<compile_context>
chip_gen: v6e
topology: v6e:2x2x1
jax: 0.10.0
libtpu: 0.0.40
codegen_flags: <defaults>
</compile_context>

<pallas_src>
import functools

import jax
import jax.numpy as jnp
from jax.experimental import pallas as pl
from jax.experimental.pallas import tpu as pltpu

NEG_SLOPE = 0.2
BN_EPS = 1e-5
# Re-derive per generation: v7x has 64 MiB VMEM, v5e has a 16 MiB scoped
# default (the explicit vmem_limit below keeps the request portable).
TILE_N_TARGET = 128


def _pick_tile_n(n):
    """Largest tile <= TILE_N_TARGET that divides n; fall back to full N."""
    for t in (TILE_N_TARGET, 64, 32, 16):
        if t <= n and n % t == 0:
            return t
    return n


def _nbytes(shape, dtype):
    sz = 1
    for s in shape:
        sz *= s
    return sz * jnp.dtype(dtype).itemsize


def _vmem_limit(*block_bytes):
    # double-buffered blocks + headroom, clamped so the request stays portable
    # across v5e/v6e (128 MiB physical) and v7x (64 MiB physical).
    need = 2 * sum(block_bytes) + (8 << 20)
    return int(min(max(need, 32 << 20), 56 << 20))


def _leaky(x):
    return jnp.where(x > 0, x, NEG_SLOPE * x)


# ---------------------------------------------------------------------------
# Kernel A: fully fused edge-conv layer
#   knn (top-K) + one-hot MXU gather + factorized 1x1 conv (BN folded)
#   + max over K neighbors + LeakyReLU
# ---------------------------------------------------------------------------
def _edge_conv_kernel(xt_ref, xf_ref, wg_ref, wh_ref, b_ref, out_ref, *, k_nn):
    xt = xt_ref[0]                                    # (TN, C) f32  row tile
    xf = xf_ref[0]                                    # (N,  C) f32  all points
    n_cols = xf.shape[0]

    # Negative squared distance up to a per-row constant:
    #   2 <x_i, x_j> - ||x_j||^2   (row term -||x_i||^2 dropped: constant/row)
    inner = jax.lax.dot_general(
        xt, xf, (((1,), (1,)), ((), ())), preferred_element_type=jnp.float32)
    ones_row = jnp.ones((1, xf.shape[1]), jnp.float32)
    col_sq = jax.lax.dot_general(                     # (1, N) via MXU, no transpose
        ones_row, xf * xf, (((1,), (1,)), ((), ())),
        preferred_element_type=jnp.float32)
    d = 2.0 * inner - col_sq                          # (TN, N)

    ids = jax.lax.broadcasted_iota(jnp.int32, d.shape, 1).astype(jnp.float32)
    big = float(n_cols)

    # MXU operands in bf16 (exact one-hot selection; f32 accumulate).
    xf_b = xf.astype(jnp.bfloat16)
    xt_b = xt.astype(jnp.bfloat16)
    wg = wg_ref[...]                                  # (C, Cout) bf16
    wh = wh_ref[...]                                  # (C, Cout) bf16

    # Center term + folded BN bias (constant over K).
    h = jnp.dot(xt_b, wh, preferred_element_type=jnp.float32) + b_ref[...]

    # Iterative top-K: argmax + mask.  The one-hot "winner" mask used to knock
    # the winner out of d is reused as an exact gather matrix on the MXU.
    acc = None
    for _ in range(k_nn):
        m = jnp.max(d, axis=1, keepdims=True)                        # (TN, 1)
        sel = jnp.min(jnp.where(d >= m, ids, big), axis=1, keepdims=True)
        onehot = ids == sel                                          # (TN, N)
        d = jnp.where(onehot, -1e30, d)
        sel_bf = jnp.where(onehot, 1.0, 0.0).astype(jnp.bfloat16)
        nbr_x = jnp.dot(sel_bf, xf_b,
                        preferred_element_type=jnp.float32)          # (TN, C)
        g = jnp.dot(nbr_x.astype(jnp.bfloat16), wg,
                    preferred_element_type=jnp.float32)              # (TN, Cout)
        acc = g if acc is None else jnp.maximum(acc, g)              # VPU max

    # LeakyReLU is monotone and h is K-independent -> apply once after the max.
    out_ref[0] = _leaky(acc + h)


def edge_conv(x, w_g, w_h, bias, k):
    """x: (B,N,C) f32 -> (B,N,Cout) f32 (one DGCNN edge-conv layer)."""
    B, N, C = x.shape
    Cout = w_g.shape[1]
    tn = _pick_tile_n(N)
    vmem = _vmem_limit(
        _nbytes((tn, C), jnp.float32), _nbytes((N, C), jnp.float32),
        2 * _nbytes((C, Cout), jnp.bfloat16), _nbytes((1, Cout), jnp.float32),
        _nbytes((tn, Cout), jnp.float32),
        3 * _nbytes((tn, N), jnp.float32))        # d / ids / onehot temporaries
    kernel = functools.partial(_edge_conv_kernel, k_nn=k)
    return pl.pallas_call(
        kernel,
        out_shape=jax.ShapeDtypeStruct((B, N, Cout), jnp.float32),
        grid=(B, N // tn),
        in_specs=[
            pl.BlockSpec((1, tn, C), lambda b, n: (b, n, 0)),   # row tile
            pl.BlockSpec((1, N, C), lambda b, n: (b, 0, 0)),    # all points
            pl.BlockSpec((C, Cout), lambda b, n: (0, 0)),
            pl.BlockSpec((C, Cout), lambda b, n: (0, 0)),
            pl.BlockSpec((1, Cout), lambda b, n: (0, 0)),
        ],
        out_specs=pl.BlockSpec((1, tn, Cout), lambda b, n: (b, n, 0)),
        compiler_params=pltpu.CompilerParams(
            dimension_semantics=("parallel", "parallel"),
            vmem_limit_bytes=vmem),
    )(x, x, w_g, w_h, bias)


# ---------------------------------------------------------------------------
# Kernel B: streaming conv5 (1x1, BN folded, implicit channel concat of
#           x1..x4 via weight row-blocks) + LeakyReLU + global max over N,
#           fused with the (512, F) embedding matmul on the last N tile.
# ---------------------------------------------------------------------------
def _conv5_embed_kernel(x1_ref, x2_ref, x3_ref, x4_ref,
                        w5_ref, b5_ref, we_ref, out_ref, acc_ref):
    n = pl.program_id(1)

    @pl.when(n == 0)
    def _init():
        acc_ref[...] = jnp.full(acc_ref.shape, -jnp.inf, jnp.float32)

    y = None
    offs = 0
    for x_ref in (x1_ref, x2_ref, x3_ref, x4_ref):
        c = x_ref.shape[2]
        part = jnp.dot(x_ref[0].astype(jnp.bfloat16),
                       w5_ref[offs:offs + c, :],
                       preferred_element_type=jnp.float32)
        y = part if y is None else y + part
        offs += c
    y = _leaky(y + b5_ref[...])                                   # (TN, 512)
    acc_ref[...] = jnp.maximum(acc_ref[...], jnp.max(y, axis=0, keepdims=True))

    @pl.when(n == pl.num_programs(1) - 1)
    def _finish():
        out_ref[0] = jnp.dot(acc_ref[...], we_ref[...],
                             preferred_element_type=jnp.float32)


def conv5_max_embed(x1, x2, x3, x4, w5, b5, w_emb):
    """x1..x4: (B,N,Ci) f32 (C1+..+C4 = 512) -> features (B, F) f32."""
    B, N, _ = x1.shape
    cin = w5.shape[0]
    F = w_emb.shape[1]
    tn = _pick_tile_n(N)
    c1, c2, c3, c4 = (x1.shape[2], x2.shape[2], x3.shape[2], x4.shape[2])
    vmem = _vmem_limit(
        _nbytes((tn, c1), jnp.float32), _nbytes((tn, c2), jnp.float32),
        _nbytes((tn, c3), jnp.float32), _nbytes((tn, c4), jnp.float32),
        _nbytes((cin, cin), jnp.bfloat16), _nbytes((cin, F), jnp.float32),
        _nbytes((1, F), jnp.float32), _nbytes((tn, cin), jnp.float32))
    out = pl.pallas_call(
        _conv5_embed_kernel,
        out_shape=jax.ShapeDtypeStruct((B, 1, F), jnp.float32),
        grid=(B, N // tn),
        in_specs=[
            pl.BlockSpec((1, tn, c1), lambda b, n: (b, n, 0)),
            pl.BlockSpec((1, tn, c2), lambda b, n: (b, n, 0)),
            pl.BlockSpec((1, tn, c3), lambda b, n: (b, n, 0)),
            pl.BlockSpec((1, tn, c4), lambda b, n: (b, n, 0)),
            pl.BlockSpec((cin, cin), lambda b, n: (0, 0)),
            pl.BlockSpec((1, cin), lambda b, n: (0, 0)),
            pl.BlockSpec((cin, F), lambda b, n: (0, 0)),
        ],
        out_specs=pl.BlockSpec((1, 1, F), lambda b, n: (b, 0, 0)),
        scratch_shapes=[pltpu.VMEM((1, cin), jnp.float32)],
        compiler_params=pltpu.CompilerParams(
            dimension_semantics=("parallel", "arbitrary"),
            vmem_limit_bytes=vmem),
    )(x1, x2, x3, x4, w5, b5, w_emb)
    return out.reshape(B, F)


# ---------------------------------------------------------------------------
# Parameters (mirroring the PyTorch module) + BN folding / bf16 pre-cast
# ---------------------------------------------------------------------------
def init_params(key, num_features):
    dims = [(6, 64), (128, 64), (128, 128), (256, 256), (512, 512)]
    keys = jax.random.split(key, 2 * len(dims) + 1)
    params = {}
    for i, (cin, cout) in enumerate(dims):
        w = jax.random.normal(keys[2 * i], (cin, cout), jnp.float32)
        w = w * (2.0 / cin) ** 0.5
        gamma = 1.0 + 0.1 * jax.random.normal(keys[2 * i + 1], (cout,), jnp.float32)
        beta = jnp.zeros((cout,), jnp.float32)
        mean = jnp.zeros((cout,), jnp.float32)
        var = jnp.ones((cout,), jnp.float32)
        params[f"w{i + 1}"] = w
        params[f"bn{i + 1}"] = (gamma, beta, mean, var)
    # nn.Linear(512, num_features, bias=False), stored as (512, F)
    params["w_emb"] = jax.random.normal(
        keys[-1], (512, num_features), jnp.float32) * (1.0 / 512.0) ** 0.5
    return params


def fold_params(params, num_features):
    """Fold eval-mode BN into the conv weights; pre-cast MXU operands to bf16."""
    fp = {}
    for i in range(1, 5):
        w = params[f"w{i}"]                                     # (2C, Cout)
        gamma, beta, mean, var = params[f"bn{i}"]
        scale = gamma / jnp.sqrt(var + BN_EPS)
        bias = beta - mean * scale
        c = w.shape[0] // 2
        w_a, w_b = w[:c], w[c:]                 # rows for (nbr - ctr) / ctr
        fp[f"wg{i}"] = (w_a * scale[None, :]).astype(jnp.bfloat16)
        fp[f"wh{i}"] = ((w_b - w_a) * scale[None, :]).astype(jnp.bfloat16)
        fp[f"b{i}"] = bias[None, :]                             # f32 (1, Cout)
    w5 = params["w5"]
    gamma, beta, mean, var = params["bn5"]
    scale = gamma / jnp.sqrt(var + BN_EPS)
    fp["w5"] = (w5 * scale[None, :]).astype(jnp.bfloat16)
    fp["b5"] = (beta - mean * scale)[None, :]
    if num_features != 512:
        fp["w_emb"] = params["w_emb"]                           # f32 (512, F)
    else:
        fp["w_emb"] = jnp.eye(512, dtype=jnp.float32)           # reference skips it
    return fp


# ---------------------------------------------------------------------------
# Forward pass
# ---------------------------------------------------------------------------
def dgcnn_encoder(points, fp, k):
    """points: (B, N, 3) f32 -> features (B, num_features) f32."""
    x = points
    layer_outputs = []
    for i in range(1, 5):
        x = edge_conv(x, fp[f"wg{i}"], fp[f"wh{i}"], fp[f"b{i}"], k)
        layer_outputs.append(x)
    x1, x2, x3, x4 = layer_outputs
    return conv5_max_embed(x1, x2, x3, x4, fp["w5"], fp["b5"], fp["w_emb"])


if __name__ == "__main__":
    B, N, K = 2, 16, 4            # small shapes; k scaled down from 20 for N=16
    NUM_FEATURES = 32

    key = jax.random.PRNGKey(0)
    k_pts, k_par = jax.random.split(key)
    points = jax.random.normal(k_pts, (B, N, 3), jnp.float32)
    params = init_params(k_par, NUM_FEATURES)
    fp = fold_params(params, NUM_FEATURES)

    fwd = jax.jit(functools.partial(dgcnn_encoder, k=K))
    feats = fwd(points, fp)
    feats = jax.block_until_ready(feats)

    assert feats.shape == (B, NUM_FEATURES), feats.shape
    assert bool(jnp.all(jnp.isfinite(feats)))
    print("KERNEL_OK")
</pallas_src>

<mosaic_0001>
module attributes {stable_mosaic.version = 11 : i64} {
  func.func @_edge_conv_kernel(%arg0: i32, %arg1: i32, %arg2: memref<1x16x64xf32, #tpu.memory_space<vmem>>, %arg3: memref<1x16x64xf32, #tpu.memory_space<vmem>>, %arg4: memref<64x64xbf16, #tpu.memory_space<vmem>>, %arg5: memref<64x64xbf16, #tpu.memory_space<vmem>>, %arg6: memref<1x64xf32, #tpu.memory_space<vmem>>, %arg7: memref<1x16x64xf32, #tpu.memory_space<vmem>>) attributes {dimension_semantics = [#tpu.dimension_semantics<parallel>, #tpu.dimension_semantics<parallel>], iteration_bounds = array<i64: 2, 1>, scalar_prefetch = 0 : i64, scratch_operands = 0 : i64, tpu.core_type = #tpu.core_type<tc>, window_params = [{transform_indices = @transform_0, window_bounds = array<i64: 1, 16, 64>}, {transform_indices = @transform_1, window_bounds = array<i64: 1, 16, 64>}, {pipeline_mode = #tpu.pipeline_mode<synchronous>, transform_indices = @transform_2, window_bounds = array<i64: 64, 64>}, {pipeline_mode = #tpu.pipeline_mode<synchronous>, transform_indices = @transform_3, window_bounds = array<i64: 64, 64>}, {pipeline_mode = #tpu.pipeline_mode<synchronous>, transform_indices = @transform_4, window_bounds = array<i64: 1, 64>}, {transform_indices = @transform_5, window_bounds = array<i64: 1, 16, 64>}]} {
    %c0 = arith.constant 0 : index
    %c0_0 = arith.constant 0 : index
    %c0_1 = arith.constant 0 : index
    %0 = vector.load %arg2[%c0, %c0_0, %c0_1] : memref<1x16x64xf32, #tpu.memory_space<vmem>>, vector<1x16x64xf32>
    %1 = vector.shape_cast %0 : vector<1x16x64xf32> to vector<16x64xf32>
    %c0_2 = arith.constant 0 : index
    %c0_3 = arith.constant 0 : index
    %c0_4 = arith.constant 0 : index
    %2 = vector.load %arg3[%c0_2, %c0_3, %c0_4] : memref<1x16x64xf32, #tpu.memory_space<vmem>>, vector<1x16x64xf32>
    %3 = vector.shape_cast %2 : vector<1x16x64xf32> to vector<16x64xf32>
    %cst = arith.constant dense<0.000000e+00> : vector<16x16xf32>
    %4 = tpu.matmul %1, %3, %cst {dimension_numbers = #tpu.dot_dimension_numbers<[1], [1], [0], [0], [0, 0, 1, 0], [], []>} : vector<16x64xf32>, vector<16x64xf32>, vector<16x16xf32> -> vector<16x16xf32>
    %cst_5 = arith.constant 1.000000e+00 : f32
    %5 = vector.broadcast %cst_5 : f32 to vector<1x64xf32>
    %6 = arith.mulf %3, %3 : vector<16x64xf32>
    %cst_6 = arith.constant dense<0.000000e+00> : vector<1x16xf32>
    %7 = tpu.matmul %5, %6, %cst_6 {dimension_numbers = #tpu.dot_dimension_numbers<[1], [1], [0], [0], [0, 0, 1, 0], [], []>} : vector<1x64xf32>, vector<16x64xf32>, vector<1x16xf32> -> vector<1x16xf32>
    %cst_7 = arith.constant 2.000000e+00 : f32
    %8 = vector.broadcast %cst_7 : f32 to vector<16x16xf32>
    %9 = arith.mulf %8, %4 : vector<16x16xf32>
    %10 = vector.broadcast %7 : vector<1x16xf32> to vector<16x16xf32>
    %11 = arith.subf %9, %10 : vector<16x16xf32>
    %12 = tpu.iota {dimensions = array<i32: 1>} : vector<16x16xi32>
    %13 = arith.sitofp %12 : vector<16x16xi32> to vector<16x16xf32>
    %14 = arith.truncf %3 : vector<16x64xf32> to vector<16x64xbf16>
    %15 = arith.truncf %1 : vector<16x64xf32> to vector<16x64xbf16>
    %c0_8 = arith.constant 0 : index
    %c0_9 = arith.constant 0 : index
    %16 = vector.load %arg4[%c0_8, %c0_9] : memref<64x64xbf16, #tpu.memory_space<vmem>>, vector<64x64xbf16>
    %c0_10 = arith.constant 0 : index
    %c0_11 = arith.constant 0 : index
    %17 = vector.load %arg5[%c0_10, %c0_11] : memref<64x64xbf16, #tpu.memory_space<vmem>>, vector<64x64xbf16>
    %cst_12 = arith.constant dense<0.000000e+00> : vector<16x64xf32>
    %18 = tpu.matmul %15, %17, %cst_12 {dimension_numbers = #tpu.dot_dimension_numbers<[1], [0], [0], [1], [0, 0, 1, 1], [], []>} : vector<16x64xbf16>, vector<64x64xbf16>, vector<16x64xf32> -> vector<16x64xf32>
    %c0_13 = arith.constant 0 : index
    %c0_14 = arith.constant 0 : index
    %19 = vector.load %arg6[%c0_13, %c0_14] : memref<1x64xf32, #tpu.memory_space<vmem>>, vector<1x64xf32>
    %20 = vector.broadcast %19 : vector<1x64xf32> to vector<16x64xf32>
    %21 = arith.addf %18, %20 : vector<16x64xf32>
    %cst_15 = arith.constant dense<0xFF800000> : vector<16xf32>
    %22 = vector.multi_reduction <maximumf>, %11, %cst_15 [1] : vector<16x16xf32> to vector<16xf32>
    %23 = vector.shape_cast %22 : vector<16xf32> to vector<16x1xf32>
    %24 = vector.broadcast %23 : vector<16x1xf32> to vector<16x16xf32>
    %25 = arith.cmpf oge, %11, %24 : vector<16x16xf32>
    %cst_16 = arith.constant 1.600000e+01 : f32
    %26 = vector.broadcast %cst_16 : f32 to vector<16x16xf32>
    %27 = arith.select %25, %13, %26 : vector<16x16xi1>, vector<16x16xf32>
    %cst_17 = arith.constant dense<0x7F800000> : vector<16xf32>
    %28 = vector.multi_reduction <minimumf>, %27, %cst_17 [1] : vector<16x16xf32> to vector<16xf32>
    %29 = vector.shape_cast %28 : vector<16xf32> to vector<16x1xf32>
    %30 = vector.broadcast %29 : vector<16x1xf32> to vector<16x16xf32>
    %31 = arith.cmpf oeq, %13, %30 : vector<16x16xf32>
    %cst_18 = arith.constant -1.000000e+30 : f32
    %32 = vector.broadcast %cst_18 : f32 to vector<16x16xf32>
    %33 = arith.select %31, %32, %11 : vector<16x16xi1>, vector<16x16xf32>
    %cst_19 = arith.constant 1.000000e+00 : f32
    %cst_20 = arith.constant 0.000000e+00 : f32
    %34 = vector.broadcast %cst_19 : f32 to vector<16x16xf32>
    %35 = vector.broadcast %cst_20 : f32 to vector<16x16xf32>
    %36 = arith.select %31, %34, %35 : vector<16x16xi1>, vector<16x16xf32>
    %37 = arith.truncf %36 : vector<16x16xf32> to vector<16x16xbf16>
    %cst_21 = arith.constant dense<0.000000e+00> : vector<16x64xf32>
    %38 = tpu.matmul %37, %14, %cst_21 {dimension_numbers = #tpu.dot_dimension_numbers<[1], [0], [0], [1], [0, 0, 1, 1], [], []>} : vector<16x16xbf16>, vector<16x64xbf16>, vector<16x64xf32> -> vector<16x64xf32>
    %39 = arith.truncf %38 : vector<16x64xf32> to vector<16x64xbf16>
    %cst_22 = arith.constant dense<0.000000e+00> : vector<16x64xf32>
    %40 = tpu.matmul %39, %16, %cst_22 {dimension_numbers = #tpu.dot_dimension_numbers<[1], [0], [0], [1], [0, 0, 1, 1], [], []>} : vector<16x64xbf16>, vector<64x64xbf16>, vector<16x64xf32> -> vector<16x64xf32>
    %cst_23 = arith.constant dense<0xFF800000> : vector<16xf32>
    %41 = vector.multi_reduction <maximumf>, %33, %cst_23 [1] : vector<16x16xf32> to vector<16xf32>
    %42 = vector.shape_cast %41 : vector<16xf32> to vector<16x1xf32>
    %43 = vector.broadcast %42 : vector<16x1xf32> to vector<16x16xf32>
    %44 = arith.cmpf oge, %33, %43 : vector<16x16xf32>
    %cst_24 = arith.constant 1.600000e+01 : f32
    %45 = vector.broadcast %cst_24 : f32 to vector<16x16xf32>
    %46 = arith.select %44, %13, %45 : vector<16x16xi1>, vector<16x16xf32>
    %cst_25 = arith.constant dense<0x7F800000> : vector<16xf32>
    %47 = vector.multi_reduction <minimumf>, %46, %cst_25 [1] : vector<16x16xf32> to vector<16xf32>
    %48 = vector.shape_cast %47 : vector<16xf32> to vector<16x1xf32>
    %49 = vector.broadcast %48 : vector<16x1xf32> to vector<16x16xf32>
    %50 = arith.cmpf oeq, %13, %49 : vector<16x16xf32>
    %cst_26 = arith.constant -1.000000e+30 : f32
    %51 = vector.broadcast %cst_26 : f32 to vector<16x16xf32>
    %52 = arith.select %50, %51, %33 : vector<16x16xi1>, vector<16x16xf32>
    %cst_27 = arith.constant 1.000000e+00 : f32
    %cst_28 = arith.constant 0.000000e+00 : f32
    %53 = vector.broadcast %cst_27 : f32 to vector<16x16xf32>
    %54 = vector.broadcast %cst_28 : f32 to vector<16x16xf32>
    %55 = arith.select %50, %53, %54 : vector<16x16xi1>, vector<16x16xf32>
    %56 = arith.truncf %55 : vector<16x16xf32> to vector<16x16xbf16>
    %cst_29 = arith.constant dense<0.000000e+00> : vector<16x64xf32>
    %57 = tpu.matmul %56, %14, %cst_29 {dimension_numbers = #tpu.dot_dimension_numbers<[1], [0], [0], [1], [0, 0, 1, 1], [], []>} : vector<16x16xbf16>, vector<16x64xbf16>, vector<16x64xf32> -> vector<16x64xf32>
    %58 = arith.truncf %57 : vector<16x64xf32> to vector<16x64xbf16>
    %cst_30 = arith.constant dense<0.000000e+00> : vector<16x64xf32>
    %59 = tpu.matmul %58, %16, %cst_30 {dimension_numbers = #tpu.dot_dimension_numbers<[1], [0], [0], [1], [0, 0, 1, 1], [], []>} : vector<16x64xbf16>, vector<64x64xbf16>, vector<16x64xf32> -> vector<16x64xf32>
    %60 = arith.maximumf %40, %59 : vector<16x64xf32>
    %cst_31 = arith.constant dense<0xFF800000> : vector<16xf32>
    %61 = vector.multi_reduction <maximumf>, %52, %cst_31 [1] : vector<16x16xf32> to vector<16xf32>
    %62 = vector.shape_cast %61 : vector<16xf32> to vector<16x1xf32>
    %63 = vector.broadcast %62 : vector<16x1xf32> to vector<16x16xf32>
    %64 = arith.cmpf oge, %52, %63 : vector<16x16xf32>
    %cst_32 = arith.constant 1.600000e+01 : f32
    %65 = vector.broadcast %cst_32 : f32 to vector<16x16xf32>
    %66 = arith.select %64, %13, %65 : vector<16x16xi1>, vector<16x16xf32>
    %cst_33 = arith.constant dense<0x7F800000> : vector<16xf32>
    %67 = vector.multi_reduction <minimumf>, %66, %cst_33 [1] : vector<16x16xf32> to vector<16xf32>
    %68 = vector.shape_cast %67 : vector<16xf32> to vector<16x1xf32>
    %69 = vector.broadcast %68 : vector<16x1xf32> to vector<16x16xf32>
    %70 = arith.cmpf oeq, %13, %69 : vector<16x16xf32>
    %cst_34 = arith.constant -1.000000e+30 : f32
    %71 = vector.broadcast %cst_34 : f32 to vector<16x16xf32>
    %72 = arith.select %70, %71, %52 : vector<16x16xi1>, vector<16x16xf32>
    %cst_35 = arith.constant 1.000000e+00 : f32
    %cst_36 = arith.constant 0.000000e+00 : f32
    %73 = vector.broadcast %cst_35 : f32 to vector<16x16xf32>
    %74 = vector.broadcast %cst_36 : f32 to vector<16x16xf32>
    %75 = arith.select %70, %73, %74 : vector<16x16xi1>, vector<16x16xf32>
    %76 = arith.truncf %75 : vector<16x16xf32> to vector<16x16xbf16>
    %cst_37 = arith.constant dense<0.000000e+00> : vector<16x64xf32>
    %77 = tpu.matmul %76, %14, %cst_37 {dimension_numbers = #tpu.dot_dimension_numbers<[1], [0], [0], [1], [0, 0, 1, 1], [], []>} : vector<16x16xbf16>, vector<16x64xbf16>, vector<16x64xf32> -> vector<16x64xf32>
    %78 = arith.truncf %77 : vector<16x64xf32> to vector<16x64xbf16>
    %cst_38 = arith.constant dense<0.000000e+00> : vector<16x64xf32>
    %79 = tpu.matmul %78, %16, %cst_38 {dimension_numbers = #tpu.dot_dimension_numbers<[1], [0], [0], [1], [0, 0, 1, 1], [], []>} : vector<16x64xbf16>, vector<64x64xbf16>, vector<16x64xf32> -> vector<16x64xf32>
    %80 = arith.maximumf %60, %79 : vector<16x64xf32>
    %cst_39 = arith.constant dense<0xFF800000> : vector<16xf32>
    %81 = vector.multi_reduction <maximumf>, %72, %cst_39 [1] : vector<16x16xf32> to vector<16xf32>
    %82 = vector.shape_cast %81 : vector<16xf32> to vector<16x1xf32>
    %83 = vector.broadcast %82 : vector<16x1xf32> to vector<16x16xf32>
    %84 = arith.cmpf oge, %72, %83 : vector<16x16xf32>
    %cst_40 = arith.constant 1.600000e+01 : f32
    %85 = vector.broadcast %cst_40 : f32 to vector<16x16xf32>
    %86 = arith.select %84, %13, %85 : vector<16x16xi1>, vector<16x16xf32>
    %cst_41 = arith.constant dense<0x7F800000> : vector<16xf32>
    %87 = vector.multi_reduction <minimumf>, %86, %cst_41 [1] : vector<16x16xf32> to vector<16xf32>
    %88 = vector.shape_cast %87 : vector<16xf32> to vector<16x1xf32>
    %89 = vector.broadcast %88 : vector<16x1xf32> to vector<16x16xf32>
    %90 = arith.cmpf oeq, %13, %89 : vector<16x16xf32>
    %cst_42 = arith.constant 1.000000e+00 : f32
    %cst_43 = arith.constant 0.000000e+00 : f32
    %91 = vector.broadcast %cst_42 : f32 to vector<16x16xf32>
    %92 = vector.broadcast %cst_43 : f32 to vector<16x16xf32>
    %93 = arith.select %90, %91, %92 : vector<16x16xi1>, vector<16x16xf32>
    %94 = arith.truncf %93 : vector<16x16xf32> to vector<16x16xbf16>
    %cst_44 = arith.constant dense<0.000000e+00> : vector<16x64xf32>
    %95 = tpu.matmul %94, %14, %cst_44 {dimension_numbers = #tpu.dot_dimension_numbers<[1], [0], [0], [1], [0, 0, 1, 1], [], []>} : vector<16x16xbf16>, vector<16x64xbf16>, vector<16x64xf32> -> vector<16x64xf32>
    %96 = arith.truncf %95 : vector<16x64xf32> to vector<16x64xbf16>
    %cst_45 = arith.constant dense<0.000000e+00> : vector<16x64xf32>
    %97 = tpu.matmul %96, %16, %cst_45 {dimension_numbers = #tpu.dot_dimension_numbers<[1], [0], [0], [1], [0, 0, 1, 1], [], []>} : vector<16x64xbf16>, vector<64x64xbf16>, vector<16x64xf32> -> vector<16x64xf32>
    %98 = arith.maximumf %80, %97 : vector<16x64xf32>
    %99 = arith.addf %98, %21 : vector<16x64xf32>
    %cst_46 = arith.constant 0.000000e+00 : f32
    %100 = vector.broadcast %cst_46 : f32 to vector<16x64xf32>
    %101 = arith.cmpf ogt, %99, %100 : vector<16x64xf32>
    %cst_47 = arith.constant 2.000000e-01 : f32
    %102 = vector.broadcast %cst_47 : f32 to vector<16x64xf32>
    %103 = arith.mulf %102, %99 : vector<16x64xf32>
    %104 = arith.select %101, %99, %103 : vector<16x64xi1>, vector<16x64xf32>
    %c0_48 = arith.constant 0 : index
    %c0_49 = arith.constant 0 : index
    %c0_50 = arith.constant 0 : index
    %105 = vector.load %arg7[%c0_48, %c0_49, %c0_50] : memref<1x16x64xf32, #tpu.memory_space<vmem>>, vector<1x16x64xf32>
    %106 = vector.shape_cast %105 : vector<1x16x64xf32> to vector<16x64xf32>
    %107 = vector.shape_cast %104 : vector<16x64xf32> to vector<1x16x64xf32>
    tpu.vector_store %arg7[%c0_48, %c0_49, %c0_50], %107 {strides = array<i32>} : memref<1x16x64xf32, #tpu.memory_space<vmem>>, vector<1x16x64xf32>,
    return
  }
  func.func @transform_0(%arg0: i32, %arg1: i32) -> (i32, i32, i32) {
    %c0_i32 = arith.constant 0 : i32
    %c0_i32_0 = arith.constant 0 : i32
    return %arg0, %arg1, %c0_i32 : i32, i32, i32
  }
  func.func @transform_1(%arg0: i32, %arg1: i32) -> (i32, i32, i32) {
    %c0_i32 = arith.constant 0 : i32
    %c0_i32_0 = arith.constant 0 : i32
    %c0_i32_1 = arith.constant 0 : i32
    return %arg0, %c0_i32, %c0_i32_0 : i32, i32, i32
  }
  func.func @transform_2(%arg0: i32, %arg1: i32) -> (i32, i32) {
    %c0_i32 = arith.constant 0 : i32
    %c0_i32_0 = arith.constant 0 : i32
    %c0_i32_1 = arith.constant 0 : i32
    return %c0_i32, %c0_i32_0 : i32, i32
  }
  func.func @transform_3(%arg0: i32, %arg1: i32) -> (i32, i32) {
    %c0_i32 = arith.constant 0 : i32
    %c0_i32_0 = arith.constant 0 : i32
    %c0_i32_1 = arith.constant 0 : i32
    return %c0_i32, %c0_i32_0 : i32, i32
  }
  func.func @transform_4(%arg0: i32, %arg1: i32) -> (i32, i32) {
    %c0_i32 = arith.constant 0 : i32
    %c0_i32_0 = arith.constant 0 : i32
    %c0_i32_1 = arith.constant 0 : i32
    return %c0_i32, %c0_i32_0 : i32, i32
  }
  func.func @transform_5(%arg0: i32, %arg1: i32) -> (i32, i32, i32) {
    %c0_i32 = arith.constant 0 : i32
    %c0_i32_0 = arith.constant 0 : i32
    return %arg0, %arg1, %c0_i32 : i32, i32, i32
  }
}

module attributes {stable_mosaic.version = 11 : i64} {
  func.func @_edge_conv_kernel(%arg0: i32, %arg1: i32, %arg2: memref<1x16x64xf32, #tpu.memory_space<vmem>>, %arg3: memref<1x16x64xf32, #tpu.memory_space<vmem>>, %arg4: memref<64x128xbf16, #tpu.memory_space<vmem>>, %arg5: memref<64x128xbf16, #tpu.memory_space<vmem>>, %arg6: memref<1x128xf32, #tpu.memory_space<vmem>>, %arg7: memref<1x16x128xf32, #tpu.memory_space<vmem>>) attributes {dimension_semantics = [#tpu.dimension_semantics<parallel>, #tpu.dimension_semantics<parallel>], iteration_bounds = array<i64: 2, 1>, scalar_prefetch = 0 : i64, scratch_operands = 0 : i64, tpu.core_type = #tpu.core_type<tc>, window_params = [{transform_indices = @transform_0, window_bounds = array<i64: 1, 16, 64>}, {transform_indices = @transform_1, window_bounds = array<i64: 1, 16, 64>}, {pipeline_mode = #tpu.pipeline_mode<synchronous>, transform_indices = @transform_2, window_bounds = array<i64: 64, 128>}, {pipeline_mode = #tpu.pipeline_mode<synchronous>, transform_indices = @transform_3, window_bounds = array<i64: 64, 128>}, {pipeline_mode = #tpu.pipeline_mode<synchronous>, transform_indices = @transform_4, window_bounds = array<i64: 1, 128>}, {transform_indices = @transform_5, window_bounds = array<i64: 1, 16, 128>}]} {
    %c0 = arith.constant 0 : index
    %c0_0 = arith.constant 0 : index
    %c0_1 = arith.constant 0 : index
    %0 = vector.load %arg2[%c0, %c0_0, %c0_1] : memref<1x16x64xf32, #tpu.memory_space<vmem>>, vector<1x16x64xf32>
    %1 = vector.shape_cast %0 : vector<1x16x64xf32> to vector<16x64xf32>
    %c0_2 = arith.constant 0 : index
    %c0_3 = arith.constant 0 : index
    %c0_4 = arith.constant 0 : index
    %2 = vector.load %arg3[%c0_2, %c0_3, %c0_4] : memref<1x16x64xf32, #tpu.memory_space<vmem>>, vector<1x16x64xf32>
    %3 = vector.shape_cast %2 : vector<1x16x64xf32> to vector<16x64xf32>
    %cst = arith.constant dense<0.000000e+00> : vector<16x16xf32>
    %4 = tpu.matmul %1, %3, %cst {dimension_numbers = #tpu.dot_dimension_numbers<[1], [1], [0], [0], [0, 0, 1, 0], [], []>} : vector<16x64xf32>, vector<16x64xf32>, vector<16x16xf32> -> vector<16x16xf32>
    %cst_5 = arith.constant 1.000000e+00 : f32
    %5 = vector.broadcast %cst_5 : f32 to vector<1x64xf32>
    %6 = arith.mulf %3, %3 : vector<16x64xf32>
    %cst_6 = arith.constant dense<0.000000e+00> : vector<1x16xf32>
    %7 = tpu.matmul %5, %6, %cst_6 {dimension_numbers = #tpu.dot_dimension_numbers<[1], [1], [0], [0], [0, 0, 1, 0], [], []>} : vector<1x64xf32>, vector<16x64xf32>, vector<1x16xf32> -> vector<1x16xf32>
    %cst_7 = arith.constant 2.000000e+00 : f32
    %8 = vector.broadcast %cst_7 : f32 to vector<16x16xf32>
    %9 = arith.mulf %8, %4 : vector<16x16xf32>
    %10 = vector.broadcast %7 : vector<1x16xf32> to vector<16x16xf32>
    %11 = arith.subf %9, %10 : vector<16x16xf32>
    %12 = tpu.iota {dimensions = array<i32: 1>} : vector<16x16xi32>
    %13 = arith.sitofp %12 : vector<16x16xi32> to vector<16x16xf32>
    %14 = arith.truncf %3 : vector<16x64xf32> to vector<16x64xbf16>
    %15 = arith.truncf %1 : vector<16x64xf32> to vector<16x64xbf16>
    %c0_8 = arith.constant 0 : index
    %c0_9 = arith.constant 0 : index
    %16 = vector.load %arg4[%c0_8, %c0_9] : memref<64x128xbf16, #tpu.memory_space<vmem>>, vector<64x128xbf16>
    %c0_10 = arith.constant 0 : index
    %c0_11 = arith.constant 0 : index
    %17 = vector.load %arg5[%c0_10, %c0_11] : memref<64x128xbf16, #tpu.memory_space<vmem>>, vector<64x128xbf16>
    %cst_12 = arith.constant dense<0.000000e+00> : vector<16x128xf32>
    %18 = tpu.matmul %15, %17, %cst_12 {dimension_numbers = #tpu.dot_dimension_numbers<[1], [0], [0], [1], [0, 0, 1, 1], [], []>} : vector<16x64xbf16>, vector<64x128xbf16>, vector<16x128xf32> -> vector<16x128xf32>
    %c0_13 = arith.constant 0 : index
    %c0_14 = arith.constant 0 : index
    %19 = vector.load %arg6[%c0_13, %c0_14] : memref<1x128xf32, #tpu.memory_space<vmem>>, vector<1x128xf32>
    %20 = vector.broadcast %19 : vector<1x128xf32> to vector<16x128xf32>
    %21 = arith.addf %18, %20 : vector<16x128xf32>
    %cst_15 = arith.constant dense<0xFF800000> : vector<16xf32>
    %22 = vector.multi_reduction <maximumf>, %11, %cst_15 [1] : vector<16x16xf32> to vector<16xf32>
    %23 = vector.shape_cast %22 : vector<16xf32> to vector<16x1xf32>
    %24 = vector.broadcast %23 : vector<16x1xf32> to vector<16x16xf32>
    %25 = arith.cmpf oge, %11, %24 : vector<16x16xf32>
    %cst_16 = arith.constant 1.600000e+01 : f32
    %26 = vector.broadcast %cst_16 : f32 to vector<16x16xf32>
    %27 = arith.select %25, %13, %26 : vector<16x16xi1>, vector<16x16xf32>
    %cst_17 = arith.constant dense<0x7F800000> : vector<16xf32>
    %28 = vector.multi_reduction <minimumf>, %27, %cst_17 [1] : vector<16x16xf32> to vector<16xf32>
    %29 = vector.shape_cast %28 : vector<16xf32> to vector<16x1xf32>
    %30 = vector.broadcast %29 : vector<16x1xf32> to vector<16x16xf32>
    %31 = arith.cmpf oeq, %13, %30 : vector<16x16xf32>
    %cst_18 = arith.constant -1.000000e+30 : f32
    %32 = vector.broadcast %cst_18 : f32 to vector<16x16xf32>
    %33 = arith.select %31, %32, %11 : vector<16x16xi1>, vector<16x16xf32>
    %cst_19 = arith.constant 1.000000e+00 : f32
    %cst_20 = arith.constant 0.000000e+00 : f32
    %34 = vector.broadcast %cst_19 : f32 to vector<16x16xf32>
    %35 = vector.broadcast %cst_20 : f32 to vector<16x16xf32>
    %36 = arith.select %31, %34, %35 : vector<16x16xi1>, vector<16x16xf32>
    %37 = arith.truncf %36 : vector<16x16xf32> to vector<16x16xbf16>
    %cst_21 = arith.constant dense<0.000000e+00> : vector<16x64xf32>
    %38 = tpu.matmul %37, %14, %cst_21 {dimension_numbers = #tpu.dot_dimension_numbers<[1], [0], [0], [1], [0, 0, 1, 1], [], []>} : vector<16x16xbf16>, vector<16x64xbf16>, vector<16x64xf32> -> vector<16x64xf32>
    %39 = arith.truncf %38 : vector<16x64xf32> to vector<16x64xbf16>
    %cst_22 = arith.constant dense<0.000000e+00> : vector<16x128xf32>
    %40 = tpu.matmul %39, %16, %cst_22 {dimension_numbers = #tpu.dot_dimension_numbers<[1], [0], [0], [1], [0, 0, 1, 1], [], []>} : vector<16x64xbf16>, vector<64x128xbf16>, vector<16x128xf32> -> vector<16x128xf32>
    %cst_23 = arith.constant dense<0xFF800000> : vector<16xf32>
    %41 = vector.multi_reduction <maximumf>, %33, %cst_23 [1] : vector<16x16xf32> to vector<16xf32>
    %42 = vector.shape_cast %41 : vector<16xf32> to vector<16x1xf32>
    %43 = vector.broadcast %42 : vector<16x1xf32> to vector<16x16xf32>
    %44 = arith.cmpf oge, %33, %43 : vector<16x16xf32>
    %cst_24 = arith.constant 1.600000e+01 : f32
    %45 = vector.broadcast %cst_24 : f32 to vector<16x16xf32>
    %46 = arith.select %44, %13, %45 : vector<16x16xi1>, vector<16x16xf32>
    %cst_25 = arith.constant dense<0x7F800000> : vector<16xf32>
    %47 = vector.multi_reduction <minimumf>, %46, %cst_25 [1] : vector<16x16xf32> to vector<16xf32>
    %48 = vector.shape_cast %47 : vector<16xf32> to vector<16x1xf32>
    %49 = vector.broadcast %48 : vector<16x1xf32> to vector<16x16xf32>
    %50 = arith.cmpf oeq, %13, %49 : vector<16x16xf32>
    %cst_26 = arith.constant -1.000000e+30 : f32
    %51 = vector.broadcast %cst_26 : f32 to vector<16x16xf32>
    %52 = arith.select %50, %51, %33 : vector<16x16xi1>, vector<16x16xf32>
    %cst_27 = arith.constant 1.000000e+00 : f32
    %cst_28 = arith.constant 0.000000e+00 : f32
    %53 = vector.broadcast %cst_27 : f32 to vector<16x16xf32>
    %54 = vector.broadcast %cst_28 : f32 to vector<16x16xf32>
    %55 = arith.select %50, %53, %54 : vector<16x16xi1>, vector<16x16xf32>
    %56 = arith.truncf %55 : vector<16x16xf32> to vector<16x16xbf16>
    %cst_29 = arith.constant dense<0.000000e+00> : vector<16x64xf32>
    %57 = tpu.matmul %56, %14, %cst_29 {dimension_numbers = #tpu.dot_dimension_numbers<[1], [0], [0], [1], [0, 0, 1, 1], [], []>} : vector<16x16xbf16>, vector<16x64xbf16>, vector<16x64xf32> -> vector<16x64xf32>
    %58 = arith.truncf %57 : vector<16x64xf32> to vector<16x64xbf16>
    %cst_30 = arith.constant dense<0.000000e+00> : vector<16x128xf32>
    %59 = tpu.matmul %58, %16, %cst_30 {dimension_numbers = #tpu.dot_dimension_numbers<[1], [0], [0], [1], [0, 0, 1, 1], [], []>} : vector<16x64xbf16>, vector<64x128xbf16>, vector<16x128xf32> -> vector<16x128xf32>
    %60 = arith.maximumf %40, %59 : vector<16x128xf32>
    %cst_31 = arith.constant dense<0xFF800000> : vector<16xf32>
    %61 = vector.multi_reduction <maximumf>, %52, %cst_31 [1] : vector<16x16xf32> to vector<16xf32>
    %62 = vector.shape_cast %61 : vector<16xf32> to vector<16x1xf32>
    %63 = vector.broadcast %62 : vector<16x1xf32> to vector<16x16xf32>
    %64 = arith.cmpf oge, %52, %63 : vector<16x16xf32>
    %cst_32 = arith.constant 1.600000e+01 : f32
    %65 = vector.broadcast %cst_32 : f32 to vector<16x16xf32>
    %66 = arith.select %64, %13, %65 : vector<16x16xi1>, vector<16x16xf32>
    %cst_33 = arith.constant dense<0x7F800000> : vector<16xf32>
    %67 = vector.multi_reduction <minimumf>, %66, %cst_33 [1] : vector<16x16xf32> to vector<16xf32>
    %68 = vector.shape_cast %67 : vector<16xf32> to vector<16x1xf32>
    %69 = vector.broadcast %68 : vector<16x1xf32> to vector<16x16xf32>
    %70 = arith.cmpf oeq, %13, %69 : vector<16x16xf32>
    %cst_34 = arith.constant -1.000000e+30 : f32
    %71 = vector.broadcast %cst_34 : f32 to vector<16x16xf32>
    %72 = arith.select %70, %71, %52 : vector<16x16xi1>, vector<16x16xf32>
    %cst_35 = arith.constant 1.000000e+00 : f32
    %cst_36 = arith.constant 0.000000e+00 : f32
    %73 = vector.broadcast %cst_35 : f32 to vector<16x16xf32>
    %74 = vector.broadcast %cst_36 : f32 to vector<16x16xf32>
    %75 = arith.select %70, %73, %74 : vector<16x16xi1>, vector<16x16xf32>
    %76 = arith.truncf %75 : vector<16x16xf32> to vector<16x16xbf16>
    %cst_37 = arith.constant dense<0.000000e+00> : vector<16x64xf32>
    %77 = tpu.matmul %76, %14, %cst_37 {dimension_numbers = #tpu.dot_dimension_numbers<[1], [0], [0], [1], [0, 0, 1, 1], [], []>} : vector<16x16xbf16>, vector<16x64xbf16>, vector<16x64xf32> -> vector<16x64xf32>
    %78 = arith.truncf %77 : vector<16x64xf32> to vector<16x64xbf16>
    %cst_38 = arith.constant dense<0.000000e+00> : vector<16x128xf32>
    %79 = tpu.matmul %78, %16, %cst_38 {dimension_numbers = #tpu.dot_dimension_numbers<[1], [0], [0], [1], [0, 0, 1, 1], [], []>} : vector<16x64xbf16>, vector<64x128xbf16>, vector<16x128xf32> -> vector<16x128xf32>
    %80 = arith.maximumf %60, %79 : vector<16x128xf32>
    %cst_39 = arith.constant dense<0xFF800000> : vector<16xf32>
    %81 = vector.multi_reduction <maximumf>, %72, %cst_39 [1] : vector<16x16xf32> to vector<16xf32>
    %82 = vector.shape_cast %81 : vector<16xf32> to vector<16x1xf32>
    %83 = vector.broadcast %82 : vector<16x1xf32> to vector<16x16xf32>
    %84 = arith.cmpf oge, %72, %83 : vector<16x16xf32>
    %cst_40 = arith.constant 1.600000e+01 : f32
    %85 = vector.broadcast %cst_40 : f32 to vector<16x16xf32>
    %86 = arith.select %84, %13, %85 : vector<16x16xi1>, vector<16x16xf32>
    %cst_41 = arith.constant dense<0x7F800000> : vector<16xf32>
    %87 = vector.multi_reduction <minimumf>, %86, %cst_41 [1] : vector<16x16xf32> to vector<16xf32>
    %88 = vector.shape_cast %87 : vector<16xf32> to vector<16x1xf32>
    %89 = vector.broadcast %88 : vector<16x1xf32> to vector<16x16xf32>
    %90 = arith.cmpf oeq, %13, %89 : vector<16x16xf32>
    %cst_42 = arith.constant 1.000000e+00 : f32
    %cst_43 = arith.constant 0.000000e+00 : f32
    %91 = vector.broadcast %cst_42 : f32 to vector<16x16xf32>
    %92 = vector.broadcast %cst_43 : f32 to vector<16x16xf32>
    %93 = arith.select %90, %91, %92 : vector<16x16xi1>, vector<16x16xf32>
    %94 = arith.truncf %93 : vector<16x16xf32> to vector<16x16xbf16>
    %cst_44 = arith.constant dense<0.000000e+00> : vector<16x64xf32>
    %95 = tpu.matmul %94, %14, %cst_44 {dimension_numbers = #tpu.dot_dimension_numbers<[1], [0], [0], [1], [0, 0, 1, 1], [], []>} : vector<16x16xbf16>, vector<16x64xbf16>, vector<16x64xf32> -> vector<16x64xf32>
    %96 = arith.truncf %95 : vector<16x64xf32> to vector<16x64xbf16>
    %cst_45 = arith.constant dense<0.000000e+00> : vector<16x128xf32>
    %97 = tpu.matmul %96, %16, %cst_45 {dimension_numbers = #tpu.dot_dimension_numbers<[1], [0], [0], [1], [0, 0, 1, 1], [], []>} : vector<16x64xbf16>, vector<64x128xbf16>, vector<16x128xf32> -> vector<16x128xf32>
    %98 = arith.maximumf %80, %97 : vector<16x128xf32>
    %99 = arith.addf %98, %21 : vector<16x128xf32>
    %cst_46 = arith.constant 0.000000e+00 : f32
    %100 = vector.broadcast %cst_46 : f32 to vector<16x128xf32>
    %101 = arith.cmpf ogt, %99, %100 : vector<16x128xf32>
    %cst_47 = arith.constant 2.000000e-01 : f32
    %102 = vector.broadcast %cst_47 : f32 to vector<16x128xf32>
    %103 = arith.mulf %102, %99 : vector<16x128xf32>
    %104 = arith.select %101, %99, %103 : vector<16x128xi1>, vector<16x128xf32>
    %c0_48 = arith.constant 0 : index
    %c0_49 = arith.constant 0 : index
    %c0_50 = arith.constant 0 : index
    %105 = vector.load %arg7[%c0_48, %c0_49, %c0_50] : memref<1x16x128xf32, #tpu.memory_space<vmem>>, vector<1x16x128xf32>
    %106 = vector.shape_cast %105 : vector<1x16x128xf32> to vector<16x128xf32>
    %107 = vector.shape_cast %104 : vector<16x128xf32> to vector<1x16x128xf32>
    tpu.vector_store %arg7[%c0_48, %c0_49, %c0_50], %107 {strides = array<i32>} : memref<1x16x128xf32, #tpu.memory_space<vmem>>, vector<1x16x128xf32>,
    return
  }
  func.func @transform_0(%arg0: i32, %arg1: i32) -> (i32, i32, i32) {
    %c0_i32 = arith.constant 0 : i32
    %c0_i32_0 = arith.constant 0 : i32
    return %arg0, %arg1, %c0_i32 : i32, i32, i32
  }
  func.func @transform_1(%arg0: i32, %arg1: i32) -> (i32, i32, i32) {
    %c0_i32 = arith.constant 0 : i32
    %c0_i32_0 = arith.constant 0 : i32
    %c0_i32_1 = arith.constant 0 : i32
    return %arg0, %c0_i32, %c0_i32_0 : i32, i32, i32
  }
  func.func @transform_2(%arg0: i32, %arg1: i32) -> (i32, i32) {
    %c0_i32 = arith.constant 0 : i32
    %c0_i32_0 = arith.constant 0 : i32
    %c0_i32_1 = arith.constant 0 : i32
    return %c0_i32, %c0_i32_0 : i32, i32
  }
  func.func @transform_3(%arg0: i32, %arg1: i32) -> (i32, i32) {
    %c0_i32 = arith.constant 0 : i32
    %c0_i32_0 = arith.constant 0 : i32
    %c0_i32_1 = arith.constant 0 : i32
    return %c0_i32, %c0_i32_0 : i32, i32
  }
  func.func @transform_4(%arg0: i32, %arg1: i32) -> (i32, i32) {
    %c0_i32 = arith.constant 0 : i32
    %c0_i32_0 = arith.constant 0 : i32
    %c0_i32_1 = arith.constant 0 : i32
    return %c0_i32, %c0_i32_0 : i32, i32
  }
  func.func @transform_5(%arg0: i32, %arg1: i32) -> (i32, i32, i32) {
    %c0_i32 = arith.constant 0 : i32
    %c0_i32_0 = arith.constant 0 : i32
    return %arg0, %arg1, %c0_i32 : i32, i32, i32
  }
}

module attributes {stable_mosaic.version = 11 : i64} {
  func.func @_edge_conv_kernel(%arg0: i32, %arg1: i32, %arg2: memref<1x16x3xf32, #tpu.memory_space<vmem>>, %arg3: memref<1x16x3xf32, #tpu.memory_space<vmem>>, %arg4: memref<3x64xbf16, #tpu.memory_space<vmem>>, %arg5: memref<3x64xbf16, #tpu.memory_space<vmem>>, %arg6: memref<1x64xf32, #tpu.memory_space<vmem>>, %arg7: memref<1x16x64xf32, #tpu.memory_space<vmem>>) attributes {dimension_semantics = [#tpu.dimension_semantics<parallel>, #tpu.dimension_semantics<parallel>], iteration_bounds = array<i64: 2, 1>, scalar_prefetch = 0 : i64, scratch_operands = 0 : i64, tpu.core_type = #tpu.core_type<tc>, window_params = [{transform_indices = @transform_0, window_bounds = array<i64: 1, 16, 3>}, {transform_indices = @transform_1, window_bounds = array<i64: 1, 16, 3>}, {pipeline_mode = #tpu.pipeline_mode<synchronous>, transform_indices = @transform_2, window_bounds = array<i64: 3, 64>}, {pipeline_mode = #tpu.pipeline_mode<synchronous>, transform_indices = @transform_3, window_bounds = array<i64: 3, 64>}, {pipeline_mode = #tpu.pipeline_mode<synchronous>, transform_indices = @transform_4, window_bounds = array<i64: 1, 64>}, {transform_indices = @transform_5, window_bounds = array<i64: 1, 16, 64>}]} {
    %c0 = arith.constant 0 : index
    %c0_0 = arith.constant 0 : index
    %c0_1 = arith.constant 0 : index
    %0 = vector.load %arg2[%c0, %c0_0, %c0_1] : memref<1x16x3xf32, #tpu.memory_space<vmem>>, vector<1x16x3xf32>
    %1 = vector.shape_cast %0 : vector<1x16x3xf32> to vector<16x3xf32>
    %c0_2 = arith.constant 0 : index
    %c0_3 = arith.constant 0 : index
    %c0_4 = arith.constant 0 : index
    %2 = vector.load %arg3[%c0_2, %c0_3, %c0_4] : memref<1x16x3xf32, #tpu.memory_space<vmem>>, vector<1x16x3xf32>
    %3 = vector.shape_cast %2 : vector<1x16x3xf32> to vector<16x3xf32>
    %cst = arith.constant dense<0.000000e+00> : vector<16x16xf32>
    %4 = tpu.matmul %1, %3, %cst {dimension_numbers = #tpu.dot_dimension_numbers<[1], [1], [0], [0], [0, 0, 1, 0], [], []>} : vector<16x3xf32>, vector<16x3xf32>, vector<16x16xf32> -> vector<16x16xf32>
    %cst_5 = arith.constant 1.000000e+00 : f32
    %5 = vector.broadcast %cst_5 : f32 to vector<1x3xf32>
    %6 = arith.mulf %3, %3 : vector<16x3xf32>
    %cst_6 = arith.constant dense<0.000000e+00> : vector<1x16xf32>
    %7 = tpu.matmul %5, %6, %cst_6 {dimension_numbers = #tpu.dot_dimension_numbers<[1], [1], [0], [0], [0, 0, 1, 0], [], []>} : vector<1x3xf32>, vector<16x3xf32>, vector<1x16xf32> -> vector<1x16xf32>
    %cst_7 = arith.constant 2.000000e+00 : f32
    %8 = vector.broadcast %cst_7 : f32 to vector<16x16xf32>
    %9 = arith.mulf %8, %4 : vector<16x16xf32>
    %10 = vector.broadcast %7 : vector<1x16xf32> to vector<16x16xf32>
    %11 = arith.subf %9, %10 : vector<16x16xf32>
    %12 = tpu.iota {dimensions = array<i32: 1>} : vector<16x16xi32>
    %13 = arith.sitofp %12 : vector<16x16xi32> to vector<16x16xf32>
    %14 = arith.truncf %3 : vector<16x3xf32> to vector<16x3xbf16>
    %15 = arith.truncf %1 : vector<16x3xf32> to vector<16x3xbf16>
    %c0_8 = arith.constant 0 : index
    %c0_9 = arith.constant 0 : index
    %16 = vector.load %arg4[%c0_8, %c0_9] : memref<3x64xbf16, #tpu.memory_space<vmem>>, vector<3x64xbf16>
    %c0_10 = arith.constant 0 : index
    %c0_11 = arith.constant 0 : index
    %17 = vector.load %arg5[%c0_10, %c0_11] : memref<3x64xbf16, #tpu.memory_space<vmem>>, vector<3x64xbf16>
    %cst_12 = arith.constant dense<0.000000e+00> : vector<16x64xf32>
    %18 = tpu.matmul %15, %17, %cst_12 {dimension_numbers = #tpu.dot_dimension_numbers<[1], [0], [0], [1], [0, 0, 1, 1], [], []>} : vector<16x3xbf16>, vector<3x64xbf16>, vector<16x64xf32> -> vector<16x64xf32>
    %c0_13 = arith.constant 0 : index
    %c0_14 = arith.constant 0 : index
    %19 = vector.load %arg6[%c0_13, %c0_14] : memref<1x64xf32, #tpu.memory_space<vmem>>, vector<1x64xf32>
    %20 = vector.broadcast %19 : vector<1x64xf32> to vector<16x64xf32>
    %21 = arith.addf %18, %20 : vector<16x64xf32>
    %cst_15 = arith.constant dense<0xFF800000> : vector<16xf32>
    %22 = vector.multi_reduction <maximumf>, %11, %cst_15 [1] : vector<16x16xf32> to vector<16xf32>
    %23 = vector.shape_cast %22 : vector<16xf32> to vector<16x1xf32>
    %24 = vector.broadcast %23 : vector<16x1xf32> to vector<16x16xf32>
    %25 = arith.cmpf oge, %11, %24 : vector<16x16xf32>
    %cst_16 = arith.constant 1.600000e+01 : f32
    %26 = vector.broadcast %cst_16 : f32 to vector<16x16xf32>
    %27 = arith.select %25, %13, %26 : vector<16x16xi1>, vector<16x16xf32>
    %cst_17 = arith.constant dense<0x7F800000> : vector<16xf32>
    %28 = vector.multi_reduction <minimumf>, %27, %cst_17 [1] : vector<16x16xf32> to vector<16xf32>
    %29 = vector.shape_cast %28 : vector<16xf32> to vector<16x1xf32>
    %30 = vector.broadcast %29 : vector<16x1xf32> to vector<16x16xf32>
    %31 = arith.cmpf oeq, %13, %30 : vector<16x16xf32>
    %cst_18 = arith.constant -1.000000e+30 : f32
    %32 = vector.broadcast %cst_18 : f32 to vector<16x16xf32>
    %33 = arith.select %31, %32, %11 : vector<16x16xi1>, vector<16x16xf32>
    %cst_19 = arith.constant 1.000000e+00 : f32
    %cst_20 = arith.constant 0.000000e+00 : f32
    %34 = vector.broadcast %cst_19 : f32 to vector<16x16xf32>
    %35 = vector.broadcast %cst_20 : f32 to vector<16x16xf32>
    %36 = arith.select %31, %34, %35 : vector<16x16xi1>, vector<16x16xf32>
    %37 = arith.truncf %36 : vector<16x16xf32> to vector<16x16xbf16>
    %cst_21 = arith.constant dense<0.000000e+00> : vector<16x3xf32>
    %38 = tpu.matmul %37, %14, %cst_21 {dimension_numbers = #tpu.dot_dimension_numbers<[1], [0], [0], [1], [0, 0, 1, 1], [], []>} : vector<16x16xbf16>, vector<16x3xbf16>, vector<16x3xf32> -> vector<16x3xf32>
    %39 = arith.truncf %38 : vector<16x3xf32> to vector<16x3xbf16>
    %cst_22 = arith.constant dense<0.000000e+00> : vector<16x64xf32>
    %40 = tpu.matmul %39, %16, %cst_22 {dimension_numbers = #tpu.dot_dimension_numbers<[1], [0], [0], [1], [0, 0, 1, 1], [], []>} : vector<16x3xbf16>, vector<3x64xbf16>, vector<16x64xf32> -> vector<16x64xf32>
    %cst_23 = arith.constant dense<0xFF800000> : vector<16xf32>
    %41 = vector.multi_reduction <maximumf>, %33, %cst_23 [1] : vector<16x16xf32> to vector<16xf32>
    %42 = vector.shape_cast %41 : vector<16xf32> to vector<16x1xf32>
    %43 = vector.broadcast %42 : vector<16x1xf32> to vector<16x16xf32>
    %44 = arith.cmpf oge, %33, %43 : vector<16x16xf32>
    %cst_24 = arith.constant 1.600000e+01 : f32
    %45 = vector.broadcast %cst_24 : f32 to vector<16x16xf32>
    %46 = arith.select %44, %13, %45 : vector<16x16xi1>, vector<16x16xf32>
    %cst_25 = arith.constant dense<0x7F800000> : vector<16xf32>
    %47 = vector.multi_reduction <minimumf>, %46, %cst_25 [1] : vector<16x16xf32> to vector<16xf32>
    %48 = vector.shape_cast %47 : vector<16xf32> to vector<16x1xf32>
    %49 = vector.broadcast %48 : vector<16x1xf32> to vector<16x16xf32>
    %50 = arith.cmpf oeq, %13, %49 : vector<16x16xf32>
    %cst_26 = arith.constant -1.000000e+30 : f32
    %51 = vector.broadcast %cst_26 : f32 to vector<16x16xf32>
    %52 = arith.select %50, %51, %33 : vector<16x16xi1>, vector<16x16xf32>
    %cst_27 = arith.constant 1.000000e+00 : f32
    %cst_28 = arith.constant 0.000000e+00 : f32
    %53 = vector.broadcast %cst_27 : f32 to vector<16x16xf32>
    %54 = vector.broadcast %cst_28 : f32 to vector<16x16xf32>
    %55 = arith.select %50, %53, %54 : vector<16x16xi1>, vector<16x16xf32>
    %56 = arith.truncf %55 : vector<16x16xf32> to vector<16x16xbf16>
    %cst_29 = arith.constant dense<0.000000e+00> : vector<16x3xf32>
    %57 = tpu.matmul %56, %14, %cst_29 {dimension_numbers = #tpu.dot_dimension_numbers<[1], [0], [0], [1], [0, 0, 1, 1], [], []>} : vector<16x16xbf16>, vector<16x3xbf16>, vector<16x3xf32> -> vector<16x3xf32>
    %58 = arith.truncf %57 : vector<16x3xf32> to vector<16x3xbf16>
    %cst_30 = arith.constant dense<0.000000e+00> : vector<16x64xf32>
    %59 = tpu.matmul %58, %16, %cst_30 {dimension_numbers = #tpu.dot_dimension_numbers<[1], [0], [0], [1], [0, 0, 1, 1], [], []>} : vector<16x3xbf16>, vector<3x64xbf16>, vector<16x64xf32> -> vector<16x64xf32>
    %60 = arith.maximumf %40, %59 : vector<16x64xf32>
    %cst_31 = arith.constant dense<0xFF800000> : vector<16xf32>
    %61 = vector.multi_reduction <maximumf>, %52, %cst_31 [1] : vector<16x16xf32> to vector<16xf32>
    %62 = vector.shape_cast %61 : vector<16xf32> to vector<16x1xf32>
    %63 = vector.broadcast %62 : vector<16x1xf32> to vector<16x16xf32>
    %64 = arith.cmpf oge, %52, %63 : vector<16x16xf32>
    %cst_32 = arith.constant 1.600000e+01 : f32
    %65 = vector.broadcast %cst_32 : f32 to vector<16x16xf32>
    %66 = arith.select %64, %13, %65 : vector<16x16xi1>, vector<16x16xf32>
    %cst_33 = arith.constant dense<0x7F800000> : vector<16xf32>
    %67 = vector.multi_reduction <minimumf>, %66, %cst_33 [1] : vector<16x16xf32> to vector<16xf32>
    %68 = vector.shape_cast %67 : vector<16xf32> to vector<16x1xf32>
    %69 = vector.broadcast %68 : vector<16x1xf32> to vector<16x16xf32>
    %70 = arith.cmpf oeq, %13, %69 : vector<16x16xf32>
    %cst_34 = arith.constant -1.000000e+30 : f32
    %71 = vector.broadcast %cst_34 : f32 to vector<16x16xf32>
    %72 = arith.select %70, %71, %52 : vector<16x16xi1>, vector<16x16xf32>
    %cst_35 = arith.constant 1.000000e+00 : f32
    %cst_36 = arith.constant 0.000000e+00 : f32
    %73 = vector.broadcast %cst_35 : f32 to vector<16x16xf32>
    %74 = vector.broadcast %cst_36 : f32 to vector<16x16xf32>
    %75 = arith.select %70, %73, %74 : vector<16x16xi1>, vector<16x16xf32>
    %76 = arith.truncf %75 : vector<16x16xf32> to vector<16x16xbf16>
    %cst_37 = arith.constant dense<0.000000e+00> : vector<16x3xf32>
    %77 = tpu.matmul %76, %14, %cst_37 {dimension_numbers = #tpu.dot_dimension_numbers<[1], [0], [0], [1], [0, 0, 1, 1], [], []>} : vector<16x16xbf16>, vector<16x3xbf16>, vector<16x3xf32> -> vector<16x3xf32>
    %78 = arith.truncf %77 : vector<16x3xf32> to vector<16x3xbf16>
    %cst_38 = arith.constant dense<0.000000e+00> : vector<16x64xf32>
    %79 = tpu.matmul %78, %16, %cst_38 {dimension_numbers = #tpu.dot_dimension_numbers<[1], [0], [0], [1], [0, 0, 1, 1], [], []>} : vector<16x3xbf16>, vector<3x64xbf16>, vector<16x64xf32> -> vector<16x64xf32>
    %80 = arith.maximumf %60, %79 : vector<16x64xf32>
    %cst_39 = arith.constant dense<0xFF800000> : vector<16xf32>
    %81 = vector.multi_reduction <maximumf>, %72, %cst_39 [1] : vector<16x16xf32> to vector<16xf32>
    %82 = vector.shape_cast %81 : vector<16xf32> to vector<16x1xf32>
    %83 = vector.broadcast %82 : vector<16x1xf32> to vector<16x16xf32>
    %84 = arith.cmpf oge, %72, %83 : vector<16x16xf32>
    %cst_40 = arith.constant 1.600000e+01 : f32
    %85 = vector.broadcast %cst_40 : f32 to vector<16x16xf32>
    %86 = arith.select %84, %13, %85 : vector<16x16xi1>, vector<16x16xf32>
    %cst_41 = arith.constant dense<0x7F800000> : vector<16xf32>
    %87 = vector.multi_reduction <minimumf>, %86, %cst_41 [1] : vector<16x16xf32> to vector<16xf32>
    %88 = vector.shape_cast %87 : vector<16xf32> to vector<16x1xf32>
    %89 = vector.broadcast %88 : vector<16x1xf32> to vector<16x16xf32>
    %90 = arith.cmpf oeq, %13, %89 : vector<16x16xf32>
    %cst_42 = arith.constant 1.000000e+00 : f32
    %cst_43 = arith.constant 0.000000e+00 : f32
    %91 = vector.broadcast %cst_42 : f32 to vector<16x16xf32>
    %92 = vector.broadcast %cst_43 : f32 to vector<16x16xf32>
    %93 = arith.select %90, %91, %92 : vector<16x16xi1>, vector<16x16xf32>
    %94 = arith.truncf %93 : vector<16x16xf32> to vector<16x16xbf16>
    %cst_44 = arith.constant dense<0.000000e+00> : vector<16x3xf32>
    %95 = tpu.matmul %94, %14, %cst_44 {dimension_numbers = #tpu.dot_dimension_numbers<[1], [0], [0], [1], [0, 0, 1, 1], [], []>} : vector<16x16xbf16>, vector<16x3xbf16>, vector<16x3xf32> -> vector<16x3xf32>
    %96 = arith.truncf %95 : vector<16x3xf32> to vector<16x3xbf16>
    %cst_45 = arith.constant dense<0.000000e+00> : vector<16x64xf32>
    %97 = tpu.matmul %96, %16, %cst_45 {dimension_numbers = #tpu.dot_dimension_numbers<[1], [0], [0], [1], [0, 0, 1, 1], [], []>} : vector<16x3xbf16>, vector<3x64xbf16>, vector<16x64xf32> -> vector<16x64xf32>
    %98 = arith.maximumf %80, %97 : vector<16x64xf32>
    %99 = arith.addf %98, %21 : vector<16x64xf32>
    %cst_46 = arith.constant 0.000000e+00 : f32
    %100 = vector.broadcast %cst_46 : f32 to vector<16x64xf32>
    %101 = arith.cmpf ogt, %99, %100 : vector<16x64xf32>
    %cst_47 = arith.constant 2.000000e-01 : f32
    %102 = vector.broadcast %cst_47 : f32 to vector<16x64xf32>
    %103 = arith.mulf %102, %99 : vector<16x64xf32>
    %104 = arith.select %101, %99, %103 : vector<16x64xi1>, vector<16x64xf32>
    %c0_48 = arith.constant 0 : index
    %c0_49 = arith.constant 0 : index
    %c0_50 = arith.constant 0 : index
    %105 = vector.load %arg7[%c0_48, %c0_49, %c0_50] : memref<1x16x64xf32, #tpu.memory_space<vmem>>, vector<1x16x64xf32>
    %106 = vector.shape_cast %105 : vector<1x16x64xf32> to vector<16x64xf32>
    %107 = vector.shape_cast %104 : vector<16x64xf32> to vector<1x16x64xf32>
    tpu.vector_store %arg7[%c0_48, %c0_49, %c0_50], %107 {strides = array<i32>} : memref<1x16x64xf32, #tpu.memory_space<vmem>>, vector<1x16x64xf32>,
    return
  }
  func.func @transform_0(%arg0: i32, %arg1: i32) -> (i32, i32, i32) {
    %c0_i32 = arith.constant 0 : i32
    %c0_i32_0 = arith.constant 0 : i32
    return %arg0, %arg1, %c0_i32 : i32, i32, i32
  }
  func.func @transform_1(%arg0: i32, %arg1: i32) -> (i32, i32, i32) {
    %c0_i32 = arith.constant 0 : i32
    %c0_i32_0 = arith.constant 0 : i32
    %c0_i32_1 = arith.constant 0 : i32
    return %arg0, %c0_i32, %c0_i32_0 : i32, i32, i32
  }
  func.func @transform_2(%arg0: i32, %arg1: i32) -> (i32, i32) {
    %c0_i32 = arith.constant 0 : i32
    %c0_i32_0 = arith.constant 0 : i32
    %c0_i32_1 = arith.constant 0 : i32
    return %c0_i32, %c0_i32_0 : i32, i32
  }
  func.func @transform_3(%arg0: i32, %arg1: i32) -> (i32, i32) {
    %c0_i32 = arith.constant 0 : i32
    %c0_i32_0 = arith.constant 0 : i32
    %c0_i32_1 = arith.constant 0 : i32
    return %c0_i32, %c0_i32_0 : i32, i32
  }
  func.func @transform_4(%arg0: i32, %arg1: i32) -> (i32, i32) {
    %c0_i32 = arith.constant 0 : i32
    %c0_i32_0 = arith.constant 0 : i32
    %c0_i32_1 = arith.constant 0 : i32
    return %c0_i32, %c0_i32_0 : i32, i32
  }
  func.func @transform_5(%arg0: i32, %arg1: i32) -> (i32, i32, i32) {
    %c0_i32 = arith.constant 0 : i32
    %c0_i32_0 = arith.constant 0 : i32
    return %arg0, %arg1, %c0_i32 : i32, i32, i32
  }
}

module attributes {stable_mosaic.version = 11 : i64} {
  func.func @_edge_conv_kernel(%arg0: i32, %arg1: i32, %arg2: memref<1x16x128xf32, #tpu.memory_space<vmem>>, %arg3: memref<1x16x128xf32, #tpu.memory_space<vmem>>, %arg4: memref<128x256xbf16, #tpu.memory_space<vmem>>, %arg5: memref<128x256xbf16, #tpu.memory_space<vmem>>, %arg6: memref<1x256xf32, #tpu.memory_space<vmem>>, %arg7: memref<1x16x256xf32, #tpu.memory_space<vmem>>) attributes {dimension_semantics = [#tpu.dimension_semantics<parallel>, #tpu.dimension_semantics<parallel>], iteration_bounds = array<i64: 2, 1>, scalar_prefetch = 0 : i64, scratch_operands = 0 : i64, tpu.core_type = #tpu.core_type<tc>, window_params = [{transform_indices = @transform_0, window_bounds = array<i64: 1, 16, 128>}, {transform_indices = @transform_1, window_bounds = array<i64: 1, 16, 128>}, {pipeline_mode = #tpu.pipeline_mode<synchronous>, transform_indices = @transform_2, window_bounds = array<i64: 128, 256>}, {pipeline_mode = #tpu.pipeline_mode<synchronous>, transform_indices = @transform_3, window_bounds = array<i64: 128, 256>}, {pipeline_mode = #tpu.pipeline_mode<synchronous>, transform_indices = @transform_4, window_bounds = array<i64: 1, 256>}, {transform_indices = @transform_5, window_bounds = array<i64: 1, 16, 256>}]} {
    %c0 = arith.constant 0 : index
    %c0_0 = arith.constant 0 : index
    %c0_1 = arith.constant 0 : index
    %0 = vector.load %arg2[%c0, %c0_0, %c0_1] : memref<1x16x128xf32, #tpu.memory_space<vmem>>, vector<1x16x128xf32>
    %1 = vector.shape_cast %0 : vector<1x16x128xf32> to vector<16x128xf32>
    %c0_2 = arith.constant 0 : index
    %c0_3 = arith.constant 0 : index
    %c0_4 = arith.constant 0 : index
    %2 = vector.load %arg3[%c0_2, %c0_3, %c0_4] : memref<1x16x128xf32, #tpu.memory_space<vmem>>, vector<1x16x128xf32>
    %3 = vector.shape_cast %2 : vector<1x16x128xf32> to vector<16x128xf32>
    %cst = arith.constant dense<0.000000e+00> : vector<16x16xf32>
    %4 = tpu.matmul %1, %3, %cst {dimension_numbers = #tpu.dot_dimension_numbers<[1], [1], [0], [0], [0, 0, 1, 0], [], []>} : vector<16x128xf32>, vector<16x128xf32>, vector<16x16xf32> -> vector<16x16xf32>
    %cst_5 = arith.constant 1.000000e+00 : f32
    %5 = vector.broadcast %cst_5 : f32 to vector<1x128xf32>
    %6 = arith.mulf %3, %3 : vector<16x128xf32>
    %cst_6 = arith.constant dense<0.000000e+00> : vector<1x16xf32>
    %7 = tpu.matmul %5, %6, %cst_6 {dimension_numbers = #tpu.dot_dimension_numbers<[1], [1], [0], [0], [0, 0, 1, 0], [], []>} : vector<1x128xf32>, vector<16x128xf32>, vector<1x16xf32> -> vector<1x16xf32>
    %cst_7 = arith.constant 2.000000e+00 : f32
    %8 = vector.broadcast %cst_7 : f32 to vector<16x16xf32>
    %9 = arith.mulf %8, %4 : vector<16x16xf32>
    %10 = vector.broadcast %7 : vector<1x16xf32> to vector<16x16xf32>
    %11 = arith.subf %9, %10 : vector<16x16xf32>
    %12 = tpu.iota {dimensions = array<i32: 1>} : vector<16x16xi32>
    %13 = arith.sitofp %12 : vector<16x16xi32> to vector<16x16xf32>
    %14 = arith.truncf %3 : vector<16x128xf32> to vector<16x128xbf16>
    %15 = arith.truncf %1 : vector<16x128xf32> to vector<16x128xbf16>
    %c0_8 = arith.constant 0 : index
    %c0_9 = arith.constant 0 : index
    %16 = vector.load %arg4[%c0_8, %c0_9] : memref<128x256xbf16, #tpu.memory_space<vmem>>, vector<128x256xbf16>
    %c0_10 = arith.constant 0 : index
    %c0_11 = arith.constant 0 : index
    %17 = vector.load %arg5[%c0_10, %c0_11] : memref<128x256xbf16, #tpu.memory_space<vmem>>, vector<128x256xbf16>
    %cst_12 = arith.constant dense<0.000000e+00> : vector<16x256xf32>
    %18 = tpu.matmul %15, %17, %cst_12 {dimension_numbers = #tpu.dot_dimension_numbers<[1], [0], [0], [1], [0, 0, 1, 1], [], []>} : vector<16x128xbf16>, vector<128x256xbf16>, vector<16x256xf32> -> vector<16x256xf32>
    %c0_13 = arith.constant 0 : index
    %c0_14 = arith.constant 0 : index
    %19 = vector.load %arg6[%c0_13, %c0_14] : memref<1x256xf32, #tpu.memory_space<vmem>>, vector<1x256xf32>
    %20 = vector.broadcast %19 : vector<1x256xf32> to vector<16x256xf32>
    %21 = arith.addf %18, %20 : vector<16x256xf32>
    %cst_15 = arith.constant dense<0xFF800000> : vector<16xf32>
    %22 = vector.multi_reduction <maximumf>, %11, %cst_15 [1] : vector<16x16xf32> to vector<16xf32>
    %23 = vector.shape_cast %22 : vector<16xf32> to vector<16x1xf32>
    %24 = vector.broadcast %23 : vector<16x1xf32> to vector<16x16xf32>
    %25 = arith.cmpf oge, %11, %24 : vector<16x16xf32>
    %cst_16 = arith.constant 1.600000e+01 : f32
    %26 = vector.broadcast %cst_16 : f32 to vector<16x16xf32>
    %27 = arith.select %25, %13, %26 : vector<16x16xi1>, vector<16x16xf32>
    %cst_17 = arith.constant dense<0x7F800000> : vector<16xf32>
    %28 = vector.multi_reduction <minimumf>, %27, %cst_17 [1] : vector<16x16xf32> to vector<16xf32>
    %29 = vector.shape_cast %28 : vector<16xf32> to vector<16x1xf32>
    %30 = vector.broadcast %29 : vector<16x1xf32> to vector<16x16xf32>
    %31 = arith.cmpf oeq, %13, %30 : vector<16x16xf32>
    %cst_18 = arith.constant -1.000000e+30 : f32
    %32 = vector.broadcast %cst_18 : f32 to vector<16x16xf32>
    %33 = arith.select %31, %32, %11 : vector<16x16xi1>, vector<16x16xf32>
    %cst_19 = arith.constant 1.000000e+00 : f32
    %cst_20 = arith.constant 0.000000e+00 : f32
    %34 = vector.broadcast %cst_19 : f32 to vector<16x16xf32>
    %35 = vector.broadcast %cst_20 : f32 to vector<16x16xf32>
    %36 = arith.select %31, %34, %35 : vector<16x16xi1>, vector<16x16xf32>
    %37 = arith.truncf %36 : vector<16x16xf32> to vector<16x16xbf16>
    %cst_21 = arith.constant dense<0.000000e+00> : vector<16x128xf32>
    %38 = tpu.matmul %37, %14, %cst_21 {dimension_numbers = #tpu.dot_dimension_numbers<[1], [0], [0], [1], [0, 0, 1, 1], [], []>} : vector<16x16xbf16>, vector<16x128xbf16>, vector<16x128xf32> -> vector<16x128xf32>
    %39 = arith.truncf %38 : vector<16x128xf32> to vector<16x128xbf16>
    %cst_22 = arith.constant dense<0.000000e+00> : vector<16x256xf32>
    %40 = tpu.matmul %39, %16, %cst_22 {dimension_numbers = #tpu.dot_dimension_numbers<[1], [0], [0], [1], [0, 0, 1, 1], [], []>} : vector<16x128xbf16>, vector<128x256xbf16>, vector<16x256xf32> -> vector<16x256xf32>
    %cst_23 = arith.constant dense<0xFF800000> : vector<16xf32>
    %41 = vector.multi_reduction <maximumf>, %33, %cst_23 [1] : vector<16x16xf32> to vector<16xf32>
    %42 = vector.shape_cast %41 : vector<16xf32> to vector<16x1xf32>
    %43 = vector.broadcast %42 : vector<16x1xf32> to vector<16x16xf32>
    %44 = arith.cmpf oge, %33, %43 : vector<16x16xf32>
    %cst_24 = arith.constant 1.600000e+01 : f32
    %45 = vector.broadcast %cst_24 : f32 to vector<16x16xf32>
    %46 = arith.select %44, %13, %45 : vector<16x16xi1>, vector<16x16xf32>
    %cst_25 = arith.constant dense<0x7F800000> : vector<16xf32>
    %47 = vector.multi_reduction <minimumf>, %46, %cst_25 [1] : vector<16x16xf32> to vector<16xf32>
    %48 = vector.shape_cast %47 : vector<16xf32> to vector<16x1xf32>
    %49 = vector.broadcast %48 : vector<16x1xf32> to vector<16x16xf32>
    %50 = arith.cmpf oeq, %13, %49 : vector<16x16xf32>
    %cst_26 = arith.constant -1.000000e+30 : f32
    %51 = vector.broadcast %cst_26 : f32 to vector<16x16xf32>
    %52 = arith.select %50, %51, %33 : vector<16x16xi1>, vector<16x16xf32>
    %cst_27 = arith.constant 1.000000e+00 : f32
    %cst_28 = arith.constant 0.000000e+00 : f32
    %53 = vector.broadcast %cst_27 : f32 to vector<16x16xf32>
    %54 = vector.broadcast %cst_28 : f32 to vector<16x16xf32>
    %55 = arith.select %50, %53, %54 : vector<16x16xi1>, vector<16x16xf32>
    %56 = arith.truncf %55 : vector<16x16xf32> to vector<16x16xbf16>
    %cst_29 = arith.constant dense<0.000000e+00> : vector<16x128xf32>
    %57 = tpu.matmul %56, %14, %cst_29 {dimension_numbers = #tpu.dot_dimension_numbers<[1], [0], [0], [1], [0, 0, 1, 1], [], []>} : vector<16x16xbf16>, vector<16x128xbf16>, vector<16x128xf32> -> vector<16x128xf32>
    %58 = arith.truncf %57 : vector<16x128xf32> to vector<16x128xbf16>
    %cst_30 = arith.constant dense<0.000000e+00> : vector<16x256xf32>
    %59 = tpu.matmul %58, %16, %cst_30 {dimension_numbers = #tpu.dot_dimension_numbers<[1], [0], [0], [1], [0, 0, 1, 1], [], []>} : vector<16x128xbf16>, vector<128x256xbf16>, vector<16x256xf32> -> vector<16x256xf32>
    %60 = arith.maximumf %40, %59 : vector<16x256xf32>
    %cst_31 = arith.constant dense<0xFF800000> : vector<16xf32>
    %61 = vector.multi_reduction <maximumf>, %52, %cst_31 [1] : vector<16x16xf32> to vector<16xf32>
    %62 = vector.shape_cast %61 : vector<16xf32> to vector<16x1xf32>
    %63 = vector.broadcast %62 : vector<16x1xf32> to vector<16x16xf32>
    %64 = arith.cmpf oge, %52, %63 : vector<16x16xf32>
    %cst_32 = arith.constant 1.600000e+01 : f32
    %65 = vector.broadcast %cst_32 : f32 to vector<16x16xf32>
    %66 = arith.select %64, %13, %65 : vector<16x16xi1>, vector<16x16xf32>
    %cst_33 = arith.constant dense<0x7F800000> : vector<16xf32>
    %67 = vector.multi_reduction <minimumf>, %66, %cst_33 [1] : vector<16x16xf32> to vector<16xf32>
    %68 = vector.shape_cast %67 : vector<16xf32> to vector<16x1xf32>
    %69 = vector.broadcast %68 : vector<16x1xf32> to vector<16x16xf32>
    %70 = arith.cmpf oeq, %13, %69 : vector<16x16xf32>
    %cst_34 = arith.constant -1.000000e+30 : f32
    %71 = vector.broadcast %cst_34 : f32 to vector<16x16xf32>
    %72 = arith.select %70, %71, %52 : vector<16x16xi1>, vector<16x16xf32>
    %cst_35 = arith.constant 1.000000e+00 : f32
    %cst_36 = arith.constant 0.000000e+00 : f32
    %73 = vector.broadcast %cst_35 : f32 to vector<16x16xf32>
    %74 = vector.broadcast %cst_36 : f32 to vector<16x16xf32>
    %75 = arith.select %70, %73, %74 : vector<16x16xi1>, vector<16x16xf32>
    %76 = arith.truncf %75 : vector<16x16xf32> to vector<16x16xbf16>
    %cst_37 = arith.constant dense<0.000000e+00> : vector<16x128xf32>
    %77 = tpu.matmul %76, %14, %cst_37 {dimension_numbers = #tpu.dot_dimension_numbers<[1], [0], [0], [1], [0, 0, 1, 1], [], []>} : vector<16x16xbf16>, vector<16x128xbf16>, vector<16x128xf32> -> vector<16x128xf32>
    %78 = arith.truncf %77 : vector<16x128xf32> to vector<16x128xbf16>
    %cst_38 = arith.constant dense<0.000000e+00> : vector<16x256xf32>
    %79 = tpu.matmul %78, %16, %cst_38 {dimension_numbers = #tpu.dot_dimension_numbers<[1], [0], [0], [1], [0, 0, 1, 1], [], []>} : vector<16x128xbf16>, vector<128x256xbf16>, vector<16x256xf32> -> vector<16x256xf32>
    %80 = arith.maximumf %60, %79 : vector<16x256xf32>
    %cst_39 = arith.constant dense<0xFF800000> : vector<16xf32>
    %81 = vector.multi_reduction <maximumf>, %72, %cst_39 [1] : vector<16x16xf32> to vector<16xf32>
    %82 = vector.shape_cast %81 : vector<16xf32> to vector<16x1xf32>
    %83 = vector.broadcast %82 : vector<16x1xf32> to vector<16x16xf32>
    %84 = arith.cmpf oge, %72, %83 : vector<16x16xf32>
    %cst_40 = arith.constant 1.600000e+01 : f32
    %85 = vector.broadcast %cst_40 : f32 to vector<16x16xf32>
    %86 = arith.select %84, %13, %85 : vector<16x16xi1>, vector<16x16xf32>
    %cst_41 = arith.constant dense<0x7F800000> : vector<16xf32>
    %87 = vector.multi_reduction <minimumf>, %86, %cst_41 [1] : vector<16x16xf32> to vector<16xf32>
    %88 = vector.shape_cast %87 : vector<16xf32> to vector<16x1xf32>
    %89 = vector.broadcast %88 : vector<16x1xf32> to vector<16x16xf32>
    %90 = arith.cmpf oeq, %13, %89 : vector<16x16xf32>
    %cst_42 = arith.constant 1.000000e+00 : f32
    %cst_43 = arith.constant 0.000000e+00 : f32
    %91 = vector.broadcast %cst_42 : f32 to vector<16x16xf32>
    %92 = vector.broadcast %cst_43 : f32 to vector<16x16xf32>
    %93 = arith.select %90, %91, %92 : vector<16x16xi1>, vector<16x16xf32>
    %94 = arith.truncf %93 : vector<16x16xf32> to vector<16x16xbf16>
    %cst_44 = arith.constant dense<0.000000e+00> : vector<16x128xf32>
    %95 = tpu.matmul %94, %14, %cst_44 {dimension_numbers = #tpu.dot_dimension_numbers<[1], [0], [0], [1], [0, 0, 1, 1], [], []>} : vector<16x16xbf16>, vector<16x128xbf16>, vector<16x128xf32> -> vector<16x128xf32>
    %96 = arith.truncf %95 : vector<16x128xf32> to vector<16x128xbf16>
    %cst_45 = arith.constant dense<0.000000e+00> : vector<16x256xf32>
    %97 = tpu.matmul %96, %16, %cst_45 {dimension_numbers = #tpu.dot_dimension_numbers<[1], [0], [0], [1], [0, 0, 1, 1], [], []>} : vector<16x128xbf16>, vector<128x256xbf16>, vector<16x256xf32> -> vector<16x256xf32>
    %98 = arith.maximumf %80, %97 : vector<16x256xf32>
    %99 = arith.addf %98, %21 : vector<16x256xf32>
    %cst_46 = arith.constant 0.000000e+00 : f32
    %100 = vector.broadcast %cst_46 : f32 to vector<16x256xf32>
    %101 = arith.cmpf ogt, %99, %100 : vector<16x256xf32>
    %cst_47 = arith.constant 2.000000e-01 : f32
    %102 = vector.broadcast %cst_47 : f32 to vector<16x256xf32>
    %103 = arith.mulf %102, %99 : vector<16x256xf32>
    %104 = arith.select %101, %99, %103 : vector<16x256xi1>, vector<16x256xf32>
    %c0_48 = arith.constant 0 : index
    %c0_49 = arith.constant 0 : index
    %c0_50 = arith.constant 0 : index
    %105 = vector.load %arg7[%c0_48, %c0_49, %c0_50] : memref<1x16x256xf32, #tpu.memory_space<vmem>>, vector<1x16x256xf32>
    %106 = vector.shape_cast %105 : vector<1x16x256xf32> to vector<16x256xf32>
    %107 = vector.shape_cast %104 : vector<16x256xf32> to vector<1x16x256xf32>
    tpu.vector_store %arg7[%c0_48, %c0_49, %c0_50], %107 {strides = array<i32>} : memref<1x16x256xf32, #tpu.memory_space<vmem>>, vector<1x16x256xf32>,
    return
  }
  func.func @transform_0(%arg0: i32, %arg1: i32) -> (i32, i32, i32) {
    %c0_i32 = arith.constant 0 : i32
    %c0_i32_0 = arith.constant 0 : i32
    return %arg0, %arg1, %c0_i32 : i32, i32, i32
  }
  func.func @transform_1(%arg0: i32, %arg1: i32) -> (i32, i32, i32) {
    %c0_i32 = arith.constant 0 : i32
    %c0_i32_0 = arith.constant 0 : i32
    %c0_i32_1 = arith.constant 0 : i32
    return %arg0, %c0_i32, %c0_i32_0 : i32, i32, i32
  }
  func.func @transform_2(%arg0: i32, %arg1: i32) -> (i32, i32) {
    %c0_i32 = arith.constant 0 : i32
    %c0_i32_0 = arith.constant 0 : i32
    %c0_i32_1 = arith.constant 0 : i32
    return %c0_i32, %c0_i32_0 : i32, i32
  }
  func.func @transform_3(%arg0: i32, %arg1: i32) -> (i32, i32) {
    %c0_i32 = arith.constant 0 : i32
    %c0_i32_0 = arith.constant 0 : i32
    %c0_i32_1 = arith.constant 0 : i32
    return %c0_i32, %c0_i32_0 : i32, i32
  }
  func.func @transform_4(%arg0: i32, %arg1: i32) -> (i32, i32) {
    %c0_i32 = arith.constant 0 : i32
    %c0_i32_0 = arith.constant 0 : i32
    %c0_i32_1 = arith.constant 0 : i32
    return %c0_i32, %c0_i32_0 : i32, i32
  }
  func.func @transform_5(%arg0: i32, %arg1: i32) -> (i32, i32, i32) {
    %c0_i32 = arith.constant 0 : i32
    %c0_i32_0 = arith.constant 0 : i32
    return %arg0, %arg1, %c0_i32 : i32, i32, i32
  }
}

module attributes {stable_mosaic.version = 11 : i64} {
  func.func @_conv5_embed_kernel(%arg0: i32, %arg1: i32, %arg2: memref<1x16x64xf32, #tpu.memory_space<vmem>>, %arg3: memref<1x16x64xf32, #tpu.memory_space<vmem>>, %arg4: memref<1x16x128xf32, #tpu.memory_space<vmem>>, %arg5: memref<1x16x256xf32, #tpu.memory_space<vmem>>, %arg6: memref<512x512xbf16, #tpu.memory_space<vmem>>, %arg7: memref<1x512xf32, #tpu.memory_space<vmem>>, %arg8: memref<512x32xf32, #tpu.memory_space<vmem>>, %arg9: memref<1x1x32xf32, #tpu.memory_space<vmem>>, %arg10: memref<1x512xf32, #tpu.memory_space<vmem>>) attributes {dimension_semantics = [#tpu.dimension_semantics<parallel>, #tpu.dimension_semantics<arbitrary>], iteration_bounds = array<i64: 2, 1>, scalar_prefetch = 0 : i64, scratch_operands = 1 : i64, tpu.core_type = #tpu.core_type<tc>, window_params = [{transform_indices = @transform_0, window_bounds = array<i64: 1, 16, 64>}, {transform_indices = @transform_1, window_bounds = array<i64: 1, 16, 64>}, {transform_indices = @transform_2, window_bounds = array<i64: 1, 16, 128>}, {transform_indices = @transform_3, window_bounds = array<i64: 1, 16, 256>}, {pipeline_mode = #tpu.pipeline_mode<synchronous>, transform_indices = @transform_4, window_bounds = array<i64: 512, 512>}, {pipeline_mode = #tpu.pipeline_mode<synchronous>, transform_indices = @transform_5, window_bounds = array<i64: 1, 512>}, {pipeline_mode = #tpu.pipeline_mode<synchronous>, transform_indices = @transform_6, window_bounds = array<i64: 512, 32>}, {transform_indices = @transform_7, window_bounds = array<i64: 1, 1, 32>}]} {
    %c0_i32 = arith.constant 0 : i32
    %0 = arith.cmpi eq, %arg1, %c0_i32 : i32
    %1 = arith.extui %0 : i1 to i32
    %c0_i32_0 = arith.constant 0 : i32
    %2 = arith.cmpi ne, %1, %c0_i32_0 : i32
    scf.if %2 {
      %cst_31 = arith.constant 0xFF800000 : f32
      %42 = vector.broadcast %cst_31 : f32 to vector<1x512xf32>
      %c0_32 = arith.constant 0 : index
      %c0_33 = arith.constant 0 : index
      %43 = vector.load %arg10[%c0_32, %c0_33] : memref<1x512xf32, #tpu.memory_space<vmem>>, vector<1x512xf32>
      tpu.vector_store %arg10[%c0_32, %c0_33], %42 {strides = array<i32>} : memref<1x512xf32, #tpu.memory_space<vmem>>, vector<1x512xf32>,
    } else {
    }
    %c0 = arith.constant 0 : index
    %c0_1 = arith.constant 0 : index
    %c0_2 = arith.constant 0 : index
    %3 = vector.load %arg2[%c0, %c0_1, %c0_2] : memref<1x16x64xf32, #tpu.memory_space<vmem>>, vector<1x16x64xf32>
    %4 = vector.shape_cast %3 : vector<1x16x64xf32> to vector<16x64xf32>
    %5 = arith.truncf %4 : vector<16x64xf32> to vector<16x64xbf16>
    %c0_3 = arith.constant 0 : index
    %c0_4 = arith.constant 0 : index
    %6 = vector.load %arg6[%c0_3, %c0_4] : memref<512x512xbf16, #tpu.memory_space<vmem>>, vector<64x512xbf16>
    %cst = arith.constant dense<0.000000e+00> : vector<16x512xf32>
    %7 = tpu.matmul %5, %6, %cst {dimension_numbers = #tpu.dot_dimension_numbers<[1], [0], [0], [1], [0, 0, 1, 1], [], []>} : vector<16x64xbf16>, vector<64x512xbf16>, vector<16x512xf32> -> vector<16x512xf32>
    %c0_5 = arith.constant 0 : index
    %c0_6 = arith.constant 0 : index
    %c0_7 = arith.constant 0 : index
    %8 = vector.load %arg3[%c0_5, %c0_6, %c0_7] : memref<1x16x64xf32, #tpu.memory_space<vmem>>, vector<1x16x64xf32>
    %9 = vector.shape_cast %8 : vector<1x16x64xf32> to vector<16x64xf32>
    %10 = arith.truncf %9 : vector<16x64xf32> to vector<16x64xbf16>
    %c64 = arith.constant 64 : index
    %c0_8 = arith.constant 0 : index
    %11 = vector.load %arg6[%c64, %c0_8] : memref<512x512xbf16, #tpu.memory_space<vmem>>, vector<64x512xbf16>
    %cst_9 = arith.constant dense<0.000000e+00> : vector<16x512xf32>
    %12 = tpu.matmul %10, %11, %cst_9 {dimension_numbers = #tpu.dot_dimension_numbers<[1], [0], [0], [1], [0, 0, 1, 1], [], []>} : vector<16x64xbf16>, vector<64x512xbf16>, vector<16x512xf32> -> vector<16x512xf32>
    %13 = arith.addf %7, %12 : vector<16x512xf32>
    %c0_10 = arith.constant 0 : index
    %c0_11 = arith.constant 0 : index
    %c0_12 = arith.constant 0 : index
    %14 = vector.load %arg4[%c0_10, %c0_11, %c0_12] : memref<1x16x128xf32, #tpu.memory_space<vmem>>, vector<1x16x128xf32>
    %15 = vector.shape_cast %14 : vector<1x16x128xf32> to vector<16x128xf32>
    %16 = arith.truncf %15 : vector<16x128xf32> to vector<16x128xbf16>
    %c128 = arith.constant 128 : index
    %c0_13 = arith.constant 0 : index
    %17 = vector.load %arg6[%c128, %c0_13] : memref<512x512xbf16, #tpu.memory_space<vmem>>, vector<128x512xbf16>
    %cst_14 = arith.constant dense<0.000000e+00> : vector<16x512xf32>
    %18 = tpu.matmul %16, %17, %cst_14 {dimension_numbers = #tpu.dot_dimension_numbers<[1], [0], [0], [1], [0, 0, 1, 1], [], []>} : vector<16x128xbf16>, vector<128x512xbf16>, vector<16x512xf32> -> vector<16x512xf32>
    %19 = arith.addf %13, %18 : vector<16x512xf32>
    %c0_15 = arith.constant 0 : index
    %c0_16 = arith.constant 0 : index
    %c0_17 = arith.constant 0 : index
    %20 = vector.load %arg5[%c0_15, %c0_16, %c0_17] : memref<1x16x256xf32, #tpu.memory_space<vmem>>, vector<1x16x256xf32>
    %21 = vector.shape_cast %20 : vector<1x16x256xf32> to vector<16x256xf32>
    %22 = arith.truncf %21 : vector<16x256xf32> to vector<16x256xbf16>
    %c256 = arith.constant 256 : index
    %c0_18 = arith.constant 0 : index
    %23 = vector.load %arg6[%c256, %c0_18] : memref<512x512xbf16, #tpu.memory_space<vmem>>, vector<256x512xbf16>
    %cst_19 = arith.constant dense<0.000000e+00> : vector<16x512xf32>
    %24 = tpu.matmul %22, %23, %cst_19 {dimension_numbers = #tpu.dot_dimension_numbers<[1], [0], [0], [1], [0, 0, 1, 1], [], []>} : vector<16x256xbf16>, vector<256x512xbf16>, vector<16x512xf32> -> vector<16x512xf32>
    %25 = arith.addf %19, %24 : vector<16x512xf32>
    %c0_20 = arith.constant 0 : index
    %c0_21 = arith.constant 0 : index
    %26 = vector.load %arg7[%c0_20, %c0_21] : memref<1x512xf32, #tpu.memory_space<vmem>>, vector<1x512xf32>
    %27 = vector.broadcast %26 : vector<1x512xf32> to vector<16x512xf32>
    %28 = arith.addf %25, %27 : vector<16x512xf32>
    %cst_22 = arith.constant 0.000000e+00 : f32
    %29 = vector.broadcast %cst_22 : f32 to vector<16x512xf32>
    %30 = arith.cmpf ogt, %28, %29 : vector<16x512xf32>
    %cst_23 = arith.constant 2.000000e-01 : f32
    %31 = vector.broadcast %cst_23 : f32 to vector<16x512xf32>
    %32 = arith.mulf %31, %28 : vector<16x512xf32>
    %33 = arith.select %30, %28, %32 : vector<16x512xi1>, vector<16x512xf32>
    %c0_24 = arith.constant 0 : index
    %c0_25 = arith.constant 0 : index
    %34 = vector.load %arg10[%c0_24, %c0_25] : memref<1x512xf32, #tpu.memory_space<vmem>>, vector<1x512xf32>
    %cst_26 = arith.constant dense<0xFF800000> : vector<512xf32>
    %35 = vector.multi_reduction <maximumf>, %33, %cst_26 [0] : vector<16x512xf32> to vector<512xf32>
    %36 = vector.shape_cast %35 : vector<512xf32> to vector<1x512xf32>
    %37 = arith.maximumf %34, %36 : vector<1x512xf32>
    %c0_27 = arith.constant 0 : index
    %c0_28 = arith.constant 0 : index
    %38 = vector.load %arg10[%c0_27, %c0_28] : memref<1x512xf32, #tpu.memory_space<vmem>>, vector<1x512xf32>
    tpu.vector_store %arg10[%c0_27, %c0_28], %37 {strides = array<i32>} : memref<1x512xf32, #tpu.memory_space<vmem>>, vector<1x512xf32>,
    %c0_i32_29 = arith.constant 0 : i32
    %39 = arith.cmpi eq, %arg1, %c0_i32_29 : i32
    %40 = arith.extui %39 : i1 to i32
    %c0_i32_30 = arith.constant 0 : i32
    %41 = arith.cmpi ne, %40, %c0_i32_30 : i32
    scf.if %41 {
      %c0_31 = arith.constant 0 : index
      %c0_32 = arith.constant 0 : index
      %42 = vector.load %arg10[%c0_31, %c0_32] : memref<1x512xf32, #tpu.memory_space<vmem>>, vector<1x512xf32>
      %c0_33 = arith.constant 0 : index
      %c0_34 = arith.constant 0 : index
      %43 = vector.load %arg8[%c0_33, %c0_34] : memref<512x32xf32, #tpu.memory_space<vmem>>, vector<512x32xf32>
      %cst_35 = arith.constant dense<0.000000e+00> : vector<1x32xf32>
      %44 = tpu.matmul %42, %43, %cst_35 {dimension_numbers = #tpu.dot_dimension_numbers<[1], [0], [0], [1], [0, 0, 1, 1], [], []>} : vector<1x512xf32>, vector<512x32xf32>, vector<1x32xf32> -> vector<1x32xf32>
      %c0_36 = arith.constant 0 : index
      %c0_37 = arith.constant 0 : index
      %c0_38 = arith.constant 0 : index
      %45 = vector.load %arg9[%c0_36, %c0_37, %c0_38] : memref<1x1x32xf32, #tpu.memory_space<vmem>>, vector<1x1x32xf32>
      %46 = vector.shape_cast %45 : vector<1x1x32xf32> to vector<1x32xf32>
      %47 = vector.shape_cast %44 : vector<1x32xf32> to vector<1x1x32xf32>
      tpu.vector_store %arg9[%c0_36, %c0_37, %c0_38], %47 {strides = array<i32>} : memref<1x1x32xf32, #tpu.memory_space<vmem>>, vector<1x1x32xf32>,
    } else {
    }
    return
  }
  func.func @transform_0(%arg0: i32, %arg1: i32) -> (i32, i32, i32) {
    %c0_i32 = arith.constant 0 : i32
    %c0_i32_0 = arith.constant 0 : i32
    return %arg0, %arg1, %c0_i32 : i32, i32, i32
  }
  func.func @transform_1(%arg0: i32, %arg1: i32) -> (i32, i32, i32) {
    %c0_i32 = arith.constant 0 : i32
    %c0_i32_0 = arith.constant 0 : i32
    return %arg0, %arg1, %c0_i32 : i32, i32, i32
  }
  func.func @transform_2(%arg0: i32, %arg1: i32) -> (i32, i32, i32) {
    %c0_i32 = arith.constant 0 : i32
    %c0_i32_0 = arith.constant 0 : i32
    return %arg0, %arg1, %c0_i32 : i32, i32, i32
  }
  func.func @transform_3(%arg0: i32, %arg1: i32) -> (i32, i32, i32) {
    %c0_i32 = arith.constant 0 : i32
    %c0_i32_0 = arith.constant 0 : i32
    return %arg0, %arg1, %c0_i32 : i32, i32, i32
  }
  func.func @transform_4(%arg0: i32, %arg1: i32) -> (i32, i32) {
    %c0_i32 = arith.constant 0 : i32
    %c0_i32_0 = arith.constant 0 : i32
    %c0_i32_1 = arith.constant 0 : i32
    return %c0_i32, %c0_i32_0 : i32, i32
  }
  func.func @transform_5(%arg0: i32, %arg1: i32) -> (i32, i32) {
    %c0_i32 = arith.constant 0 : i32
    %c0_i32_0 = arith.constant 0 : i32
    %c0_i32_1 = arith.constant 0 : i32
    return %c0_i32, %c0_i32_0 : i32, i32
  }
  func.func @transform_6(%arg0: i32, %arg1: i32) -> (i32, i32) {
    %c0_i32 = arith.constant 0 : i32
    %c0_i32_0 = arith.constant 0 : i32
    %c0_i32_1 = arith.constant 0 : i32
    return %c0_i32, %c0_i32_0 : i32, i32
  }
  func.func @transform_7(%arg0: i32, %arg1: i32) -> (i32, i32, i32) {
    %c0_i32 = arith.constant 0 : i32
    %c0_i32_0 = arith.constant 0 : i32
    %c0_i32_1 = arith.constant 0 : i32
    return %arg0, %c0_i32, %c0_i32_0 : i32, i32, i32
  }
}

</mosaic_0001>

<bundles_post_ra>
// kernel: dgcnn_encoder.7
= control target key start
LH: loop header
LB: loop body
LE: loop exit
PB: predicated region body
PF: predicated region fallthrough
CT: control target
= control target key end

     0   :  { %10 = vsyncpa [#allocation3], 0  ;;  %s1488_s18 = smov 0   ;;  %s1490_s19 = smov 0   ;;  %s1748_s0 = inlined_call_operand.vmem [shape: f32[2,16,64], index: 0, kind: input, shape index: {}, may-alias: {0,1}]   ;;  %s1749_s1 = inlined_call_operand.vmem [shape: f32[2,16,64], index: 1, kind: input, shape index: {}, may-alias: {0,1}]   ;;  %s1750_s2 = inlined_call_operand.vmem [shape: bf16[64,128], index: 2, kind: input, shape index: {}]   ;;  %s1751_s3 = inlined_call_operand.vmem [shape: bf16[64,128], index: 3, kind: input, shape index: {}]   ;;  %s1752_s4 = inlined_call_operand.hbm [shape: f32[1,128], index: 4, kind: input, shape index: {}]   ;;  %s1753_s5 = inlined_call_operand.vmem [shape: f32[2,16,128], index: 5, kind: output, shape index: {}]  }
   0x1   :  { %s1492_s20 = smov 0  }
   0x2 LB: > { %s1173_s21 = sadd.s32 4294967295, %s1452_s20   ;;  %s28_s22 = sadd.s32 1, %s1448_s19  ;;  %s1452_s20 = sphi %s1492_s20, %s16_s20   ;;  %s1448_s19 = sphi %s1490_s19, %s1757_s19   ;;  %s1444_s18 = sphi %s1488_s18, %s1756_s18  }
   0x3   : > { %p30_p0 = scmp.ge.s32.totalorder %s28_s22, 2  ;;  %p1175_p1 = scmp.ge.s32.totalorder %s1452_s20, 1 }
   0x4   : > { %p178_p2 = scmp.lt.s32.totalorder %s1452_s20, 3  ;;  %p1513_p4 = scmp.eq.s32.totalorder %s1173_s21, 0 }
   0x5   : > { %s1759_s22 = smov (%p30_p0, %s28_s22), 0  ;;  %s1454_s25 = smov [#allocation2]  }
   0x6   : > { %p1509_p3 = pnand %p1175_p1, %p178_p2  ;;  %s197_s26 = sshll.u32 %s1454_s25, 4  ;;  %s198_s26 = int_to_ptr.vmem [resolvable:$true] %s197_s26 }
   0x7   : > { %s1411_s27 = scalar_lea.vmem %s198_s26, 16  ;;  %s1418_s28 = scalar_lea.vmem %s198_s26, 32 }
   0x8   : > { %p1358_p5 = pneg %p1509_p3  ;;  %p1412_p8 = scmp.ne.s32.totalorder %s198_s26, %s1411_s27 }
   0x9   : > { %p1419_p11 = scmp.lt.s32.totalorder %s198_s26, %s198_s26  ;;  %p1420_p12 = scmp.lt.s32.totalorder %s1418_s28, %s1411_s27 }
   0xa   : > { %p1359_p6 = pnand %p1513_p4, %p1358_p5 }
   0xb   : > { %p1421_p13 = por %p1420_p12, %p1419_p11 }
   0xc   : > { %p1402_p7 = pneg %p1359_p6 }
   0xe   : > { %p1414_p9 = pnand %p1412_p8, %p1402_p7 }
  0x10   : > { %p1415_p10 = pneg %p1414_p9 }
  0x12   : > { %p1422_p0 = pnand %p1421_p13, %p1415_p10 }
  0x14   : > { %1425 = shalt.err (!%p1422_p0)
}
  0x15   : > { %1361 = dma.hbm_to_vmem [thread:$0]  (!%p1359_p6), %s1752_s4, 16, %s198_s26, [#allocation3]  }
  0x16   : > { %231 = sbr.rel (%p1509_p3) target bundleno = 1785 (0x6f9), region = 40 }
  0x1b   : > { %1439 = dma.done.wait (%p1513_p4), [#allocation3], 16  }
  0x1c   : > { %1441 = vsyncadd (%p1513_p4), [#allocation3], 4294967280  ;;  %p273_p1 = scmp.lt.s32.totalorder %s1444_s18, 1  ;;  %v1455_v0 = vmov 0.0   ;;  %vm1456_vm0 = vmmov 0   ;;  %vm302_vm1 = vcmask 523264   ;;  %v473_v9 = vlaneseq }
  0x1d   : > { %1282 = vmatprep.subr.bf16.mxu1 %v1455_v0  ;;  %1284 = vmatprep.mubr.msk.bf16.mxu1 %vm1456_vm0, %v1455_v0  ;;  %v1457_v8 = vmov 1.0   ;;  %vm575_vm2 = vcmask 130048   ;;  %v1599_v41 = vld [vmem:[%s1750_s2 + $0x18] sm:$0xff]   ;;  %v1605_v42 = vld [vmem:[%s1750_s2 + $0x10] sm:$0xff]   ;;  %v1613_v43 = vld [vmem:[%s1750_s2 + $0x8] sm:$0xff]  }
  0x1e   : > { %s1761_s18 = smov (!%p273_p1, %s1444_s18), 1  ;;  %v474_v10 = vshrl.u32 %v473_v9, 7  ;;  %v480_v23 = vand.u32 127, %v473_v9  ;;  %v1620_v44 = vld [vmem:[%s1750_s2] sm:$0xff]   ;;  %v1396_v45 = vld [vmem:[%s1751_s3 + $0x18] sm:$0xff]   ;;  %v1397_v46 = vld [vmem:[%s1751_s3 + $0x10] sm:$0xff]  }
  0x1f   : > { %s1535_s6 = sshll.u32 %s1761_s18, 4  ;;  %v1398_v47 = vld [vmem:[%s1751_s3 + $0x8] sm:$0xff]   ;;  %v1399_v48 = vld [vmem:[%s1751_s3] sm:$0xff]  }
  0x20   : > { %s286_s9 = scalar_lea.vmem %s1749_s1, %s1535_s6  ;;  %s280_s12 = scalar_lea.vmem %s1748_s0, %s1535_s6  ;;  %v475_v12 = vsub.s32 0, %v474_v10  ;;  %v1571_v24 = vcvt.s32.f32 %v480_v23 }
  0x21   : > { %v301_v1 = vld [vmem:[%s286_s9 + $0x8] sm:$0xff]  ;;  %v300_v2 = vld [vmem:[%s286_s9] sm:$0xff]  ;;  %s295_s10 = scalar_lea.vmem %s1753_s5, %s1535_s6 }
  0x22   : > { %v1545_v3 = vld [vmem:[%s280_s12] sm:$0xff]  ;;  %1256 = vmatprep.subr.msk.mxu0 %vm302_vm1, %v301_v1  ;;  %v1548_v4 = vld [vmem:[%s280_s12 + $0x8] sm:$0xff]  ;;  %v391_v6 = vmul.f32 %v301_v1, %v301_v1  ;;  %v390_v7 = vmul.f32 %v300_v2, %v300_v2  ;;  %v1577_v31 = vpack.c.bf16 %v301_v1, %v300_v2 }
  0x23   : > { %1260 = vmatprep.mubr.msk.f32.mxu0 %vm302_vm1, %v1545_v3  ;;  %1257 = vmatpush3.xpose.msk.msra.mxu0 %vm302_vm1, %v301_v1  ;;  %v483_v5 = vpack.c.bf16 %v1548_v4, %v1545_v3 }
  0x24   : > { %1258 = vmatprep.subr.msk.mxu0 %vm302_vm1, %v300_v2  ;;  %1283 = vmatpush3.bf16.msra.mxu1 %v1577_v31 }
  0x25   : > { %1288 = vmatprep.subr.bf16.mxu1 %v1455_v0 }
  0x27   : > { %1259 = vmatpush3.xpose.msk.msra.mxu0 %vm302_vm1, %v300_v2 }
  0x28   : > { %1263 = vmatprep.subr.mxu0 %v1455_v0 }
  0x2a   : > { %1261 = vmatmul.mubr.msk.f32.vlgmr.msra.gmra.mxu0 %vm302_vm1, %v1548_v4 }
  0x2b   : > { %1264 = vmatpush3.xpose.msk.msra.mxu0 %vm302_vm1, %v391_v6  ;;  %1267 = vmatprep.mubr.msk.f32.mxu0 %vm1456_vm0, %v1455_v0 }
  0x2c   : > { %1265 = vmatprep.subr.mxu0 %v1455_v0 }
  0x2f   : > { %1266 = vmatpush3.xpose.msk.msra.mxu0 %vm302_vm1, %v390_v7 }
  0x30   : > { %1270 = vmatprep.subr.bf16.mxu0 %v1455_v0 }
  0x32   : > { %1268 = vmatmul.mubr.msk.f32.vlgmr.msra.gmra.mxu0 %vm302_vm1, %v1457_v8 }
  0x33   : > { %1278 = vmatprep.mubr.msk.bf16.mxu0 %vm1456_vm0, %v1455_v0  ;;  %1271 = vmatpush3.bf16.msra.mxu0 %v1396_v45 }
  0x34   : > { %1272 = vmatprep.subr.bf16.mxu0 %v1455_v0 }
  0x37   : > { %1273 = vmatpush3.bf16.msra.mxu0 %v1397_v46 }
  0x38   : > { %1274 = vmatprep.subr.bf16.mxu0 %v1455_v0 }
  0x3b   : > { %1275 = vmatpush3.bf16.msra.mxu0 %v1398_v47 }
  0x3c   : > { %1276 = vmatprep.subr.bf16.mxu0 %v1455_v0 }
  0x3f   : > { %1277 = vmatpush3.bf16.msra.mxu0 %v1399_v48 }
  0x40   : > { %1300 = vmatprep.subr.bf16.mxu0 %v1455_v0 }
  0x42   : > { %1279 = vmatmul.mubr.msk.bf16.vlgmr.msra.gmra.mxu0 %vm302_vm1, %v483_v5 }
  0x43   : > { %1301 = vmatpush3.bf16.msra.mxu0 %v1577_v31  ;;  %1302 = vmatprep.mubr.msk.bf16.mxu0 %vm1456_vm0, %v1455_v0 }
  0x44   : > { %1318 = vmatprep.subr.bf16.mxu0 %v1455_v0 }
  0xea   : > { %v1262_v11 = vpop.f32.mrf.mxu0 }
  0xeb   : > { %v472_v18 = vmul.f32 2.0, %v1262_v11 }
  0xec   : > { %v381_v13 = vpop.f32.mrf.mxu0 }
  0xed   : > { %v471_v15 = vmul.f32 2.0, %v381_v13 }
  0xf2   : > { %v467_v14 = vpop.f32.mrf.mxu0 }
  0xf3   : > { %v476_v16 = vrot.slane %v467_v14, %v475_v12 }
  0xf4   : > { %v1269_v17 = vpop.f32.mrf.mxu0 }
  0xf5   : > { %v477_v19 = vsub.f32 %v471_v15, %v476_v16  ;;  %v478_v20 = vsub.f32 %v472_v18, %v476_v16 }
  0xf7   : > { %v576_v21 = vsel %vm575_vm2, %v477_v19, -inf  ;;  %v579_v22 = vsel %vm575_vm2, %v478_v20, -inf }
  0xf8   : > { %577 = vmax.xlane.f32.xlu0 %v576_v21 }
  0xfc   : > { %580 = vmax.xlane.f32.xlu0 %v579_v22 }
 0x102   : > { %v1678_v6 = vpop.f32.mrf.mxu0 }
 0x104   : > { %v1280_v7 = vpop.f32.mrf.mxu0 }
 0x106   : > { %v1680_v8 = vpop.f32.mrf.mxu0 }
 0x108   : > { %v1281_v9 = vpop.f32.mrf.mxu0 }
 0x181   : > { %v578_v25 = vpop.xlane.xlu0 %577 }
 0x182   : > { %vm582_vm3 = vcmp.ge.f32.partialorder %v477_v19, %v578_v25 }
 0x183   : > { %v584_v26 = vsel %vm582_vm3, %v1571_v24, 16.0 }
 0x184   : > { %v586_v27 = vsel %vm575_vm2, %v584_v26, inf }
 0x185   : > { %587 = vmin.xlane.f32.xlu1 %v586_v27  ;;  %v581_v28 = vpop.xlane.xlu0 %580 }
 0x186   : > { %vm583_vm4 = vcmp.ge.f32.partialorder %v478_v20, %v581_v28 }
 0x187   : > { %v585_v29 = vsel %vm583_vm4, %v1571_v24, 16.0 }
 0x188   : > { %v589_v30 = vsel %vm575_vm2, %v585_v29, inf }
 0x189   : > { %590 = vmin.xlane.f32.xlu1 %v589_v30 }
 0x20e   : > { %v588_v32 = vpop.xlane.xlu1 %587 }
 0x20f   : > { %vm592_vm5 = vcmp.eq.f32.partialorder %v1571_v24, %v588_v32 }
 0x210   : > { %v1582_v33 = vsel %vm592_vm5, -1e+30, %v477_v19  ;;  %v596_v36 = vsel %vm592_vm5, 1.0, %v1455_v0 }
 0x211   : > { %v712_v34 = vsel %vm575_vm2, %v1582_v33, -inf }
 0x212   : > { %713 = vmax.xlane.f32.xlu0 %v712_v34  ;;  %v591_v35 = vpop.xlane.xlu1 %590 }
 0x213   : > { %vm593_vm6 = vcmp.eq.f32.partialorder %v1571_v24, %v591_v35 }
 0x214   : > { %v1588_v37 = vsel %vm593_vm6, -1e+30, %v478_v20  ;;  %v597_v38 = vsel %vm593_vm6, 1.0, %v1455_v0 }
 0x215   : > { %v598_v39 = vpack.c.bf16 %v597_v38, %v596_v36  ;;  %v715_v40 = vsel %vm575_vm2, %v1588_v37, -inf }
 0x216   : > { %716 = vmax.xlane.f32.xlu1 %v715_v40 }
 0x217   : > { %1285 = vmatmul.mubr.msk.bf16.vlgmr.msra.gmra.mxu1 %vm575_vm2, %v598_v39 }
 0x218   : > { %1296 = vmatprep.mubr.msk.bf16.mxu1 %vm1456_vm0, %v1455_v0  ;;  %1289 = vmatpush3.bf16.msra.mxu1 %v1599_v41 }
 0x219   : > { %1290 = vmatprep.subr.bf16.mxu1 %v1455_v0 }
 0x21c   : > { %1291 = vmatpush3.bf16.msra.mxu1 %v1605_v42 }
 0x21d   : > { %1292 = vmatprep.subr.bf16.mxu1 %v1455_v0 }
 0x220   : > { %1293 = vmatpush3.bf16.msra.mxu1 %v1613_v43 }
 0x221   : > { %1294 = vmatprep.subr.bf16.mxu1 %v1455_v0 }
 0x224   : > { %1295 = vmatpush3.bf16.msra.mxu1 %v1620_v44 }
 0x225   : > { %1306 = vmatprep.subr.bf16.mxu1 %v1455_v0 }
 0x29b   : > { %v714_v49 = vpop.xlane.xlu0 %713 }
 0x29c   : > { %vm718_vm7 = vcmp.ge.f32.partialorder %v1582_v33, %v714_v49 }
 0x29d   : > { %v720_v50 = vsel %vm718_vm7, %v1571_v24, 16.0 }
 0x29e   : > { %v722_v51 = vsel %vm575_vm2, %v720_v50, inf }
 0x29f   : > { %v717_v52 = vpop.xlane.xlu1 %716  ;;  %723 = vmin.xlane.f32.xlu0 %v722_v51 }
 0x2a0   : > { %vm719_vm8 = vcmp.ge.f32.partialorder %v1588_v37, %v717_v52 }
 0x2a1   : > { %v721_v53 = vsel %vm719_vm8, %v1571_v24, 16.0 }
 0x2a2   : > { %v725_v54 = vsel %vm575_vm2, %v721_v53, inf }
 0x2a3   : > { %726 = vmin.xlane.f32.xlu1 %v725_v54 }
 0x2d7   : > { %v636_v55 = vpop.f32.mrf.mxu1 }
 0x2d9   : > { %v1286_v56 = vpop.f32.mrf.mxu1 }
 0x2db   : > { %v639_v57 = vpop.f32.mrf.mxu1 }
 0x2dc   : > { %v643_v58 = vpack.c.bf16 %v639_v57, %v636_v55 }
 0x2dd   : > { %v1287_v59 = vpop.f32.mrf.mxu1 }
 0x2de   : > { %1297 = vmatmul.mubr.msk.bf16.vlgmr.msra.gmra.mxu1 %vm302_vm1, %v643_v58 }
 0x2df   : > { %1307 = vmatpush3.bf16.msra.mxu1 %v1599_v41  ;;  %1314 = vmatprep.mubr.msk.bf16.mxu1 %vm1456_vm0, %v1455_v0 }
 0x2e0   : > { %1308 = vmatprep.subr.bf16.mxu1 %v1455_v0 }
 0x2e3   : > { %1309 = vmatpush3.bf16.msra.mxu1 %v1605_v42 }
 0x2e4   : > { %1310 = vmatprep.subr.bf16.mxu1 %v1455_v0 }
 0x2e7   : > { %1311 = vmatpush3.bf16.msra.mxu1 %v1613_v43 }
 0x2e8   : > { %1312 = vmatprep.subr.bf16.mxu1 %v1455_v0 }
 0x2eb   : > { %1313 = vmatpush3.bf16.msra.mxu1 %v1620_v44 }
 0x2ec   : > { %1336 = vmatprep.subr.bf16.mxu1 %v1455_v0 }
 0x328   : > { %v724_v60 = vpop.xlane.xlu0 %723 }
 0x329   : > { %vm728_vm9 = vcmp.eq.f32.partialorder %v1571_v24, %v724_v60 }
 0x32a   : > { %v730_v61 = vsel %vm728_vm9, -1e+30, %v1582_v33  ;;  %v732_v1 = vsel %vm728_vm9, 1.0, %v1455_v0 }
 0x32b   : > { %v826_v62 = vsel %vm575_vm2, %v730_v61, -inf }
 0x32c   : > { %v727_v63 = vpop.xlane.xlu1 %726  ;;  %827 = vmax.xlane.f32.xlu0 %v826_v62 }
 0x32d   : > { %vm729_vm10 = vcmp.eq.f32.partialorder %v1571_v24, %v727_v63 }
 0x32e   : > { %v731_v2 = vsel %vm729_vm10, -1e+30, %v1588_v37  ;;  %v733_v3 = vsel %vm729_vm10, 1.0, %v1455_v0 }
 0x32f   : > { %v734_v4 = vpack.c.bf16 %v733_v3, %v732_v1  ;;  %v829_v5 = vsel %vm575_vm2, %v731_v2, -inf }
 0x330   : > { %830 = vmax.xlane.f32.xlu1 %v829_v5 }
 0x331   : > { %1303 = vmatmul.mubr.msk.bf16.vlgmr.msra.gmra.mxu0 %vm575_vm2, %v734_v4 }
 0x332   : > { %1319 = vmatpush3.bf16.msra.mxu0 %v1577_v31  ;;  %1320 = vmatprep.mubr.msk.bf16.mxu0 %vm1456_vm0, %v1455_v0 }
 0x333   : > { %1324 = vmatprep.subr.bf16.mxu0 %v1455_v0 }
 0x39e   : > { %v1682_v10 = vpop.f32.mrf.mxu1 }
 0x3a0   : > { %v1298_v11 = vpop.f32.mrf.mxu1 }
 0x3a2   : > { %v1684_v12 = vpop.f32.mrf.mxu1 }
 0x3a4   : > { %v1299_v13 = vpop.f32.mrf.mxu1 }
 0x3b5   : > { %v828_v14 = vpop.xlane.xlu0 %827 }
 0x3b6   : > { %vm832_vm11 = vcmp.ge.f32.partialorder %v730_v61, %v828_v14 }
 0x3b7   : > { %v834_v15 = vsel %vm832_vm11, %v1571_v24, 16.0 }
 0x3b8   : > { %v836_v16 = vsel %vm575_vm2, %v834_v15, inf }
 0x3b9   : > { %v831_v17 = vpop.xlane.xlu1 %830  ;;  %837 = vmin.xlane.f32.xlu0 %v836_v16 }
 0x3ba   : > { %vm833_vm12 = vcmp.ge.f32.partialorder %v731_v2, %v831_v17 }
 0x3bb   : > { %v835_v18 = vsel %vm833_vm12, %v1571_v24, 16.0 }
 0x3bc   : > { %v839_v19 = vsel %vm575_vm2, %v835_v18, inf }
 0x3bd   : > { %840 = vmin.xlane.f32.xlu1 %v839_v19 }
 0x3f1   : > { %v772_v20 = vpop.f32.mrf.mxu0 }
 0x3f3   : > { %v1304_v21 = vpop.f32.mrf.mxu0 }
 0x3f5   : > { %v775_v22 = vpop.f32.mrf.mxu0 }
 0x3f6   : > { %v779_v23 = vpack.c.bf16 %v775_v22, %v772_v20 }
 0x3f7   : > { %v1305_v25 = vpop.f32.mrf.mxu0 }
 0x3f8   : > { %1315 = vmatmul.mubr.msk.bf16.vlgmr.msra.gmra.mxu1 %vm302_vm1, %v779_v23 }
 0x3f9   : > { %1337 = vmatpush3.bf16.msra.mxu1 %v1577_v31  ;;  %1338 = vmatprep.mubr.msk.bf16.mxu1 %vm1456_vm0, %v1455_v0 }
 0x3fa   : > { %1342 = vmatprep.subr.bf16.mxu1 %v1455_v0 }
 0x442   : > { %v838_v26 = vpop.xlane.xlu0 %837 }
 0x443   : > { %vm842_vm13 = vcmp.eq.f32.partialorder %v1571_v24, %v838_v26 }
 0x444   : > { %v844_v27 = vsel %vm842_vm13, -1e+30, %v730_v61  ;;  %v846_v30 = vsel %vm842_vm13, 1.0, %v1455_v0 }
 0x445   : > { %v940_v28 = vsel %vm575_vm2, %v844_v27, -inf }
 0x446   : > { %v841_v29 = vpop.xlane.xlu1 %840  ;;  %941 = vmax.xlane.f32.xlu0 %v940_v28 }
 0x447   : > { %vm843_vm14 = vcmp.eq.f32.partialorder %v1571_v24, %v841_v29 }
 0x448   : > { %v847_v32 = vsel %vm843_vm14, 1.0, %v1455_v0  ;;  %v845_v31 = vsel %vm843_vm14, -1e+30, %v731_v2 }
 0x449   : > { %v848_v33 = vpack.c.bf16 %v847_v32, %v846_v30  ;;  %v943_v34 = vsel %vm575_vm2, %v845_v31, -inf }
 0x44a   : > { %944 = vmax.xlane.f32.xlu1 %v943_v34 }
 0x44b   : > { %1321 = vmatmul.mubr.msk.bf16.vlgmr.msra.gmra.mxu0 %vm575_vm2, %v848_v33 }
 0x44c   : > { %1325 = vmatpush3.bf16.msra.mxu0 %v1599_v41  ;;  %1332 = vmatprep.mubr.msk.bf16.mxu0 %vm1456_vm0, %v1455_v0 }
 0x44d   : > { %1326 = vmatprep.subr.bf16.mxu0 %v1455_v0 }
 0x450   : > { %1327 = vmatpush3.bf16.msra.mxu0 %v1605_v42 }
 0x451   : > { %1328 = vmatprep.subr.bf16.mxu0 %v1455_v0 }
 0x454   : > { %1329 = vmatpush3.bf16.msra.mxu0 %v1613_v43 }
 0x455   : > { %1330 = vmatprep.subr.bf16.mxu0 %v1455_v0 }
 0x458   : > { %1331 = vmatpush3.bf16.msra.mxu0 %v1620_v44 }
 0x4b8   : > { %v817_v35 = vpop.f32.mrf.mxu1 }
 0x4ba   : > { %v1316_v36 = vpop.f32.mrf.mxu1 }
 0x4bc   : > { %v820_v37 = vpop.f32.mrf.mxu1 }
 0x4bd   : > { %v825_v61 = vmax.f32 %v1684_v12, %v820_v37 }
 0x4be   : > { %v1317_v38 = vpop.f32.mrf.mxu1 }
 0x4cf   : > { %v942_v39 = vpop.xlane.xlu0 %941 }
 0x4d0   : > { %vm946_vm15 = vcmp.ge.f32.partialorder %v844_v27, %v942_v39 }
 0x4d1   : > { %v948_v40 = vsel %vm946_vm15, %v1571_v24, 16.0 }
 0x4d2   : > { %v950_v45 = vsel %vm575_vm2, %v948_v40, inf }
 0x4d3   : > { %v945_v46 = vpop.xlane.xlu1 %944  ;;  %951 = vmin.xlane.f32.xlu0 %v950_v45 }
 0x4d4   : > { %vm947_vm3 = vcmp.ge.f32.partialorder %v845_v31, %v945_v46 }
 0x4d5   : > { %v949_v47 = vsel %vm947_vm3, %v1571_v24, 16.0 }
 0x4d6   : > { %v953_v48 = vsel %vm575_vm2, %v949_v47, inf }
 0x4d7   : > { %954 = vmin.xlane.f32.xlu1 %v953_v48 }
 0x50b   : > { %v886_v49 = vpop.f32.mrf.mxu0 }
 0x50d   : > { %v1322_v50 = vpop.f32.mrf.mxu0 }
 0x50f   : > { %v889_v51 = vpop.f32.mrf.mxu0 }
 0x510   : > { %v893_v52 = vpack.c.bf16 %v889_v51, %v886_v49 }
 0x511   : > { %v1323_v53 = vpop.f32.mrf.mxu0 }
 0x512   : > { %1333 = vmatmul.mubr.msk.bf16.vlgmr.msra.gmra.mxu0 %vm302_vm1, %v893_v52 }
 0x55c   : > { %v952_v54 = vpop.xlane.xlu0 %951 }
 0x55d   : > { %vm956_vm4 = vcmp.eq.f32.partialorder %v1571_v24, %v952_v54 }
 0x55e   : > { %v958_v56 = vsel %vm956_vm4, 1.0, %v1455_v0 }
 0x560   : > { %v955_v55 = vpop.xlane.xlu1 %954 }
 0x561   : > { %vm957_vm5 = vcmp.eq.f32.partialorder %v1571_v24, %v955_v55  ;;  %v824_v24 = vmax.f32 %v1682_v10, %v817_v35 }
 0x562   : > { %v959_v57 = vsel %vm957_vm5, 1.0, %v1455_v0 }
 0x563   : > { %v960_v58 = vpack.c.bf16 %v959_v57, %v958_v56 }
 0x565   : > { %1339 = vmatmul.mubr.msk.bf16.vlgmr.msra.gmra.mxu1 %vm575_vm2, %v960_v58 }
 0x566   : > { %1343 = vmatpush3.bf16.msra.mxu1 %v1599_v41  ;;  %1350 = vmatprep.mubr.msk.bf16.mxu1 %vm1456_vm0, %v1455_v0 }
 0x567   : > { %1344 = vmatprep.subr.bf16.mxu1 %v1455_v0 }
 0x56a   : > { %1345 = vmatpush3.bf16.msra.mxu1 %v1605_v42 }
 0x56b   : > { %1346 = vmatprep.subr.bf16.mxu1 %v1455_v0 }
 0x56e   : > { %1347 = vmatpush3.bf16.msra.mxu1 %v1613_v43 }
 0x56f   : > { %1348 = vmatprep.subr.bf16.mxu1 %v1455_v0  ;;  %v1193_v0 = vld [vmem:[#allocation2] ss:$0 sm:$0xff] }
 0x570   : > { %v569_v5 = vadd.f32 %v1193_v0, %v1678_v6  ;;  %v572_v12 = vadd.f32 %v1193_v0, %v1680_v8 }
 0x572   : > { %1349 = vmatpush3.bf16.msra.mxu1 %v1620_v44 }
 0x5d2   : > { %v931_v59 = vpop.f32.mrf.mxu0 }
 0x5d3   : > { %v938_v60 = vmax.f32 %v824_v24, %v931_v59 }
 0x5d4   : > { %v1334_v41 = vpop.f32.mrf.mxu0 }
 0x5d6   : > { %v934_v62 = vpop.f32.mrf.mxu0 }
 0x5d7   : > { %v939_v63 = vmax.f32 %v825_v61, %v934_v62 }
 0x5d8   : > { %v1335_v1 = vpop.f32.mrf.mxu0 }
 0x625   : > { %v998_v42 = vpop.f32.mrf.mxu1 }
 0x627   : > { %v1340_v2 = vpop.f32.mrf.mxu1 }
 0x629   : > { %v1001_v3 = vpop.f32.mrf.mxu1 }
 0x62a   : > { %v1005_v4 = vpack.c.bf16 %v1001_v3, %v998_v42 }
 0x62b   : > { %v1341_v43 = vpop.f32.mrf.mxu1 }
 0x62c   : > { %1351 = vmatmul.mubr.msk.bf16.vlgmr.msra.gmra.mxu1 %vm302_vm1, %v1005_v4 }
 0x6ec   : > { %v1043_v44 = vpop.f32.mrf.mxu1 }
 0x6ed   : > { %v1050_v7 = vmax.f32 %v938_v60, %v1043_v44 }
 0x6ee   : > { %v1352_v9 = vpop.f32.mrf.mxu1 }
 0x6ef   : > { %v1052_v10 = vadd.f32 %v1050_v7, %v569_v5 }
 0x6f0   : > { %v1046_v11 = vpop.f32.mrf.mxu1 }
 0x6f1   : > { %vm1054_vm0 = vcmp.gt.f32.partialorder %v1052_v10, 0.0  ;;  %v1056_v13 = vmul.f32 0.2, %v1052_v10  ;;  %v1051_v14 = vmax.f32 %v939_v63, %v1046_v11 }
 0x6f2   : > { %v1353_v15 = vpop.f32.mrf.mxu1 }
 0x6f3   : > { %v1058_v16 = vsel %vm1054_vm0, %v1052_v10, %v1056_v13  ;;  %v1053_v17 = vadd.f32 %v1051_v14, %v572_v12 }
 0x6f4   : > { %1060 = vst [vmem:[%s295_s10] sm:$0xff] %v1058_v16 }
 0x6f5   : > { %vm1055_vm1 = vcmp.gt.f32.partialorder %v1053_v17, 0.0  ;;  %v1057_v18 = vmul.f32 0.2, %v1053_v17 }
 0x6f7   : > { %v1059_v6 = vsel %vm1055_vm1, %v1053_v17, %v1057_v18 }
 0x6f8   : > { %1061 = vst [vmem:[%s295_s10 + $0x8] sm:$0xff] %v1059_v6 }
 0x6f9 PF: > { %s16_s20 = sadd.s32 1, %s1452_s20   ;;  %s1756_s18 = smov %s1448_s19 }
 0x6fa   : > { %p13_p2 = scmp.ge.s32.totalorder %s16_s20, 4   ;;  %s1757_s19 = smov %s1759_s22 }
 0x6fc   :  { %15 = sbr.rel (!%p13_p2) target bundleno = 2 (0x2), region = 78 }
 0x701   :  { %1092 = vsyncpa [#allocation3], 1 }
 0x702   :  { %1094 = vsyncpa [#allocation3 + $0x1], 1 }

// kernel: dgcnn_encoder.6
= control target key start
LH: loop header
LB: loop body
LE: loop exit
PB: predicated region body
PF: predicated region fallthrough
CT: control target
= control target key end

     0   :  { %10 = vsyncpa [#allocation3], 0  ;;  %s1833_s0 = inlined_call_operand.vmem [shape: f32[2,16,64], index: 0, kind: input, shape index: {}, may-alias: {0,1}]   ;;  %s1834_s1 = inlined_call_operand.vmem [shape: f32[2,16,64], index: 1, kind: input, shape index: {}, may-alias: {0,1}]   ;;  %s1835_s2 = inlined_call_operand.hbm [shape: bf16[64,64], index: 2, kind: input, shape index: {}]   ;;  %s1836_s3 = inlined_call_operand.vmem [shape: bf16[64,64], index: 3, kind: input, shape index: {}]   ;;  %s1837_s4 = inlined_call_operand.hbm [shape: f32[1,64], index: 4, kind: input, shape index: {}]   ;;  %s1838_s5 = inlined_call_operand.vmem [shape: f32[2,16,64], index: 5, kind: output, shape index: {}]  }
   0x1   :  { %11 = vsyncpa [#allocation5], 0  ;;  %s1560_s18 = smov 0   ;;  %s1562_s19 = smov 0  }
   0x2   :  { %s1564_s20 = smov 0  }
   0x3 LB: > { %s1198_s21 = sadd.s32 4294967295, %s1521_s20   ;;  %s29_s22 = sadd.s32 1, %s1517_s19  ;;  %s1521_s20 = sphi %s1564_s20, %s17_s20   ;;  %s1517_s19 = sphi %s1562_s19, %s1843_s19   ;;  %s1513_s18 = sphi %s1560_s18, %s1842_s18  }
   0x4   : > { %p31_p0 = scmp.ge.s32.totalorder %s29_s22, 2  ;;  %p1200_p1 = scmp.ge.s32.totalorder %s1521_s20, 1 }
   0x5   : > { %p179_p2 = scmp.lt.s32.totalorder %s1521_s20, 3  ;;  %p1585_p4 = scmp.eq.s32.totalorder %s1198_s21, 0 }
   0x6   : > { %s1845_s22 = smov (%p31_p0, %s29_s22), 0  ;;  %s1523_s25 = smov [#allocation2]  }
   0x7   : > { %p1581_p3 = pnand %p1200_p1, %p179_p2  ;;  %s191_s26 = sshll.u32 %s1523_s25, 4  ;;  %s192_s26 = int_to_ptr.vmem [resolvable:$true] %s191_s26 }
   0x8   : > { %s1524_s28 = smov [#allocation4]   ;;  %s1450_s30 = scalar_lea.vmem %s192_s26, 512 }
   0x9   : > { %p1389_p5 = pneg %p1581_p3  ;;  %s208_s29 = sshll.u32 %s1524_s28, 4  ;;  %s209_s29 = int_to_ptr.vmem [resolvable:$true] %s208_s29 }
   0xa   : > { %p1451_p8 = scmp.ne.s32.totalorder %s192_s26, %s1450_s30  ;;  %p1458_p11 = scmp.lt.s32.totalorder %s192_s26, %s192_s26 }
   0xb   : > { %p1593_p6 = pnand %p1585_p4, %p1389_p5  ;;  %p1459_p12 = scmp.lt.s32.totalorder %s1450_s30, %s1450_s30 }
   0xd   : > { %p1441_p7 = pneg %p1593_p6  ;;  %p1460_p13 = por %p1459_p12, %p1458_p11 }
   0xf   : > { %p1453_p9 = pnand %p1451_p8, %p1441_p7 }
  0x11   : > { %p1454_p10 = pneg %p1453_p9 }
  0x13   : > { %p1461_p0 = pnand %p1460_p13, %p1454_p10 }
  0x15   : > { %1464 = shalt.err (!%p1461_p0)
}
  0x16   : > { %s1525_s6 = smov 64   ;;  %s1526_s7 = smov 4  }
  0x17   : > { %1392 = dma.hbm_to_vmem [thread:$0]  (!%p1593_p6), %s1835_s2, 512, %s192_s26, [#allocation3], %s1525_s6, %s1525_s6, %s1526_s7  }
  0x18   : > { %s1476_s10 = scalar_lea.vmem %s209_s29, 16  ;;  %s1483_s11 = scalar_lea.vmem %s209_s29, 32 }
  0x19   : > { %p1477_p1 = scmp.ne.s32.totalorder %s209_s29, %s1476_s10  ;;  %p1484_p8 = scmp.lt.s32.totalorder %s209_s29, %s209_s29 }
  0x1a   : > { %p1485_p9 = scmp.lt.s32.totalorder %s1483_s11, %s1476_s10 }
  0x1b   : > { %p1479_p2 = pnand %p1477_p1, %p1441_p7 }
  0x1c   : > { %p1486_p10 = por %p1485_p9, %p1484_p8 }
  0x1d   : > { %p1480_p5 = pneg %p1479_p2 }
  0x1f   : > { %p1487_p11 = pnand %p1486_p10, %p1480_p5 }
  0x21   : > { %1490 = shalt.err (!%p1487_p11)
}
  0x22   : > { %1395 = dma.hbm_to_vmem [thread:$0]  (!%p1593_p6), %s1837_s4, 16, %s209_s29, [#allocation5]  }
  0x23   : > { %242 = sbr.rel (%p1581_p3) target bundleno = 1800 (0x708), region = 40 }
  0x28   : > { %1504 = dma.done.wait (%p1585_p4), [#allocation3], 512  }
  0x29   : > { %1506 = vsyncadd (%p1585_p4), [#allocation3], 4294966784 }
  0x2a   : > { %1508 = dma.done.wait (%p1585_p4), [#allocation5], 16  }
  0x2b   : > { %1510 = vsyncadd (%p1585_p4), [#allocation5], 4294967280  ;;  %p288_p7 = scmp.lt.s32.totalorder %s1513_s18, 1  ;;  %v1527_v0 = vmov 0.0   ;;  %vm1528_vm0 = vmmov 0   ;;  %vm317_vm1 = vcmask 523264   ;;  %v488_v9 = vlaneseq }
  0x2c   : > { %1309 = vmatprep.subr.bf16.mxu1 %v1527_v0  ;;  %1311 = vmatprep.mubr.msk.bf16.mxu1 %vm1528_vm0, %v1527_v0  ;;  %v1529_v8 = vmov 1.0   ;;  %vm590_vm2 = vcmask 130048   ;;  %v1691_v41 = vld [vmem:[#allocation2 + $0x18] sm:$0xff]   ;;  %v1694_v42 = vld [vmem:[#allocation2 + $0x10] sm:$0xff]   ;;  %v1699_v43 = vld [vmem:[#allocation2 + $0x8] sm:$0xff]  }
  0x2d   : > { %s1847_s18 = smov (!%p288_p7, %s1513_s18), 1  ;;  %v489_v10 = vshrl.u32 %v488_v9, 7  ;;  %v495_v23 = vand.u32 127, %v488_v9  ;;  %v1703_v44 = vld [vmem:[#allocation2] sm:$0xff]   ;;  %v1435_v45 = vld [vmem:[%s1836_s3 + $0x18] sm:$0xff]   ;;  %v1436_v46 = vld [vmem:[%s1836_s3 + $0x10] sm:$0xff]  }
  0x2e   : > { %s1630_s14 = sshll.u32 %s1847_s18, 4  ;;  %v1437_v47 = vld [vmem:[%s1836_s3 + $0x8] sm:$0xff]   ;;  %v1438_v48 = vld [vmem:[%s1836_s3] sm:$0xff]  }
  0x2f   : > { %s301_s17 = scalar_lea.vmem %s1834_s1, %s1630_s14  ;;  %s295_s24 = scalar_lea.vmem %s1833_s0, %s1630_s14  ;;  %v490_v12 = vsub.s32 0, %v489_v10  ;;  %v1666_v24 = vcvt.s32.f32 %v495_v23 }
  0x30   : > { %v316_v1 = vld [vmem:[%s301_s17 + $0x8] sm:$0xff]  ;;  %v315_v2 = vld [vmem:[%s301_s17] sm:$0xff]  ;;  %s310_s9 = scalar_lea.vmem %s1838_s5, %s1630_s14 }
  0x31   : > { %v1640_v3 = vld [vmem:[%s295_s24] sm:$0xff]  ;;  %1283 = vmatprep.subr.msk.mxu0 %vm317_vm1, %v316_v1  ;;  %v1643_v4 = vld [vmem:[%s295_s24 + $0x8] sm:$0xff]  ;;  %v406_v6 = vmul.f32 %v316_v1, %v316_v1  ;;  %v405_v7 = vmul.f32 %v315_v2, %v315_v2  ;;  %v1672_v31 = vpack.c.bf16 %v316_v1, %v315_v2 }
  0x32   : > { %1287 = vmatprep.mubr.msk.f32.mxu0 %vm317_vm1, %v1640_v3  ;;  %1284 = vmatpush3.xpose.msk.msra.mxu0 %vm317_vm1, %v316_v1  ;;  %v498_v5 = vpack.c.bf16 %v1643_v4, %v1640_v3 }
  0x33   : > { %1285 = vmatprep.subr.msk.mxu0 %vm317_vm1, %v315_v2  ;;  %1310 = vmatpush3.bf16.msra.mxu1 %v1672_v31 }
  0x34   : > { %1315 = vmatprep.subr.bf16.mxu1 %v1527_v0 }
  0x36   : > { %1286 = vmatpush3.xpose.msk.msra.mxu0 %vm317_vm1, %v315_v2 }
  0x37   : > { %1290 = vmatprep.subr.mxu0 %v1527_v0 }
  0x39   : > { %1288 = vmatmul.mubr.msk.f32.vlgmr.msra.gmra.mxu0 %vm317_vm1, %v1643_v4 }
  0x3a   : > { %1291 = vmatpush3.xpose.msk.msra.mxu0 %vm317_vm1, %v406_v6  ;;  %1294 = vmatprep.mubr.msk.f32.mxu0 %vm1528_vm0, %v1527_v0 }
  0x3b   : > { %1292 = vmatprep.subr.mxu0 %v1527_v0 }
  0x3e   : > { %1293 = vmatpush3.xpose.msk.msra.mxu0 %vm317_vm1, %v405_v7 }
  0x3f   : > { %1297 = vmatprep.subr.bf16.mxu0 %v1527_v0 }
  0x41   : > { %1295 = vmatmul.mubr.msk.f32.vlgmr.msra.gmra.mxu0 %vm317_vm1, %v1529_v8 }
  0x42   : > { %1305 = vmatprep.mubr.msk.bf16.mxu0 %vm1528_vm0, %v1527_v0  ;;  %1298 = vmatpush3.bf16.msra.mxu0 %v1435_v45 }
  0x43   : > { %1299 = vmatprep.subr.bf16.mxu0 %v1527_v0 }
  0x46   : > { %1300 = vmatpush3.bf16.msra.mxu0 %v1436_v46 }
  0x47   : > { %1301 = vmatprep.subr.bf16.mxu0 %v1527_v0 }
  0x4a   : > { %1302 = vmatpush3.bf16.msra.mxu0 %v1437_v47 }
  0x4b   : > { %1303 = vmatprep.subr.bf16.mxu0 %v1527_v0 }
  0x4e   : > { %1304 = vmatpush3.bf16.msra.mxu0 %v1438_v48 }
  0x4f   : > { %1327 = vmatprep.subr.bf16.mxu0 %v1527_v0 }
  0x51   : > { %1306 = vmatmul.mubr.msk.bf16.vlgmr.msra.gmra.mxu0 %vm317_vm1, %v498_v5 }
  0x52   : > { %1328 = vmatpush3.bf16.msra.mxu0 %v1672_v31  ;;  %1329 = vmatprep.mubr.msk.bf16.mxu0 %vm1528_vm0, %v1527_v0 }
  0x53   : > { %1345 = vmatprep.subr.bf16.mxu0 %v1527_v0 }
  0xf9   : > { %v1289_v11 = vpop.f32.mrf.mxu0 }
  0xfa   : > { %v487_v18 = vmul.f32 2.0, %v1289_v11 }
  0xfb   : > { %v396_v13 = vpop.f32.mrf.mxu0 }
  0xfc   : > { %v486_v15 = vmul.f32 2.0, %v396_v13 }
 0x101   : > { %v482_v14 = vpop.f32.mrf.mxu0 }
 0x102   : > { %v491_v16 = vrot.slane %v482_v14, %v490_v12 }
 0x103   : > { %v1296_v17 = vpop.f32.mrf.mxu0 }
 0x104   : > { %v492_v19 = vsub.f32 %v486_v15, %v491_v16  ;;  %v493_v20 = vsub.f32 %v487_v18, %v491_v16 }
 0x106   : > { %v591_v21 = vsel %vm590_vm2, %v492_v19, -inf  ;;  %v594_v22 = vsel %vm590_vm2, %v493_v20, -inf }
 0x107   : > { %592 = vmax.xlane.f32.xlu0 %v591_v21 }
 0x10b   : > { %595 = vmax.xlane.f32.xlu0 %v594_v22 }
 0x111   : > { %v1761_v6 = vpop.f32.mrf.mxu0 }
 0x113   : > { %v1307_v7 = vpop.f32.mrf.mxu0 }
 0x115   : > { %v1763_v8 = vpop.f32.mrf.mxu0 }
 0x117   : > { %v1308_v9 = vpop.f32.mrf.mxu0 }
 0x190   : > { %v593_v25 = vpop.xlane.xlu0 %592 }
 0x191   : > { %vm597_vm3 = vcmp.ge.f32.partialorder %v492_v19, %v593_v25 }
 0x192   : > { %v599_v26 = vsel %vm597_vm3, %v1666_v24, 16.0 }
 0x193   : > { %v601_v27 = vsel %vm590_vm2, %v599_v26, inf }
 0x194   : > { %602 = vmin.xlane.f32.xlu1 %v601_v27  ;;  %v596_v28 = vpop.xlane.xlu0 %595 }
 0x195   : > { %vm598_vm4 = vcmp.ge.f32.partialorder %v493_v20, %v596_v28 }
 0x196   : > { %v600_v29 = vsel %vm598_vm4, %v1666_v24, 16.0 }
 0x197   : > { %v604_v30 = vsel %vm590_vm2, %v600_v29, inf }
 0x198   : > { %605 = vmin.xlane.f32.xlu1 %v604_v30 }
 0x21d   : > { %v603_v32 = vpop.xlane.xlu1 %602 }
 0x21e   : > { %vm607_vm5 = vcmp.eq.f32.partialorder %v1666_v24, %v603_v32 }
 0x21f   : > { %v1677_v33 = vsel %vm607_vm5, -1e+30, %v492_v19  ;;  %v611_v36 = vsel %vm607_vm5, 1.0, %v1527_v0 }
 0x220   : > { %v727_v34 = vsel %vm590_vm2, %v1677_v33, -inf }
 0x221   : > { %728 = vmax.xlane.f32.xlu0 %v727_v34  ;;  %v606_v35 = vpop.xlane.xlu1 %605 }
 0x222   : > { %vm608_vm6 = vcmp.eq.f32.partialorder %v1666_v24, %v606_v35 }
 0x223   : > { %v1683_v37 = vsel %vm608_vm6, -1e+30, %v493_v20  ;;  %v612_v38 = vsel %vm608_vm6, 1.0, %v1527_v0 }
 0x224   : > { %v613_v39 = vpack.c.bf16 %v612_v38, %v611_v36  ;;  %v730_v40 = vsel %vm590_vm2, %v1683_v37, -inf }
 0x225   : > { %731 = vmax.xlane.f32.xlu1 %v730_v40 }
 0x226   : > { %1312 = vmatmul.mubr.msk.bf16.vlgmr.msra.gmra.mxu1 %vm590_vm2, %v613_v39 }
 0x227   : > { %1323 = vmatprep.mubr.msk.bf16.mxu1 %vm1528_vm0, %v1527_v0  ;;  %1316 = vmatpush3.bf16.msra.mxu1 %v1691_v41 }
 0x228   : > { %1317 = vmatprep.subr.bf16.mxu1 %v1527_v0 }
 0x22b   : > { %1318 = vmatpush3.bf16.msra.mxu1 %v1694_v42 }
 0x22c   : > { %1319 = vmatprep.subr.bf16.mxu1 %v1527_v0 }
 0x22f   : > { %1320 = vmatpush3.bf16.msra.mxu1 %v1699_v43 }
 0x230   : > { %1321 = vmatprep.subr.bf16.mxu1 %v1527_v0 }
 0x233   : > { %1322 = vmatpush3.bf16.msra.mxu1 %v1703_v44 }
 0x234   : > { %1333 = vmatprep.subr.bf16.mxu1 %v1527_v0 }
 0x2aa   : > { %v729_v49 = vpop.xlane.xlu0 %728 }
 0x2ab   : > { %vm733_vm7 = vcmp.ge.f32.partialorder %v1677_v33, %v729_v49 }
 0x2ac   : > { %v735_v50 = vsel %vm733_vm7, %v1666_v24, 16.0 }
 0x2ad   : > { %v737_v51 = vsel %vm590_vm2, %v735_v50, inf }
 0x2ae   : > { %v732_v52 = vpop.xlane.xlu1 %731  ;;  %738 = vmin.xlane.f32.xlu0 %v737_v51 }
 0x2af   : > { %vm734_vm8 = vcmp.ge.f32.partialorder %v1683_v37, %v732_v52 }
 0x2b0   : > { %v736_v53 = vsel %vm734_vm8, %v1666_v24, 16.0 }
 0x2b1   : > { %v740_v54 = vsel %vm590_vm2, %v736_v53, inf }
 0x2b2   : > { %741 = vmin.xlane.f32.xlu1 %v740_v54 }
 0x2e6   : > { %v651_v55 = vpop.f32.mrf.mxu1 }
 0x2e8   : > { %v1313_v56 = vpop.f32.mrf.mxu1 }
 0x2ea   : > { %v654_v57 = vpop.f32.mrf.mxu1 }
 0x2eb   : > { %v658_v58 = vpack.c.bf16 %v654_v57, %v651_v55 }
 0x2ec   : > { %v1314_v59 = vpop.f32.mrf.mxu1 }
 0x2ed   : > { %1324 = vmatmul.mubr.msk.bf16.vlgmr.msra.gmra.mxu1 %vm317_vm1, %v658_v58 }
 0x2ee   : > { %1334 = vmatpush3.bf16.msra.mxu1 %v1691_v41  ;;  %1341 = vmatprep.mubr.msk.bf16.mxu1 %vm1528_vm0, %v1527_v0 }
 0x2ef   : > { %1335 = vmatprep.subr.bf16.mxu1 %v1527_v0 }
 0x2f2   : > { %1336 = vmatpush3.bf16.msra.mxu1 %v1694_v42 }
 0x2f3   : > { %1337 = vmatprep.subr.bf16.mxu1 %v1527_v0 }
 0x2f6   : > { %1338 = vmatpush3.bf16.msra.mxu1 %v1699_v43 }
 0x2f7   : > { %1339 = vmatprep.subr.bf16.mxu1 %v1527_v0 }
 0x2fa   : > { %1340 = vmatpush3.bf16.msra.mxu1 %v1703_v44 }
 0x2fb   : > { %1363 = vmatprep.subr.bf16.mxu1 %v1527_v0 }
 0x337   : > { %v739_v60 = vpop.xlane.xlu0 %738 }
 0x338   : > { %vm743_vm9 = vcmp.eq.f32.partialorder %v1666_v24, %v739_v60 }
 0x339   : > { %v745_v61 = vsel %vm743_vm9, -1e+30, %v1677_v33  ;;  %v747_v1 = vsel %vm743_vm9, 1.0, %v1527_v0 }
 0x33a   : > { %v841_v62 = vsel %vm590_vm2, %v745_v61, -inf }
 0x33b   : > { %v742_v63 = vpop.xlane.xlu1 %741  ;;  %842 = vmax.xlane.f32.xlu0 %v841_v62 }
 0x33c   : > { %vm744_vm10 = vcmp.eq.f32.partialorder %v1666_v24, %v742_v63 }
 0x33d   : > { %v746_v2 = vsel %vm744_vm10, -1e+30, %v1683_v37  ;;  %v748_v3 = vsel %vm744_vm10, 1.0, %v1527_v0 }
 0x33e   : > { %v749_v4 = vpack.c.bf16 %v748_v3, %v747_v1  ;;  %v844_v5 = vsel %vm590_vm2, %v746_v2, -inf }
 0x33f   : > { %845 = vmax.xlane.f32.xlu1 %v844_v5 }
 0x340   : > { %1330 = vmatmul.mubr.msk.bf16.vlgmr.msra.gmra.mxu0 %vm590_vm2, %v749_v4 }
 0x341   : > { %1346 = vmatpush3.bf16.msra.mxu0 %v1672_v31  ;;  %1347 = vmatprep.mubr.msk.bf16.mxu0 %vm1528_vm0, %v1527_v0 }
 0x342   : > { %1351 = vmatprep.subr.bf16.mxu0 %v1527_v0 }
 0x3ad   : > { %v1765_v10 = vpop.f32.mrf.mxu1 }
 0x3af   : > { %v1325_v11 = vpop.f32.mrf.mxu1 }
 0x3b1   : > { %v1767_v12 = vpop.f32.mrf.mxu1 }
 0x3b3   : > { %v1326_v13 = vpop.f32.mrf.mxu1 }
 0x3c4   : > { %v843_v14 = vpop.xlane.xlu0 %842 }
 0x3c5   : > { %vm847_vm11 = vcmp.ge.f32.partialorder %v745_v61, %v843_v14 }
 0x3c6   : > { %v849_v15 = vsel %vm847_vm11, %v1666_v24, 16.0 }
 0x3c7   : > { %v851_v16 = vsel %vm590_vm2, %v849_v15, inf }
 0x3c8   : > { %v846_v17 = vpop.xlane.xlu1 %845  ;;  %852 = vmin.xlane.f32.xlu0 %v851_v16 }
 0x3c9   : > { %vm848_vm12 = vcmp.ge.f32.partialorder %v746_v2, %v846_v17 }
 0x3ca   : > { %v850_v18 = vsel %vm848_vm12, %v1666_v24, 16.0 }
 0x3cb   : > { %v854_v19 = vsel %vm590_vm2, %v850_v18, inf }
 0x3cc   : > { %855 = vmin.xlane.f32.xlu1 %v854_v19 }
 0x400   : > { %v787_v20 = vpop.f32.mrf.mxu0 }
 0x402   : > { %v1331_v21 = vpop.f32.mrf.mxu0 }
 0x404   : > { %v790_v22 = vpop.f32.mrf.mxu0 }
 0x405   : > { %v794_v23 = vpack.c.bf16 %v790_v22, %v787_v20 }
 0x406   : > { %v1332_v25 = vpop.f32.mrf.mxu0 }
 0x407   : > { %1342 = vmatmul.mubr.msk.bf16.vlgmr.msra.gmra.mxu1 %vm317_vm1, %v794_v23 }
 0x408   : > { %1364 = vmatpush3.bf16.msra.mxu1 %v1672_v31  ;;  %1365 = vmatprep.mubr.msk.bf16.mxu1 %vm1528_vm0, %v1527_v0 }
 0x409   : > { %1369 = vmatprep.subr.bf16.mxu1 %v1527_v0 }
 0x451   : > { %v853_v26 = vpop.xlane.xlu0 %852 }
 0x452   : > { %vm857_vm13 = vcmp.eq.f32.partialorder %v1666_v24, %v853_v26 }
 0x453   : > { %v859_v27 = vsel %vm857_vm13, -1e+30, %v745_v61  ;;  %v861_v30 = vsel %vm857_vm13, 1.0, %v1527_v0 }
 0x454   : > { %v955_v28 = vsel %vm590_vm2, %v859_v27, -inf }
 0x455   : > { %v856_v29 = vpop.xlane.xlu1 %855  ;;  %956 = vmax.xlane.f32.xlu0 %v955_v28 }
 0x456   : > { %vm858_vm14 = vcmp.eq.f32.partialorder %v1666_v24, %v856_v29 }
 0x457   : > { %v862_v32 = vsel %vm858_vm14, 1.0, %v1527_v0  ;;  %v860_v31 = vsel %vm858_vm14, -1e+30, %v746_v2 }
 0x458   : > { %v863_v33 = vpack.c.bf16 %v862_v32, %v861_v30  ;;  %v958_v34 = vsel %vm590_vm2, %v860_v31, -inf }
 0x459   : > { %959 = vmax.xlane.f32.xlu1 %v958_v34 }
 0x45a   : > { %1348 = vmatmul.mubr.msk.bf16.vlgmr.msra.gmra.mxu0 %vm590_vm2, %v863_v33 }
 0x45b   : > { %1352 = vmatpush3.bf16.msra.mxu0 %v1691_v41  ;;  %1359 = vmatprep.mubr.msk.bf16.mxu0 %vm1528_vm0, %v1527_v0 }
 0x45c   : > { %1353 = vmatprep.subr.bf16.mxu0 %v1527_v0 }
 0x45f   : > { %1354 = vmatpush3.bf16.msra.mxu0 %v1694_v42 }
 0x460   : > { %1355 = vmatprep.subr.bf16.mxu0 %v1527_v0 }
 0x463   : > { %1356 = vmatpush3.bf16.msra.mxu0 %v1699_v43 }
 0x464   : > { %1357 = vmatprep.subr.bf16.mxu0 %v1527_v0 }
 0x467   : > { %1358 = vmatpush3.bf16.msra.mxu0 %v1703_v44 }
 0x4c7   : > { %v832_v35 = vpop.f32.mrf.mxu1 }
 0x4c9   : > { %v1343_v36 = vpop.f32.mrf.mxu1 }
 0x4cb   : > { %v835_v37 = vpop.f32.mrf.mxu1 }
 0x4cc   : > { %v840_v61 = vmax.f32 %v1767_v12, %v835_v37 }
 0x4cd   : > { %v1344_v38 = vpop.f32.mrf.mxu1 }
 0x4de   : > { %v957_v39 = vpop.xlane.xlu0 %956 }
 0x4df   : > { %vm961_vm15 = vcmp.ge.f32.partialorder %v859_v27, %v957_v39 }
 0x4e0   : > { %v963_v40 = vsel %vm961_vm15, %v1666_v24, 16.0 }
 0x4e1   : > { %v965_v45 = vsel %vm590_vm2, %v963_v40, inf }
 0x4e2   : > { %v960_v46 = vpop.xlane.xlu1 %959  ;;  %966 = vmin.xlane.f32.xlu0 %v965_v45 }
 0x4e3   : > { %vm962_vm3 = vcmp.ge.f32.partialorder %v860_v31, %v960_v46 }
 0x4e4   : > { %v964_v47 = vsel %vm962_vm3, %v1666_v24, 16.0 }
 0x4e5   : > { %v968_v48 = vsel %vm590_vm2, %v964_v47, inf }
 0x4e6   : > { %969 = vmin.xlane.f32.xlu1 %v968_v48 }
 0x51a   : > { %v901_v49 = vpop.f32.mrf.mxu0 }
 0x51c   : > { %v1349_v50 = vpop.f32.mrf.mxu0 }
 0x51e   : > { %v904_v51 = vpop.f32.mrf.mxu0 }
 0x51f   : > { %v908_v52 = vpack.c.bf16 %v904_v51, %v901_v49 }
 0x520   : > { %v1350_v53 = vpop.f32.mrf.mxu0 }
 0x521   : > { %1360 = vmatmul.mubr.msk.bf16.vlgmr.msra.gmra.mxu0 %vm317_vm1, %v908_v52 }
 0x56b   : > { %v967_v54 = vpop.xlane.xlu0 %966 }
 0x56c   : > { %vm971_vm4 = vcmp.eq.f32.partialorder %v1666_v24, %v967_v54 }
 0x56d   : > { %v973_v56 = vsel %vm971_vm4, 1.0, %v1527_v0 }
 0x56f   : > { %v970_v55 = vpop.xlane.xlu1 %969 }
 0x570   : > { %vm972_vm5 = vcmp.eq.f32.partialorder %v1666_v24, %v970_v55  ;;  %v839_v24 = vmax.f32 %v1765_v10, %v832_v35 }
 0x571   : > { %v974_v57 = vsel %vm972_vm5, 1.0, %v1527_v0 }
 0x572   : > { %v975_v58 = vpack.c.bf16 %v974_v57, %v973_v56 }
 0x574   : > { %1366 = vmatmul.mubr.msk.bf16.vlgmr.msra.gmra.mxu1 %vm590_vm2, %v975_v58 }
 0x575   : > { %1370 = vmatpush3.bf16.msra.mxu1 %v1691_v41  ;;  %1377 = vmatprep.mubr.msk.bf16.mxu1 %vm1528_vm0, %v1527_v0 }
 0x576   : > { %1371 = vmatprep.subr.bf16.mxu1 %v1527_v0 }
 0x579   : > { %1372 = vmatpush3.bf16.msra.mxu1 %v1694_v42 }
 0x57a   : > { %1373 = vmatprep.subr.bf16.mxu1 %v1527_v0 }
 0x57d   : > { %1374 = vmatpush3.bf16.msra.mxu1 %v1699_v43 }
 0x57e   : > { %1375 = vmatprep.subr.bf16.mxu1 %v1527_v0  ;;  %v1220_v0 = vld [vmem:[#allocation4] ss:$0 sm:$0xff] }
 0x57f   : > { %v584_v5 = vadd.f32 %v1220_v0, %v1761_v6  ;;  %v587_v12 = vadd.f32 %v1220_v0, %v1763_v8 }
 0x581   : > { %1376 = vmatpush3.bf16.msra.mxu1 %v1703_v44 }
 0x5e1   : > { %v946_v59 = vpop.f32.mrf.mxu0 }
 0x5e2   : > { %v953_v60 = vmax.f32 %v839_v24, %v946_v59 }
 0x5e3   : > { %v1361_v41 = vpop.f32.mrf.mxu0 }
 0x5e5   : > { %v949_v62 = vpop.f32.mrf.mxu0 }
 0x5e6   : > { %v954_v63 = vmax.f32 %v840_v61, %v949_v62 }
 0x5e7   : > { %v1362_v1 = vpop.f32.mrf.mxu0 }
 0x634   : > { %v1013_v42 = vpop.f32.mrf.mxu1 }
 0x636   : > { %v1367_v2 = vpop.f32.mrf.mxu1 }
 0x638   : > { %v1016_v3 = vpop.f32.mrf.mxu1 }
 0x639   : > { %v1020_v4 = vpack.c.bf16 %v1016_v3, %v1013_v42 }
 0x63a   : > { %v1368_v43 = vpop.f32.mrf.mxu1 }
 0x63b   : > { %1378 = vmatmul.mubr.msk.bf16.vlgmr.msra.gmra.mxu1 %vm317_vm1, %v1020_v4 }
 0x6fb   : > { %v1058_v44 = vpop.f32.mrf.mxu1 }
 0x6fc   : > { %v1065_v7 = vmax.f32 %v953_v60, %v1058_v44 }
 0x6fd   : > { %v1379_v9 = vpop.f32.mrf.mxu1 }
 0x6fe   : > { %v1067_v10 = vadd.f32 %v1065_v7, %v584_v5 }
 0x6ff   : > { %v1061_v11 = vpop.f32.mrf.mxu1 }
 0x700   : > { %vm1069_vm0 = vcmp.gt.f32.partialorder %v1067_v10, 0.0  ;;  %v1071_v13 = vmul.f32 0.2, %v1067_v10  ;;  %v1066_v14 = vmax.f32 %v954_v63, %v1061_v11 }
 0x701   : > { %v1380_v15 = vpop.f32.mrf.mxu1 }
 0x702   : > { %v1073_v16 = vsel %vm1069_vm0, %v1067_v10, %v1071_v13  ;;  %v1068_v17 = vadd.f32 %v1066_v14, %v587_v12 }
 0x703   : > { %1075 = vst.msk [vmem:[%s310_s9] sm:$0xff] %vm317_vm1, %v1073_v16 }
 0x704   : > { %vm1070_vm2 = vcmp.gt.f32.partialorder %v1068_v17, 0.0  ;;  %v1072_v6 = vmul.f32 0.2, %v1068_v17 }
 0x706   : > { %v1074_v18 = vsel %vm1070_vm2, %v1068_v17, %v1072_v6 }
 0x707   : > { %1076 = vst.msk [vmem:[%s310_s9 + $0x8] sm:$0xff] %vm317_vm1, %v1074_v18 }
 0x708 PF: > { %s17_s20 = sadd.s32 1, %s1521_s20   ;;  %s1842_s18 = smov %s1517_s19 }
 0x709   : > { %p14_p3 = scmp.ge.s32.totalorder %s17_s20, 4   ;;  %s1843_s19 = smov %s1845_s22 }
 0x70b   :  { %16 = sbr.rel (!%p14_p3) target bundleno = 3 (0x3), region = 82 }
 0x710   :  { %1107 = vsyncpa [#allocation3], 1 }
 0x711   :  { %1109 = vsyncpa [#allocation3 + $0x1], 1 }
 0x712   :  { %1110 = vsyncpa [#allocation5], 1 }

// kernel: dgcnn_encoder.5
= control target key start
LH: loop header
LB: loop body
LE: loop exit
PB: predicated region body
PF: predicated region fallthrough
CT: control target
= control target key end

     0   :  { %10 = vsyncpa [#allocation3], 0  ;;  %s1663_s0 = inlined_call_operand.vmem [shape: f32[2,16,3], index: 0, kind: input, shape index: {}, may-alias: {0,1}]   ;;  %s1664_s1 = inlined_call_operand.vmem [shape: f32[2,16,3], index: 1, kind: input, shape index: {}, may-alias: {0,1}]   ;;  %s1665_s2 = inlined_call_operand.hbm [shape: bf16[3,64], index: 2, kind: input, shape index: {}]   ;;  %s1666_s3 = inlined_call_operand.vmem [shape: bf16[3,64], index: 3, kind: input, shape index: {}]   ;;  %s1667_s4 = inlined_call_operand.hbm [shape: f32[1,64], index: 4, kind: input, shape index: {}]   ;;  %s1668_s5 = inlined_call_operand.vmem [shape: f32[2,16,64], index: 5, kind: output, shape index: {}]  }
   0x1   :  { %11 = vsyncpa [#allocation5], 0  ;;  %s1444_s18 = smov 0   ;;  %s1446_s19 = smov 0  }
   0x2   :  { %s1448_s20 = smov 0  }
   0x3 LB: > { %s1145_s21 = sadd.s32 4294967295, %s1406_s20   ;;  %s29_s22 = sadd.s32 1, %s1402_s19  ;;  %s1406_s20 = sphi %s1448_s20, %s17_s20   ;;  %s1402_s19 = sphi %s1446_s19, %s1676_s19   ;;  %s1398_s18 = sphi %s1444_s18, %s1675_s18  }
   0x4   : > { %p31_p0 = scmp.ge.s32.totalorder %s29_s22, 2  ;;  %p1147_p1 = scmp.ge.s32.totalorder %s1406_s20, 1 }
   0x5   : > { %p179_p2 = scmp.lt.s32.totalorder %s1406_s20, 3  ;;  %p1469_p4 = scmp.eq.s32.totalorder %s1145_s21, 0 }
   0x6   : > { %s1678_s22 = smov (%p31_p0, %s29_s22), 0  ;;  %s1408_s25 = smov [#allocation2]  }
   0x7   : > { %p1465_p3 = pnand %p1147_p1, %p179_p2  ;;  %s192_s26 = sshll.u32 %s1408_s25, 4  ;;  %s193_s26 = int_to_ptr.vmem [resolvable:$true] %s192_s26 }
   0x8   : > { %s1672_s24 = scalar_select %p1469_p4, 1, 0 }
   0x9   : > { %p1283_p5 = pneg %p1465_p3  ;;  %s1409_s27 = smov [#allocation4]  }
   0xa   : > { %s206_s28 = sshll.u32 %s1409_s27, 4  ;;  %s1335_s30 = scalar_lea.vmem %s193_s26, 32  ;;  %s207_s28 = int_to_ptr.vmem [resolvable:$true] %s206_s28 }
   0xb   : > { %p1477_p6 = pnand %p1469_p4, %p1283_p5  ;;  %p1336_p8 = scmp.ne.s32.totalorder %s193_s26, %s1335_s30 }
   0xc   : > { %p1343_p11 = scmp.lt.s32.totalorder %s193_s26, %s193_s26  ;;  %p1344_p12 = scmp.lt.s32.totalorder %s1335_s30, %s1335_s30 }
   0xd   : > { %p1326_p7 = pneg %p1477_p6 }
   0xe   : > { %p1345_p13 = por %p1344_p12, %p1343_p11 }
   0xf   : > { %p1338_p9 = pnand %p1336_p8, %p1326_p7 }
  0x11   : > { %p1339_p10 = pneg %p1338_p9 }
  0x13   : > { %p1346_p0 = pnand %p1345_p13, %p1339_p10 }
  0x15   : > { %1349 = shalt.err (!%p1346_p0)
}
  0x16   : > { %1286 = dma.hbm_to_vmem [thread:$0]  (!%p1477_p6), %s1665_s2, 32, %s193_s26, [#allocation3]  }
  0x17   : > { %s1361_s8 = scalar_lea.vmem %s207_s28, 16  ;;  %s1368_s9 = scalar_lea.vmem %s207_s28, 32 }
  0x18   : > { %p1362_p1 = scmp.ne.s32.totalorder %s207_s28, %s1361_s8  ;;  %p1369_p8 = scmp.lt.s32.totalorder %s207_s28, %s207_s28 }
  0x19   : > { %p1370_p9 = scmp.lt.s32.totalorder %s1368_s9, %s1361_s8 }
  0x1a   : > { %p1364_p2 = pnand %p1362_p1, %p1326_p7 }
  0x1b   : > { %p1371_p4 = por %p1370_p9, %p1369_p8 }
  0x1c   : > { %p1365_p5 = pneg %p1364_p2 }
  0x1e   : > { %p1372_p11 = pnand %p1371_p4, %p1365_p5 }
  0x20   : > { %1375 = shalt.err (!%p1372_p11)
}
  0x21   : > { %1289 = dma.hbm_to_vmem [thread:$0]  (!%p1477_p6), %s1667_s4, 16, %s207_s28, [#allocation5]  }
  0x22   : > { %240 = sbr.rel (%p1465_p3) target bundleno = 1793 (0x701), region = 40  ;;  %p1674_p10 = scmp.ne.s32.totalorder (!%p1465_p3), %s1672_s24, 0 }
  0x27   : > { %1389 = dma.done.wait (%p1674_p10), [#allocation3], 32  }
  0x28   : > { %1391 = vsyncadd (%p1674_p10), [#allocation3], 4294967264 }
  0x29   : > { %1393 = dma.done.wait (%p1674_p10), [#allocation5], 16  }
  0x2a   : > { %1395 = vsyncadd (%p1674_p10), [#allocation5], 4294967280  ;;  %p286_p4 = scmp.lt.s32.totalorder %s1398_s18, 1  ;;  %v1410_v0 = vmov 0.0   ;;  %vm1411_vm0 = vmmov 0   ;;  %vm315_vm1 = vcmask 23552   ;;  %v486_v9 = vlaneseq }
  0x2b   : > { %1214 = vmatprep.subr.mxu1 %v1410_v0  ;;  %1218 = vmatprep.mubr.msk.f32.mxu1 %vm1411_vm0, %v1410_v0  ;;  %v1412_v8 = vmov 1.0   ;;  %vm557_vm2 = vcmask 130048   ;;  %v498_v41 = vld [vmem:[%s1666_s3] sm:$0x3]  ;;  %vm509_vm7 = vcmask 1040384   ;;  %vm510_vm8 = vcmask 1041408  }
  0x2c   : > { %s1680_s18 = smov (!%p286_p4, %s1398_s18), 1  ;;  %v487_v10 = vshrl.u32 %v486_v9, 7  ;;  %v493_v23 = vand.u32 127, %v486_v9  ;;  %v1413_v42 = vmov 65535   ;;  %v497_v46 = vld [vmem:[#allocation2] sm:$0x3] }
  0x2d   : > { %s1514_s12 = sshll.u32 %s1680_s18, 4  ;;  %v511_v43 = vsel %vm509_vm7, 4294967295, %v1413_v42 }
  0x2e   : > { %s299_s15 = scalar_lea.vmem %s1664_s1, %s1514_s12  ;;  %s293_s21 = scalar_lea.vmem %s1663_s0, %s1514_s12  ;;  %v488_v11 = vsub.s32 0, %v487_v10  ;;  %v1550_v24 = vcvt.s32.f32 %v493_v23  ;;  %v512_v44 = vsel %vm510_vm8, %v511_v43, 0 }
  0x2f   : > { %v314_v1 = vld [vmem:[%s299_s15 + $0x8] sm:$0xff]  ;;  %v313_v2 = vld [vmem:[%s299_s15] sm:$0xff]  ;;  %v514_v45 = vand.u32 %v512_v44, %v498_v41  ;;  %v1581_v47 = vand.u32 %v512_v44, %v497_v46  ;;  %s308_s26 = scalar_lea.vmem %s1668_s5, %s1514_s12 }
  0x30   : > { %v1524_v3 = vld [vmem:[%s293_s21] sm:$0xff]  ;;  %1207 = vmatprep.subr.msk.mxu0 %vm315_vm1, %v314_v1  ;;  %v404_v4 = vmul.f32 %v314_v1, %v314_v1  ;;  %v1527_v5 = vld [vmem:[%s293_s21 + $0x8] sm:$0xff]  ;;  %v403_v7 = vmul.f32 %v313_v2, %v313_v2  ;;  %v1556_v31 = vpack.c.bf16 %v314_v1, %v313_v2 }
  0x31   : > { %1211 = vmatprep.mubr.msk.f32.mxu0 %vm315_vm1, %v1524_v3  ;;  %1208 = vmatpush3.xpose.msk.msra.mxu0 %vm315_vm1, %v314_v1  ;;  %v496_v6 = vpack.c.bf16 %v1527_v5, %v1524_v3 }
  0x32   : > { %1215 = vmatpush3.xpose.msk.msra.mxu1 %vm315_vm1, %v404_v4  ;;  %1209 = vmatprep.subr.msk.mxu0 %vm315_vm1, %v313_v2 }
  0x33   : > { %1216 = vmatprep.subr.mxu1 %v1410_v0 }
  0x35   : > { %1210 = vmatpush3.xpose.msk.msra.mxu0 %vm315_vm1, %v313_v2 }
  0x36   : > { %1217 = vmatpush3.xpose.msk.msra.mxu1 %vm315_vm1, %v403_v7  ;;  %1221 = vmatprep.subr.bf16.mxu0 %v1410_v0 }
  0x37   : > { %1227 = vmatprep.subr.bf16.mxu1 %v1410_v0 }
  0x38   : > { %1212 = vmatmul.mubr.msk.f32.vlgmr.msra.gmra.mxu0 %vm315_vm1, %v1527_v5 }
  0x39   : > { %1219 = vmatmul.mubr.msk.f32.vlgmr.msra.gmra.mxu1 %vm315_vm1, %v1412_v8  ;;  %1223 = vmatprep.mubr.msk.bf16.mxu0 %vm1411_vm0, %v1410_v0 }
  0x3a   : > { %1229 = vmatprep.mubr.msk.bf16.mxu1 %vm1411_vm0, %v1410_v0  ;;  %1228 = vmatpush3.bf16.msra.mxu1 %v1556_v31 }
  0x3b   : > { %1239 = vmatprep.subr.bf16.mxu1 %v1410_v0  ;;  %1222 = vmatpush3.bf16.msra.mxu0 %v514_v45 }
  0x3c   : > { %1233 = vmatprep.subr.bf16.mxu0 %v1410_v0 }
  0x3e   : > { %1224 = vmatmul.mubr.msk.bf16.vlgmr.msra.gmra.mxu0 %vm315_vm1, %v496_v6 }
  0x3f   : > { %1235 = vmatprep.mubr.msk.bf16.mxu0 %vm1411_vm0, %v1410_v0  ;;  %1234 = vmatpush3.bf16.msra.mxu0 %v1581_v47 }
  0x40   : > { %1245 = vmatprep.subr.bf16.mxu0 %v1410_v0 }
  0xf8   : > { %v1213_v12 = vpop.f32.mrf.mxu0 }
  0xf9   : > { %v480_v13 = vpop.f32.mrf.mxu1  ;;  %v485_v16 = vmul.f32 2.0, %v1213_v12 }
  0xfa   : > { %v489_v14 = vrot.slane %v480_v13, %v488_v11  ;;  %v394_v15 = vpop.f32.mrf.mxu0 }
  0xfb   : > { %v484_v17 = vmul.f32 2.0, %v394_v15  ;;  %v1220_v18 = vpop.f32.mrf.mxu1 }
  0xfc   : > { %v491_v20 = vsub.f32 %v485_v16, %v489_v14 }
  0xfd   : > { %v490_v19 = vsub.f32 %v484_v17, %v489_v14 }
  0xfe   : > { %v561_v22 = vsel %vm557_vm2, %v491_v20, -inf  ;;  %v1594_v59 = vpop.f32.mrf.mxu0 }
  0xff   : > { %v558_v21 = vsel %vm557_vm2, %v490_v19, -inf }
 0x100   : > { %559 = vmax.xlane.f32.xlu0 %v558_v21  ;;  %v1225_v60 = vpop.f32.mrf.mxu0 }
 0x102   : > { %v1596_v61 = vpop.f32.mrf.mxu0 }
 0x104   : > { %562 = vmax.xlane.f32.xlu0 %v561_v22  ;;  %v1226_v62 = vpop.f32.mrf.mxu0 }
 0x189   : > { %v560_v25 = vpop.xlane.xlu0 %559 }
 0x18a   : > { %vm564_vm3 = vcmp.ge.f32.partialorder %v490_v19, %v560_v25 }
 0x18b   : > { %v566_v26 = vsel %vm564_vm3, %v1550_v24, 16.0 }
 0x18c   : > { %v568_v27 = vsel %vm557_vm2, %v566_v26, inf }
 0x18d   : > { %569 = vmin.xlane.f32.xlu1 %v568_v27  ;;  %v563_v28 = vpop.xlane.xlu0 %562 }
 0x18e   : > { %vm565_vm4 = vcmp.ge.f32.partialorder %v491_v20, %v563_v28 }
 0x18f   : > { %v567_v29 = vsel %vm565_vm4, %v1550_v24, 16.0 }
 0x190   : > { %v571_v30 = vsel %vm557_vm2, %v567_v29, inf }
 0x191   : > { %572 = vmin.xlane.f32.xlu1 %v571_v30 }
 0x216   : > { %v570_v32 = vpop.xlane.xlu1 %569 }
 0x217   : > { %vm574_vm5 = vcmp.eq.f32.partialorder %v1550_v24, %v570_v32 }
 0x218   : > { %v576_v33 = vsel %vm574_vm5, -1e+30, %v490_v19  ;;  %v578_v36 = vsel %vm574_vm5, 1.0, %v1410_v0 }
 0x219   : > { %v673_v34 = vsel %vm557_vm2, %v576_v33, -inf }
 0x21a   : > { %674 = vmax.xlane.f32.xlu0 %v673_v34  ;;  %v573_v35 = vpop.xlane.xlu1 %572 }
 0x21b   : > { %vm575_vm6 = vcmp.eq.f32.partialorder %v1550_v24, %v573_v35 }
 0x21c   : > { %v577_v37 = vsel %vm575_vm6, -1e+30, %v491_v20  ;;  %v579_v38 = vsel %vm575_vm6, 1.0, %v1410_v0 }
 0x21d   : > { %v580_v39 = vpack.c.bf16 %v579_v38, %v578_v36  ;;  %v676_v40 = vsel %vm557_vm2, %v577_v37, -inf }
 0x21e   : > { %677 = vmax.xlane.f32.xlu1 %v676_v40 }
 0x21f   : > { %1230 = vmatmul.mubr.msk.bf16.vlgmr.msra.gmra.mxu1 %vm557_vm2, %v580_v39 }
 0x220   : > { %1240 = vmatpush3.bf16.msra.mxu1 %v1556_v31  ;;  %1241 = vmatprep.mubr.msk.bf16.mxu1 %vm1411_vm0, %v1410_v0 }
 0x221   : > { %1251 = vmatprep.subr.bf16.mxu1 %v1410_v0 }
 0x2a3   : > { %v675_v48 = vpop.xlane.xlu0 %674 }
 0x2a4   : > { %vm679_vm9 = vcmp.ge.f32.partialorder %v576_v33, %v675_v48 }
 0x2a5   : > { %v681_v49 = vsel %vm679_vm9, %v1550_v24, 16.0 }
 0x2a6   : > { %v683_v50 = vsel %vm557_vm2, %v681_v49, inf }
 0x2a7   : > { %v678_v51 = vpop.xlane.xlu1 %677  ;;  %684 = vmin.xlane.f32.xlu0 %v683_v50 }
 0x2a8   : > { %vm680_vm10 = vcmp.ge.f32.partialorder %v577_v37, %v678_v51 }
 0x2a9   : > { %v682_v52 = vsel %vm680_vm10, %v1550_v24, 16.0 }
 0x2aa   : > { %v686_v53 = vsel %vm557_vm2, %v682_v52, inf }
 0x2ab   : > { %687 = vmin.xlane.f32.xlu1 %v686_v53 }
 0x2df   : > { %v618_v54 = vpop.f32.mrf.mxu1 }
 0x2e1   : > { %v1231_v55 = vpop.f32.mrf.mxu1 }
 0x2e3   : > { %v621_v56 = vpop.f32.mrf.mxu1 }
 0x2e4   : > { %v625_v57 = vpack.c.bf16 %v621_v56, %v618_v54 }
 0x2e5   : > { %v1232_v58 = vpop.f32.mrf.mxu1 }
 0x2e6   : > { %1236 = vmatmul.mubr.msk.bf16.vlgmr.msra.gmra.mxu0 %vm315_vm1, %v625_v57 }
 0x2e7   : > { %1246 = vmatpush3.bf16.msra.mxu0 %v1581_v47  ;;  %1247 = vmatprep.mubr.msk.bf16.mxu0 %vm1411_vm0, %v1410_v0 }
 0x2e8   : > { %1257 = vmatprep.subr.bf16.mxu0 %v1410_v0 }
 0x330   : > { %v685_v63 = vpop.xlane.xlu0 %684 }
 0x331   : > { %vm689_vm11 = vcmp.eq.f32.partialorder %v1550_v24, %v685_v63 }
 0x332   : > { %v691_v1 = vsel %vm689_vm11, -1e+30, %v576_v33  ;;  %v693_v4 = vsel %vm689_vm11, 1.0, %v1410_v0 }
 0x333   : > { %v787_v2 = vsel %vm557_vm2, %v691_v1, -inf }
 0x334   : > { %v688_v3 = vpop.xlane.xlu1 %687  ;;  %788 = vmax.xlane.f32.xlu0 %v787_v2 }
 0x335   : > { %vm690_vm12 = vcmp.eq.f32.partialorder %v1550_v24, %v688_v3 }
 0x336   : > { %v692_v5 = vsel %vm690_vm12, -1e+30, %v577_v37  ;;  %v694_v6 = vsel %vm690_vm12, 1.0, %v1410_v0 }
 0x337   : > { %v695_v7 = vpack.c.bf16 %v694_v6, %v693_v4  ;;  %v790_v8 = vsel %vm557_vm2, %v692_v5, -inf }
 0x338   : > { %791 = vmax.xlane.f32.xlu1 %v790_v8 }
 0x339   : > { %1242 = vmatmul.mubr.msk.bf16.vlgmr.msra.gmra.mxu1 %vm557_vm2, %v695_v7 }
 0x33a   : > { %1252 = vmatpush3.bf16.msra.mxu1 %v1556_v31  ;;  %1253 = vmatprep.mubr.msk.bf16.mxu1 %vm1411_vm0, %v1410_v0 }
 0x33b   : > { %1263 = vmatprep.subr.bf16.mxu1 %v1410_v0 }
 0x3a6   : > { %v1609_v9 = vpop.f32.mrf.mxu0 }
 0x3a8   : > { %v1237_v10 = vpop.f32.mrf.mxu0 }
 0x3aa   : > { %v1611_v11 = vpop.f32.mrf.mxu0 }
 0x3ac   : > { %v1238_v12 = vpop.f32.mrf.mxu0 }
 0x3bd   : > { %v789_v13 = vpop.xlane.xlu0 %788 }
 0x3be   : > { %vm793_vm13 = vcmp.ge.f32.partialorder %v691_v1, %v789_v13 }
 0x3bf   : > { %v795_v14 = vsel %vm793_vm13, %v1550_v24, 16.0 }
 0x3c0   : > { %v797_v15 = vsel %vm557_vm2, %v795_v14, inf }
 0x3c1   : > { %v792_v16 = vpop.xlane.xlu1 %791  ;;  %798 = vmin.xlane.f32.xlu0 %v797_v15 }
 0x3c2   : > { %vm794_vm14 = vcmp.ge.f32.partialorder %v692_v5, %v792_v16 }
 0x3c3   : > { %v796_v17 = vsel %vm794_vm14, %v1550_v24, 16.0 }
 0x3c4   : > { %v800_v18 = vsel %vm557_vm2, %v796_v17, inf }
 0x3c5   : > { %801 = vmin.xlane.f32.xlu1 %v800_v18 }
 0x3f9   : > { %v733_v19 = vpop.f32.mrf.mxu1 }
 0x3fb   : > { %v1243_v20 = vpop.f32.mrf.mxu1 }
 0x3fd   : > { %v736_v21 = vpop.f32.mrf.mxu1 }
 0x3fe   : > { %v740_v22 = vpack.c.bf16 %v736_v21, %v733_v19 }
 0x3ff   : > { %v1244_v23 = vpop.f32.mrf.mxu1 }
 0x400   : > { %1248 = vmatmul.mubr.msk.bf16.vlgmr.msra.gmra.mxu0 %vm315_vm1, %v740_v22 }
 0x401   : > { %1258 = vmatpush3.bf16.msra.mxu0 %v1581_v47  ;;  %1259 = vmatprep.mubr.msk.bf16.mxu0 %vm1411_vm0, %v1410_v0 }
 0x402   : > { %1269 = vmatprep.subr.bf16.mxu0 %v1410_v0 }
 0x44a   : > { %v799_v25 = vpop.xlane.xlu0 %798 }
 0x44b   : > { %vm803_vm15 = vcmp.eq.f32.partialorder %v1550_v24, %v799_v25 }
 0x44c   : > { %v805_v26 = vsel %vm803_vm15, -1e+30, %v691_v1  ;;  %v807_v29 = vsel %vm803_vm15, 1.0, %v1410_v0 }
 0x44d   : > { %v901_v27 = vsel %vm557_vm2, %v805_v26, -inf }
 0x44e   : > { %v802_v28 = vpop.xlane.xlu1 %801  ;;  %902 = vmax.xlane.f32.xlu0 %v901_v27 }
 0x44f   : > { %vm804_vm3 = vcmp.eq.f32.partialorder %v1550_v24, %v802_v28 }
 0x450   : > { %v808_v30 = vsel %vm804_vm3, 1.0, %v1410_v0  ;;  %v806_v32 = vsel %vm804_vm3, -1e+30, %v692_v5 }
 0x451   : > { %v809_v33 = vpack.c.bf16 %v808_v30, %v807_v29  ;;  %v904_v34 = vsel %vm557_vm2, %v806_v32, -inf }
 0x452   : > { %905 = vmax.xlane.f32.xlu1 %v904_v34 }
 0x453   : > { %1254 = vmatmul.mubr.msk.bf16.vlgmr.msra.gmra.mxu1 %vm557_vm2, %v809_v33 }
 0x454   : > { %1264 = vmatpush3.bf16.msra.mxu1 %v1556_v31  ;;  %1265 = vmatprep.mubr.msk.bf16.mxu1 %vm1411_vm0, %v1410_v0 }
 0x4c0   : > { %v778_v35 = vpop.f32.mrf.mxu0 }
 0x4c1   : > { %v785_v55 = vmax.f32 %v1609_v9, %v778_v35 }
 0x4c2   : > { %v1249_v36 = vpop.f32.mrf.mxu0 }
 0x4c4   : > { %v781_v37 = vpop.f32.mrf.mxu0 }
 0x4c5   : > { %v786_v58 = vmax.f32 %v1611_v11, %v781_v37 }
 0x4c6   : > { %v1250_v38 = vpop.f32.mrf.mxu0 }
 0x4d7   : > { %v903_v39 = vpop.xlane.xlu0 %902 }
 0x4d8   : > { %vm907_vm4 = vcmp.ge.f32.partialorder %v805_v26, %v903_v39 }
 0x4d9   : > { %v909_v40 = vsel %vm907_vm4, %v1550_v24, 16.0 }
 0x4da   : > { %v911_v41 = vsel %vm557_vm2, %v909_v40, inf }
 0x4db   : > { %v906_v42 = vpop.xlane.xlu1 %905  ;;  %912 = vmin.xlane.f32.xlu0 %v911_v41 }
 0x4dc   : > { %vm908_vm5 = vcmp.ge.f32.partialorder %v806_v32, %v906_v42 }
 0x4dd   : > { %v910_v43 = vsel %vm908_vm5, %v1550_v24, 16.0 }
 0x4de   : > { %v914_v31 = vsel %vm557_vm2, %v910_v43, inf }
 0x4df   : > { %915 = vmin.xlane.f32.xlu1 %v914_v31 }
 0x513   : > { %v847_v44 = vpop.f32.mrf.mxu1 }
 0x515   : > { %v1255_v45 = vpop.f32.mrf.mxu1 }
 0x517   : > { %v850_v46 = vpop.f32.mrf.mxu1 }
 0x518   : > { %v854_v48 = vpack.c.bf16 %v850_v46, %v847_v44 }
 0x519   : > { %v1256_v49 = vpop.f32.mrf.mxu1 }
 0x51a   : > { %1260 = vmatmul.mubr.msk.bf16.vlgmr.msra.gmra.mxu0 %vm315_vm1, %v854_v48 }
 0x51b   : > { %1270 = vmatpush3.bf16.msra.mxu0 %v1581_v47  ;;  %1271 = vmatprep.mubr.msk.bf16.mxu0 %vm1411_vm0, %v1410_v0 }
 0x564   : > { %v913_v50 = vpop.xlane.xlu0 %912 }
 0x565   : > { %vm917_vm6 = vcmp.eq.f32.partialorder %v1550_v24, %v913_v50 }
 0x566   : > { %v919_v52 = vsel %vm917_vm6, 1.0, %v1410_v0 }
 0x568   : > { %v916_v51 = vpop.xlane.xlu1 %915 }
 0x569   : > { %vm918_vm7 = vcmp.eq.f32.partialorder %v1550_v24, %v916_v51 }
 0x56a   : > { %v920_v53 = vsel %vm918_vm7, 1.0, %v1410_v0  ;;  %v1167_v0 = vld [vmem:[#allocation4] ss:$0 sm:$0xff] }
 0x56b   : > { %v921_v54 = vpack.c.bf16 %v920_v53, %v919_v52  ;;  %v551_v6 = vadd.f32 %v1167_v0, %v1594_v59  ;;  %v554_v10 = vadd.f32 %v1167_v0, %v1596_v61 }
 0x56d   : > { %1266 = vmatmul.mubr.msk.bf16.vlgmr.msra.gmra.mxu1 %vm557_vm2, %v921_v54  ;;  %vm1021_vm2 = vcmask 523264  }
 0x5da   : > { %v892_v56 = vpop.f32.mrf.mxu0 }
 0x5db   : > { %v899_v47 = vmax.f32 %v785_v55, %v892_v56 }
 0x5dc   : > { %v1261_v57 = vpop.f32.mrf.mxu0 }
 0x5de   : > { %v895_v60 = vpop.f32.mrf.mxu0 }
 0x5df   : > { %v900_v62 = vmax.f32 %v786_v58, %v895_v60 }
 0x5e0   : > { %v1262_v63 = vpop.f32.mrf.mxu0 }
 0x62d   : > { %v959_v1 = vpop.f32.mrf.mxu1 }
 0x62f   : > { %v1267_v24 = vpop.f32.mrf.mxu1 }
 0x631   : > { %v962_v2 = vpop.f32.mrf.mxu1 }
 0x632   : > { %v966_v3 = vpack.c.bf16 %v962_v2, %v959_v1 }
 0x633   : > { %v1268_v4 = vpop.f32.mrf.mxu1 }
 0x634   : > { %1272 = vmatmul.mubr.msk.bf16.vlgmr.msra.gmra.mxu0 %vm315_vm1, %v966_v3 }
 0x6f4   : > { %v1004_v5 = vpop.f32.mrf.mxu0 }
 0x6f5   : > { %v1011_v7 = vmax.f32 %v899_v47, %v1004_v5 }
 0x6f6   : > { %v1273_v8 = vpop.f32.mrf.mxu0 }
 0x6f7   : > { %v1013_v9 = vadd.f32 %v1011_v7, %v551_v6 }
 0x6f8   : > { %v1007_v11 = vpop.f32.mrf.mxu0 }
 0x6f9   : > { %vm1015_vm0 = vcmp.gt.f32.partialorder %v1013_v9, 0.0  ;;  %v1017_v12 = vmul.f32 0.2, %v1013_v9  ;;  %v1012_v13 = vmax.f32 %v900_v62, %v1007_v11 }
 0x6fa   : > { %v1274_v14 = vpop.f32.mrf.mxu0 }
 0x6fb   : > { %v1019_v15 = vsel %vm1015_vm0, %v1013_v9, %v1017_v12  ;;  %v1014_v16 = vadd.f32 %v1012_v13, %v554_v10 }
 0x6fc   : > { %1022 = vst.msk [vmem:[%s308_s26] sm:$0xff] %vm1021_vm2, %v1019_v15 }
 0x6fd   : > { %vm1016_vm1 = vcmp.gt.f32.partialorder %v1014_v16, 0.0  ;;  %v1018_v59 = vmul.f32 0.2, %v1014_v16 }
 0x6ff   : > { %v1020_v17 = vsel %vm1016_vm1, %v1014_v16, %v1018_v59 }
 0x700   : > { %1023 = vst.msk [vmem:[%s308_s26 + $0x8] sm:$0xff] %vm1021_vm2, %v1020_v17 }
 0x701 PF: > { %s17_s20 = sadd.s32 1, %s1406_s20   ;;  %s1675_s18 = smov %s1402_s19 }
 0x702   : > { %p14_p3 = scmp.ge.s32.totalorder %s17_s20, 4   ;;  %s1676_s19 = smov %s1678_s22 }
 0x704   :  { %16 = sbr.rel (!%p14_p3) target bundleno = 3 (0x3), region = 82 }
 0x709   :  { %1054 = vsyncpa [#allocation3], 1 }
 0x70a   :  { %1056 = vsyncpa [#allocation3 + $0x1], 1 }
 0x70b   :  { %1057 = vsyncpa [#allocation5], 1 }

// kernel: dgcnn_encoder.8
= control target key start
LH: loop header
LB: loop body
LE: loop exit
PB: predicated region body
PF: predicated region fallthrough
CT: control target
= control target key end

     0   :  { %10 = vsyncpa [#allocation3], 0  ;;  %s1586_s18 = smov 0   ;;  %s1588_s19 = smov 0   ;;  %s1977_s0 = inlined_call_operand.vmem [shape: f32[2,16,128], index: 0, kind: input, shape index: {}, may-alias: {0,1}]   ;;  %s1978_s1 = inlined_call_operand.vmem [shape: f32[2,16,128], index: 1, kind: input, shape index: {}, may-alias: {0,1}]   ;;  %s1979_s2 = inlined_call_operand.vmem [shape: bf16[128,256], index: 2, kind: input, shape index: {}]   ;;  %s1980_s3 = inlined_call_operand.vmem [shape: bf16[128,256], index: 3, kind: input, shape index: {}]   ;;  %s1981_s4 = inlined_call_operand.hbm [shape: f32[1,256], index: 4, kind: input, shape index: {}]   ;;  %s1982_s5 = inlined_call_operand.vmem [shape: f32[2,16,256], index: 5, kind: output, shape index: {}]  }
   0x1   :  { %s1590_s20 = smov 0  }
   0x2 LB: > { %s1303_s21 = sadd.s32 4294967295, %s1549_s20   ;;  %s28_s22 = sadd.s32 1, %s1545_s19  ;;  %s1549_s20 = sphi %s1590_s20, %s16_s20   ;;  %s1545_s19 = sphi %s1588_s19, %s1986_s19   ;;  %s1541_s18 = sphi %s1586_s18, %s1985_s18  }
   0x3   : > { %p30_p0 = scmp.ge.s32.totalorder %s28_s22, 2  ;;  %p1305_p1 = scmp.ge.s32.totalorder %s1549_s20, 1 }
   0x4   : > { %p178_p2 = scmp.lt.s32.totalorder %s1549_s20, 3  ;;  %p1611_p4 = scmp.eq.s32.totalorder %s1303_s21, 0 }
   0x5   : > { %s1988_s22 = smov (%p30_p0, %s28_s22), 0  ;;  %s1551_s25 = smov [#allocation2]  }
   0x6   : > { %p1607_p3 = pnand %p1305_p1, %p178_p2  ;;  %s197_s26 = sshll.u32 %s1551_s25, 4  ;;  %s198_s26 = int_to_ptr.vmem [resolvable:$true] %s197_s26 }
   0x7   : > { %s1508_s27 = scalar_lea.vmem %s198_s26, 32  ;;  %p1516_p11 = scmp.lt.s32.totalorder %s198_s26, %s198_s26 }
   0x8   : > { %p1414_p5 = pneg %p1607_p3  ;;  %p1509_p8 = scmp.ne.s32.totalorder %s198_s26, %s1508_s27 }
   0x9   : > { %p1517_p12 = scmp.lt.s32.totalorder %s1508_s27, %s1508_s27 }
   0xa   : > { %p1415_p6 = pnand %p1611_p4, %p1414_p5 }
   0xb   : > { %p1518_p13 = por %p1517_p12, %p1516_p11 }
   0xc   : > { %p1499_p7 = pneg %p1415_p6 }
   0xe   : > { %p1511_p9 = pnand %p1509_p8, %p1499_p7 }
  0x10   : > { %p1512_p10 = pneg %p1511_p9 }
  0x12   : > { %p1519_p0 = pnand %p1518_p13, %p1512_p10 }
  0x14   : > { %1522 = shalt.err (!%p1519_p0)
}
  0x15   : > { %1417 = dma.hbm_to_vmem [thread:$0]  (!%p1415_p6), %s1981_s4, 32, %s198_s26, [#allocation3]  }
  0x16   : > { %231 = sbr.rel (%p1607_p3) target bundleno = 1788 (0x6fc), region = 40 }
  0x1b   : > { %1536 = dma.done.wait (%p1611_p4), [#allocation3], 32  }
  0x1c   : > { %1538 = vsyncadd (%p1611_p4), [#allocation3], 4294967264  ;;  %p274_p1 = scmp.lt.s32.totalorder %s1541_s18, 1  ;;  %v1552_v6 = vmov 0.0   ;;  %vm1553_vm0 = vmmov 0   ;;  %v1554_v8 = vmov 1.0   ;;  %v453_v9 = vlaneseq }
  0x1d   : > { %vm631_vm1 = vcmask 130048   ;;  %v1449_v23 = vld [vmem:[%s1980_s3 + $0x70] ss:$8 sps:$4 sm:$0xff]   ;;  %v1451_v24 = vld [vmem:[%s1980_s3 + $0x74] ss:$8 sps:$4 sm:$0xff]   ;;  %v1555_v28 = vmov 0  }
  0x1e   : > { %s1990_s18 = smov (!%p274_p1, %s1541_s18), 1  ;;  %v1663_v10 = vshrl.u32 %v453_v9, 7  ;;  %v1454_v25 = vld [vmem:[%s1980_s3 + $0x64] ss:$8 sps:$4 sm:$0xff]   ;;  %v1452_v26 = vld [vmem:[%s1980_s3 + $0x60] ss:$8 sps:$4 sm:$0xff]   ;;  %812 = vmatprep.mubr.bf16.mxu1 %v1555_v28 }
  0x1f   : > { %s1354_s30 = sshll.u32 %s1990_s18, 4  ;;  %v1457_v27 = vld [vmem:[%s1980_s3 + $0x54] ss:$8 sps:$4 sm:$0xff]   ;;  %v1455_v29 = vld [vmem:[%s1980_s3 + $0x50] ss:$8 sps:$4 sm:$0xff]   ;;  %v460_v40 = vand.u32 127, %v453_v9 }
  0x20   : > { %s287_s8 = scalar_lea.vmem %s1978_s1, %s1354_s30  ;;  %s281_s11 = scalar_lea.vmem %s1977_s0, %s1354_s30  ;;  %v455_v12 = vsub.s32 0, %v1663_v10  ;;  %v1460_v30 = vld [vmem:[%s1980_s3 + $0x44] ss:$8 sps:$4 sm:$0xff]   ;;  %v1458_v31 = vld [vmem:[%s1980_s3 + $0x40] ss:$8 sps:$4 sm:$0xff]  }
  0x21   : > { %v1639_v0 = vld [vmem:[%s287_s8 + $0x8] sm:$0xff]  ;;  %v1641_v1 = vld [vmem:[%s287_s8] sm:$0xff]  ;;  %v1463_v32 = vld [vmem:[%s1980_s3 + $0x34] ss:$8 sps:$4 sm:$0xff]   ;;  %v1729_v41 = vcvt.s32.f32 %v460_v40  ;;  %s1356_s13 = sshll.u32 %s1990_s18, 5 }
  0x22   : > { %v1643_v2 = vld [vmem:[%s281_s11] sm:$0xff]  ;;  %1372 = vmatprep.subr.mxu0 %v1639_v0  ;;  %v1646_v3 = vld [vmem:[%s281_s11 + $0x8] sm:$0xff]  ;;  %v380_v5 = vmul.f32 %v1639_v0, %v1639_v0  ;;  %v379_v7 = vmul.f32 %v1641_v1, %v1641_v1  ;;  %v1461_v33 = vld [vmem:[%s1980_s3 + $0x30] ss:$8 sps:$4 sm:$0xff]   ;;  %v1738_v48 = vpack.c.bf16 %v1639_v0, %v1641_v1  ;;  %s297_s16 = scalar_lea.vmem %s1982_s5, %s1356_s13 }
  0x23   : > { %1376 = vmatprep.mubr.f32.mxu0 %v1643_v2  ;;  %1373 = vmatpush3.xpose.msra.mxu0 %v1639_v0  ;;  %v463_v4 = vpack.c.bf16 %v1646_v3, %v1643_v2  ;;  %v1466_v34 = vld [vmem:[%s1980_s3 + $0x24] ss:$8 sps:$4 sm:$0xff]   ;;  %v1464_v35 = vld [vmem:[%s1980_s3 + $0x20] ss:$8 sps:$4 sm:$0xff]   ;;  %v1469_v36 = vld [vmem:[%s1980_s3 + $0x14] ss:$8 sps:$4 sm:$0xff]  }
  0x24   : > { %1374 = vmatprep.subr.mxu0 %v1641_v1  ;;  %v1467_v37 = vld [vmem:[%s1980_s3 + $0x10] ss:$8 sps:$4 sm:$0xff]   ;;  %v1472_v38 = vld [vmem:[%s1980_s3 + $0x4] ss:$8 sps:$4 sm:$0xff]   ;;  %v1470_v39 = vld [vmem:[%s1980_s3] ss:$8 sps:$4 sm:$0xff]  }
  0x25   : > { %v1763_v58 = vld [vmem:[%s1979_s2 + $0x74] ss:$8 sps:$4 sm:$0xff]   ;;  %v1768_v59 = vld [vmem:[%s1979_s2 + $0x70] ss:$8 sps:$4 sm:$0xff]   ;;  %v1773_v60 = vld [vmem:[%s1979_s2 + $0x64] ss:$8 sps:$4 sm:$0xff]  }
  0x26   : > { %780 = vmatprep.subr.bf16.mxu1 %v1763_v58  ;;  %v1780_v61 = vld [vmem:[%s1979_s2 + $0x60] ss:$8 sps:$4 sm:$0xff]   ;;  %v1786_v62 = vld [vmem:[%s1979_s2 + $0x54] ss:$8 sps:$4 sm:$0xff]   ;;  %v1792_v63 = vld [vmem:[%s1979_s2 + $0x50] ss:$8 sps:$4 sm:$0xff]  }
  0x27   : > { %1375 = vmatpush3.xpose.msra.mxu0 %v1641_v1  ;;  %781 = vmatpush1.bf16.msra.mxu1 %v1768_v59  ;;  %v1798_v0 = vld [vmem:[%s1979_s2 + $0x44] ss:$8 sps:$4 sm:$0xff]   ;;  %v1804_v1 = vld [vmem:[%s1979_s2 + $0x40] ss:$8 sps:$4 sm:$0xff]   ;;  %v1810_v2 = vld [vmem:[%s1979_s2 + $0x34] ss:$8 sps:$4 sm:$0xff]  }
  0x28   : > { %1379 = vmatprep.subr.mxu0 %v1552_v6  ;;  %782 = vmatprep.subr.bf16.mxu1 %v1773_v60  ;;  %v1847_v9 = vld [vmem:[%s1979_s2 + $0x4] ss:$8 sps:$4 sm:$0xff]  }
  0x2a   : > { %1377 = vmatmul.mubr.f32.vlgmr.msra.gmra.mxu0 %v1646_v3  ;;  %v1816_v3 = vld [vmem:[%s1979_s2 + $0x30] ss:$8 sps:$4 sm:$0xff]  }
  0x2b   : > { %1380 = vmatpush3.xpose.msra.mxu0 %v380_v5  ;;  %1383 = vmatprep.mubr.msk.f32.mxu0 %vm1553_vm0, %v1552_v6  ;;  %v1828_v5 = vld [vmem:[%s1979_s2 + $0x20] ss:$8 sps:$4 sm:$0xff]  }
  0x2c   : > { %1381 = vmatprep.subr.mxu0 %v1552_v6  ;;  %783 = vmatpush1.bf16.msra.mxu1 %v1780_v61 }
  0x2d   : > { %784 = vmatprep.subr.bf16.mxu1 %v1786_v62 }
  0x2f   : > { %1382 = vmatpush3.xpose.msra.mxu0 %v379_v7  ;;  %v1834_v7 = vld [vmem:[%s1979_s2 + $0x14] ss:$8 sps:$4 sm:$0xff]  }
  0x30   : > { %588 = vmatprep.subr.bf16.mxu0 %v1451_v24  ;;  %785 = vmatpush1.bf16.msra.mxu1 %v1792_v63 }
  0x31   : > { %786 = vmatprep.subr.bf16.mxu1 %v1798_v0 }
  0x32   : > { %1384 = vmatmul.mubr.f32.vlgmr.msra.gmra.mxu0 %v1554_v8  ;;  %v1841_v8 = vld [vmem:[%s1979_s2 + $0x10] ss:$8 sps:$4 sm:$0xff]  }
  0x33   : > { %589 = vmatpush1.bf16.msra.mxu0 %v1449_v23  ;;  %620 = vmatprep.mubr.bf16.mxu0 %v1555_v28 }
  0x34   : > { %590 = vmatprep.subr.bf16.mxu0 %v1454_v25  ;;  %787 = vmatpush1.bf16.msra.mxu1 %v1804_v1 }
  0x35   : > { %788 = vmatprep.subr.bf16.mxu1 %v1810_v2 }
  0x37   : > { %591 = vmatpush1.bf16.msra.mxu0 %v1452_v26 }
  0x38   : > { %592 = vmatprep.subr.bf16.mxu0 %v1457_v27  ;;  %789 = vmatpush1.bf16.msra.mxu1 %v1816_v3 }
  0x3b   : > { %593 = vmatpush1.bf16.msra.mxu0 %v1455_v29 }
  0x3c   : > { %594 = vmatprep.subr.bf16.mxu0 %v1460_v30 }
  0x3f   : > { %595 = vmatpush1.bf16.msra.mxu0 %v1458_v31 }
  0x40   : > { %596 = vmatprep.subr.bf16.mxu0 %v1463_v32 }
  0x43   : > { %597 = vmatpush1.bf16.msra.mxu0 %v1461_v33 }
  0x44   : > { %598 = vmatprep.subr.bf16.mxu0 %v1466_v34 }
  0x47   : > { %599 = vmatpush1.bf16.msra.mxu0 %v1464_v35 }
  0x48   : > { %600 = vmatprep.subr.bf16.mxu0 %v1469_v36 }
  0x4b   : > { %601 = vmatpush1.bf16.msra.mxu0 %v1467_v37 }
  0x4c   : > { %602 = vmatprep.subr.bf16.mxu0 %v1472_v38 }
  0x4f   : > { %603 = vmatpush1.bf16.msra.mxu0 %v1470_v39 }
  0x50   : > { %1386 = vmatprep.subr.bf16.mxu0 %v1552_v6 }
  0x52   : > { %621 = vmatmul.mubr.bf16.vlgmr.msra.gmra.mxu0 %v463_v4  ;;  %v1822_v4 = vld [vmem:[%s1979_s2 + $0x24] ss:$8 sps:$4 sm:$0xff]  }
  0x53   : > { %1388 = vmatprep.mubr.msk.bf16.mxu0 %vm1553_vm0, %v1552_v6  ;;  %1387 = vmatpush3.bf16.msra.mxu0 %v1738_v48 }
  0x54   : > { %1392 = vmatprep.subr.bf16.mxu0 %v1552_v6  ;;  %790 = vmatprep.subr.bf16.mxu1 %v1822_v4 }
  0x55   : > { %791 = vmatpush1.bf16.msra.mxu1 %v1828_v5 }
  0x56   : > { %792 = vmatprep.subr.bf16.mxu1 %v1834_v7 }
  0x59   : > { %793 = vmatpush1.bf16.msra.mxu1 %v1841_v8 }
  0x5a   : > { %794 = vmatprep.subr.bf16.mxu1 %v1847_v9 }
  0xea   : > { %v1378_v11 = vpop.f32.mrf.mxu0 }
  0xeb   : > { %v452_v18 = vmul.f32 2.0, %v1378_v11  ;;  %v1852_v11 = vld [vmem:[%s1979_s2] ss:$8 sps:$4 sm:$0xff]  }
  0xec   : > { %v370_v13 = vpop.f32.mrf.mxu0  ;;  %795 = vmatpush1.bf16.msra.mxu1 %v1852_v11 }
  0xed   : > { %v451_v15 = vmul.f32 2.0, %v370_v13  ;;  %891 = vmatprep.subr.bf16.mxu1 %v1763_v58 }
  0xf2   : > { %v447_v14 = vpop.f32.mrf.mxu0 }
  0xf3   : > { %v456_v16 = vrot.slane %v447_v14, %v455_v12 }
  0xf4   : > { %v1385_v17 = vpop.f32.mrf.mxu0 }
  0xf5   : > { %v457_v19 = vsub.f32 %v451_v15, %v456_v16  ;;  %v1668_v20 = vsub.f32 %v452_v18, %v456_v16 }
  0xf7   : > { %v632_v21 = vsel %vm631_vm1, %v457_v19, -inf  ;;  %v635_v22 = vsel %vm631_vm1, %v1668_v20, -inf }
  0xf8   : > { %633 = vmax.xlane.f32.xlu0 %v632_v21 }
  0xfc   : > { %636 = vmax.xlane.f32.xlu0 %v635_v22 }
 0x181   : > { %v634_v42 = vpop.xlane.xlu0 %633 }
 0x182   : > { %vm638_vm2 = vcmp.ge.f32.partialorder %v457_v19, %v634_v42 }
 0x183   : > { %v640_v43 = vsel %vm638_vm2, %v1729_v41, 16.0 }
 0x184   : > { %v642_v44 = vsel %vm631_vm1, %v640_v43, inf }
 0x185   : > { %643 = vmin.xlane.f32.xlu1 %v642_v44  ;;  %v637_v45 = vpop.xlane.xlu0 %636 }
 0x186   : > { %vm639_vm3 = vcmp.ge.f32.partialorder %v1668_v20, %v637_v45 }
 0x187   : > { %v641_v46 = vsel %vm639_vm3, %v1729_v41, 16.0 }
 0x188   : > { %v645_v47 = vsel %vm631_vm1, %v641_v46, inf }
 0x189   : > { %646 = vmin.xlane.f32.xlu1 %v645_v47 }
 0x20e   : > { %v644_v49 = vpop.xlane.xlu1 %643 }
 0x20f   : > { %vm648_vm4 = vcmp.eq.f32.partialorder %v1729_v41, %v644_v49 }
 0x210   : > { %v1743_v50 = vsel %vm648_vm4, -1e+30, %v457_v19  ;;  %v652_v53 = vsel %vm648_vm4, 1.0, %v1552_v6  ;;  %v1863_v19 = vpop.f32.mrf.mxu0 }
 0x211   : > { %v823_v51 = vsel %vm631_vm1, %v1743_v50, -inf }
 0x212   : > { %824 = vmax.xlane.f32.xlu0 %v823_v51  ;;  %v647_v52 = vpop.xlane.xlu1 %646 }
 0x213   : > { %vm649_vm5 = vcmp.eq.f32.partialorder %v1729_v41, %v647_v52 }
 0x214   : > { %v1750_v54 = vsel %vm649_vm5, -1e+30, %v1668_v20  ;;  %v653_v55 = vsel %vm649_vm5, 1.0, %v1552_v6  ;;  %v1865_v20 = vpop.f32.mrf.mxu0 }
 0x215   : > { %v654_v56 = vpack.c.bf16 %v653_v55, %v652_v53  ;;  %v826_v57 = vsel %vm631_vm1, %v1750_v54, -inf }
 0x216   : > { %827 = vmax.xlane.f32.xlu1 %v826_v57  ;;  %v1867_v21 = vpop.f32.mrf.mxu0 }
 0x217   : > { %1389 = vmatmul.mubr.msk.bf16.vlgmr.msra.gmra.mxu0 %vm631_vm1, %v654_v56 }
 0x218   : > { %1393 = vmatpush3.bf16.msra.mxu0 %v1738_v48  ;;  %1394 = vmatprep.mubr.msk.bf16.mxu0 %vm1553_vm0, %v1552_v6  ;;  %v1869_v22 = vpop.f32.mrf.mxu0 }
 0x219   : > { %1398 = vmatprep.subr.bf16.mxu0 %v1552_v6 }
 0x29b   : > { %v825_v13 = vpop.xlane.xlu0 %824 }
 0x29c   : > { %vm829_vm6 = vcmp.ge.f32.partialorder %v1743_v50, %v825_v13 }
 0x29d   : > { %v831_v14 = vsel %vm829_vm6, %v1729_v41, 16.0 }
 0x29e   : > { %v833_v15 = vsel %vm631_vm1, %v831_v14, inf }
 0x29f   : > { %v828_v16 = vpop.xlane.xlu1 %827  ;;  %834 = vmin.xlane.f32.xlu0 %v833_v15 }
 0x2a0   : > { %vm830_vm7 = vcmp.ge.f32.partialorder %v1750_v54, %v828_v16 }
 0x2a1   : > { %v832_v17 = vsel %vm830_vm7, %v1729_v41, 16.0 }
 0x2a2   : > { %v836_v18 = vsel %vm631_vm1, %v832_v17, inf }
 0x2a3   : > { %837 = vmin.xlane.f32.xlu1 %v836_v18 }
 0x2d7   : > { %v692_v23 = vpop.f32.mrf.mxu0 }
 0x2d9   : > { %v1390_v24 = vpop.f32.mrf.mxu0 }
 0x2db   : > { %v695_v25 = vpop.f32.mrf.mxu0 }
 0x2dc   : > { %v699_v26 = vpack.c.bf16 %v695_v25, %v692_v23 }
 0x2dd   : > { %v1391_v27 = vpop.f32.mrf.mxu0 }
 0x2de   : > { %813 = vmatmul.mubr.bf16.vlgmr.msra.gmra.mxu1 %v699_v26 }
 0x2df   : > { %892 = vmatpush1.bf16.msra.mxu1 %v1768_v59  ;;  %923 = vmatprep.mubr.bf16.mxu1 %v1555_v28 }
 0x2e0   : > { %893 = vmatprep.subr.bf16.mxu1 %v1773_v60 }
 0x2e3   : > { %894 = vmatpush1.bf16.msra.mxu1 %v1780_v61 }
 0x2e4   : > { %895 = vmatprep.subr.bf16.mxu1 %v1786_v62 }
 0x2e7   : > { %896 = vmatpush1.bf16.msra.mxu1 %v1792_v63 }
 0x2e8   : > { %897 = vmatprep.subr.bf16.mxu1 %v1798_v0 }
 0x2eb   : > { %898 = vmatpush1.bf16.msra.mxu1 %v1804_v1 }
 0x2ec   : > { %899 = vmatprep.subr.bf16.mxu1 %v1810_v2 }
 0x2ef   : > { %900 = vmatpush1.bf16.msra.mxu1 %v1816_v3 }
 0x2f0   : > { %901 = vmatprep.subr.bf16.mxu1 %v1822_v4 }
 0x2f3   : > { %902 = vmatpush1.bf16.msra.mxu1 %v1828_v5 }
 0x2f4   : > { %903 = vmatprep.subr.bf16.mxu1 %v1834_v7 }
 0x2f7   : > { %904 = vmatpush1.bf16.msra.mxu1 %v1841_v8 }
 0x2f8   : > { %905 = vmatprep.subr.bf16.mxu1 %v1847_v9 }
 0x2fb   : > { %906 = vmatpush1.bf16.msra.mxu1 %v1852_v11 }
 0x2fc   : > { %1404 = vmatprep.subr.bf16.mxu1 %v1552_v6 }
 0x328   : > { %v835_v29 = vpop.xlane.xlu0 %834 }
 0x329   : > { %vm839_vm8 = vcmp.eq.f32.partialorder %v1729_v41, %v835_v29 }
 0x32a   : > { %v841_v30 = vsel %vm839_vm8, -1e+30, %v1743_v50  ;;  %v843_v33 = vsel %vm839_vm8, 1.0, %v1552_v6 }
 0x32b   : > { %v938_v31 = vsel %vm631_vm1, %v841_v30, -inf }
 0x32c   : > { %v838_v32 = vpop.xlane.xlu1 %837  ;;  %939 = vmax.xlane.f32.xlu0 %v938_v31 }
 0x32d   : > { %vm840_vm9 = vcmp.eq.f32.partialorder %v1729_v41, %v838_v32 }
 0x32e   : > { %v842_v34 = vsel %vm840_vm9, -1e+30, %v1750_v54  ;;  %v844_v35 = vsel %vm840_vm9, 1.0, %v1552_v6 }
 0x32f   : > { %v845_v36 = vpack.c.bf16 %v844_v35, %v843_v33  ;;  %v941_v37 = vsel %vm631_vm1, %v842_v34, -inf }
 0x330   : > { %942 = vmax.xlane.f32.xlu1 %v941_v37 }
 0x331   : > { %1395 = vmatmul.mubr.msk.bf16.vlgmr.msra.gmra.mxu0 %vm631_vm1, %v845_v36 }
 0x332   : > { %1399 = vmatpush3.bf16.msra.mxu0 %v1738_v48  ;;  %1400 = vmatprep.mubr.msk.bf16.mxu0 %vm1553_vm0, %v1552_v6 }
 0x333   : > { %1006 = vmatprep.subr.bf16.mxu0 %v1763_v58 }
 0x3b5   : > { %v940_v38 = vpop.xlane.xlu0 %939 }
 0x3b6   : > { %vm944_vm10 = vcmp.ge.f32.partialorder %v841_v30, %v940_v38 }
 0x3b7   : > { %v946_v39 = vsel %vm944_vm10, %v1729_v41, 16.0 }
 0x3b8   : > { %v948_v40 = vsel %vm631_vm1, %v946_v39, inf }
 0x3b9   : > { %v943_v42 = vpop.xlane.xlu1 %942  ;;  %949 = vmin.xlane.f32.xlu0 %v948_v40 }
 0x3ba   : > { %vm945_vm11 = vcmp.ge.f32.partialorder %v842_v34, %v943_v42 }
 0x3bb   : > { %v947_v43 = vsel %vm945_vm11, %v1729_v41, 16.0 }
 0x3bc   : > { %v951_v44 = vsel %vm631_vm1, %v947_v43, inf }
 0x3bd   : > { %952 = vmin.xlane.f32.xlu1 %v951_v44 }
 0x3f1   : > { %v883_v45 = vpop.f32.mrf.mxu0 }
 0x3f3   : > { %v1396_v46 = vpop.f32.mrf.mxu0 }
 0x3f5   : > { %v886_v47 = vpop.f32.mrf.mxu0 }
 0x3f6   : > { %v890_v49 = vpack.c.bf16 %v886_v47, %v883_v45 }
 0x3f7   : > { %v1397_v50 = vpop.f32.mrf.mxu0 }
 0x3f8   : > { %924 = vmatmul.mubr.bf16.vlgmr.msra.gmra.mxu1 %v890_v49 }
 0x3f9   : > { %1405 = vmatpush3.bf16.msra.mxu1 %v1738_v48  ;;  %1406 = vmatprep.mubr.msk.bf16.mxu1 %vm1553_vm0, %v1552_v6 }
 0x3fa   : > { %1119 = vmatprep.subr.bf16.mxu1 %v1763_v58 }
 0x442   : > { %v950_v51 = vpop.xlane.xlu0 %949 }
 0x443   : > { %vm954_vm12 = vcmp.eq.f32.partialorder %v1729_v41, %v950_v51 }
 0x444   : > { %v956_v52 = vsel %vm954_vm12, -1e+30, %v841_v30  ;;  %v958_v55 = vsel %vm954_vm12, 1.0, %v1552_v6 }
 0x445   : > { %v1053_v53 = vsel %vm631_vm1, %v956_v52, -inf }
 0x446   : > { %v953_v54 = vpop.xlane.xlu1 %952  ;;  %1054 = vmax.xlane.f32.xlu0 %v1053_v53 }
 0x447   : > { %vm955_vm13 = vcmp.eq.f32.partialorder %v1729_v41, %v953_v54 }
 0x448   : > { %v959_v56 = vsel %vm955_vm13, 1.0, %v1552_v6  ;;  %v957_v48 = vsel %vm955_vm13, -1e+30, %v842_v34 }
 0x449   : > { %v960_v57 = vpack.c.bf16 %v959_v56, %v958_v55  ;;  %v1056_v13 = vsel %vm631_vm1, %v957_v48, -inf }
 0x44a   : > { %1057 = vmax.xlane.f32.xlu1 %v1056_v13 }
 0x44b   : > { %1401 = vmatmul.mubr.msk.bf16.vlgmr.msra.gmra.mxu0 %vm631_vm1, %v960_v57 }
 0x44c   : > { %1007 = vmatpush1.bf16.msra.mxu0 %v1768_v59  ;;  %1038 = vmatprep.mubr.bf16.mxu0 %v1555_v28 }
 0x44d   : > { %1008 = vmatprep.subr.bf16.mxu0 %v1773_v60 }
 0x450   : > { %1009 = vmatpush1.bf16.msra.mxu0 %v1780_v61 }
 0x451   : > { %1010 = vmatprep.subr.bf16.mxu0 %v1786_v62 }
 0x454   : > { %1011 = vmatpush1.bf16.msra.mxu0 %v1792_v63 }
 0x455   : > { %1012 = vmatprep.subr.bf16.mxu0 %v1798_v0 }
 0x458   : > { %1013 = vmatpush1.bf16.msra.mxu0 %v1804_v1 }
 0x459   : > { %1014 = vmatprep.subr.bf16.mxu0 %v1810_v2 }
 0x45c   : > { %1015 = vmatpush1.bf16.msra.mxu0 %v1816_v3 }
 0x45d   : > { %1016 = vmatprep.subr.bf16.mxu0 %v1822_v4 }
 0x460   : > { %1017 = vmatpush1.bf16.msra.mxu0 %v1828_v5 }
 0x461   : > { %1018 = vmatprep.subr.bf16.mxu0 %v1834_v7 }
 0x464   : > { %1019 = vmatpush1.bf16.msra.mxu0 %v1841_v8 }
 0x465   : > { %1020 = vmatprep.subr.bf16.mxu0 %v1847_v9 }
 0x468   : > { %1021 = vmatpush1.bf16.msra.mxu0 %v1852_v11 }
 0x4cf   : > { %v1055_v58 = vpop.xlane.xlu0 %1054 }
 0x4d0   : > { %vm1059_vm14 = vcmp.ge.f32.partialorder %v956_v52, %v1055_v58 }
 0x4d1   : > { %v1061_v14 = vsel %vm1059_vm14, %v1729_v41, 16.0 }
 0x4d2   : > { %v1063_v15 = vsel %vm631_vm1, %v1061_v14, inf }
 0x4d3   : > { %v1058_v16 = vpop.xlane.xlu1 %1057  ;;  %1064 = vmin.xlane.f32.xlu0 %v1063_v15 }
 0x4d4   : > { %vm1060_vm15 = vcmp.ge.f32.partialorder %v957_v48, %v1058_v16 }
 0x4d5   : > { %v1062_v17 = vsel %vm1060_vm15, %v1729_v41, 16.0 }
 0x4d6   : > { %v1066_v18 = vsel %vm631_vm1, %v1062_v17, inf }
 0x4d7   : > { %1067 = vmin.xlane.f32.xlu1 %v1066_v18 }
 0x50b   : > { %v998_v23 = vpop.f32.mrf.mxu0 }
 0x50d   : > { %v1402_v24 = vpop.f32.mrf.mxu0 }
 0x50f   : > { %v1001_v25 = vpop.f32.mrf.mxu0 }
 0x510   : > { %v1005_v26 = vpack.c.bf16 %v1001_v25, %v998_v23 }
 0x511   : > { %v1403_v27 = vpop.f32.mrf.mxu0 }
 0x512   : > { %1039 = vmatmul.mubr.bf16.vlgmr.msra.gmra.mxu0 %v1005_v26 }
 0x55c   : > { %v1065_v29 = vpop.xlane.xlu0 %1064 }
 0x55d   : > { %vm1069_vm0 = vcmp.eq.f32.partialorder %v1729_v41, %v1065_v29 }
 0x55e   : > { %v1071_v31 = vsel %vm1069_vm0, 1.0, %v1552_v6 }
 0x560   : > { %v1068_v30 = vpop.xlane.xlu1 %1067 }
 0x561   : > { %vm1070_vm2 = vcmp.eq.f32.partialorder %v1729_v41, %v1068_v30 }
 0x562   : > { %v1072_v32 = vsel %vm1070_vm2, 1.0, %v1552_v6  ;;  %v814_v6 = vpop.f32.mrf.mxu1 }
 0x563   : > { %v1073_v33 = vpack.c.bf16 %v1072_v32, %v1071_v31 }
 0x565   : > { %1407 = vmatmul.mubr.msk.bf16.vlgmr.msra.gmra.mxu1 %vm631_vm1, %v1073_v33 }
 0x566   : > { %1120 = vmatpush1.bf16.msra.mxu1 %v1768_v59  ;;  %1151 = vmatprep.mubr.bf16.mxu1 %v1555_v28  ;;  %v816_v28 = vpop.f32.mrf.mxu1 }
 0x567   : > { %1121 = vmatprep.subr.bf16.mxu1 %v1773_v60 }
 0x568   : > { %v818_v41 = vpop.f32.mrf.mxu1 }
 0x56a   : > { %1122 = vmatpush1.bf16.msra.mxu1 %v1780_v61  ;;  %v820_v59 = vpop.f32.mrf.mxu1 }
 0x56b   : > { %1123 = vmatprep.subr.bf16.mxu1 %v1786_v62 }
 0x56c   : > { %v925_v60 = vpop.f32.mrf.mxu1 }
 0x56d   : > { %v934_v34 = vmax.f32 %v814_v6, %v925_v60 }
 0x56e   : > { %1124 = vmatpush1.bf16.msra.mxu1 %v1792_v63  ;;  %v927_v61 = vpop.f32.mrf.mxu1 }
 0x56f   : > { %1125 = vmatprep.subr.bf16.mxu1 %v1798_v0  ;;  %v935_v36 = vmax.f32 %v816_v28, %v927_v61 }
 0x570   : > { %v929_v62 = vpop.f32.mrf.mxu1 }
 0x571   : > { %v936_v42 = vmax.f32 %v818_v41, %v929_v62 }
 0x572   : > { %1126 = vmatpush1.bf16.msra.mxu1 %v1804_v1  ;;  %v931_v63 = vpop.f32.mrf.mxu1 }
 0x573   : > { %1127 = vmatprep.subr.bf16.mxu1 %v1810_v2  ;;  %v937_v51 = vmax.f32 %v820_v59, %v931_v63 }
 0x576   : > { %1128 = vmatpush1.bf16.msra.mxu1 %v1816_v3 }
 0x577   : > { %1129 = vmatprep.subr.bf16.mxu1 %v1822_v4 }
 0x57a   : > { %1130 = vmatpush1.bf16.msra.mxu1 %v1828_v5 }
 0x57b   : > { %1131 = vmatprep.subr.bf16.mxu1 %v1834_v7  ;;  %v496_v7 = vld [vmem:[#allocation2] sm:$0x3] }
 0x57e   : > { %1132 = vmatpush1.bf16.msra.mxu1 %v1841_v8  ;;  %v504_v8 = vsub.s32 1, %v1663_v10 }
 0x57f   : > { %1133 = vmatprep.subr.bf16.mxu1 %v1847_v9 }
 0x580   : > { %v505_v35 = vrot.slane %v496_v7, %v504_v8 }
 0x582   : > { %1134 = vmatpush1.bf16.msra.mxu1 %v1852_v11  ;;  %v501_v11 = vrot.slane %v496_v7, %v455_v12  ;;  %v625_v46 = vadd.f32 %v1865_v20, %v505_v35  ;;  %v629_v13 = vadd.f32 %v1869_v22, %v505_v35 }
 0x584   : > { %v623_v40 = vadd.f32 %v1863_v19, %v501_v11  ;;  %v627_v12 = vadd.f32 %v1867_v21, %v501_v11 }
 0x5d2   : > { %v1040_v5 = vpop.f32.mrf.mxu0 }
 0x5d3   : > { %v1049_v37 = vmax.f32 %v934_v34, %v1040_v5 }
 0x5d4   : > { %v1042_v9 = vpop.f32.mrf.mxu0 }
 0x5d5   : > { %v1050_v43 = vmax.f32 %v935_v36, %v1042_v9 }
 0x5d6   : > { %v1044_v38 = vpop.f32.mrf.mxu0 }
 0x5d7   : > { %v1051_v47 = vmax.f32 %v936_v42, %v1044_v38 }
 0x5d8   : > { %v1046_v49 = vpop.f32.mrf.mxu0 }
 0x5d9   : > { %v1052_v55 = vmax.f32 %v937_v51, %v1046_v49 }
 0x625   : > { %v1111_v0 = vpop.f32.mrf.mxu1 }
 0x627   : > { %v1408_v1 = vpop.f32.mrf.mxu1 }
 0x629   : > { %v1114_v2 = vpop.f32.mrf.mxu1 }
 0x62a   : > { %v1118_v3 = vpack.c.bf16 %v1114_v2, %v1111_v0 }
 0x62b   : > { %v1409_v4 = vpop.f32.mrf.mxu1 }
 0x62c   : > { %1152 = vmatmul.mubr.bf16.vlgmr.msra.gmra.mxu1 %v1118_v3 }
 0x6ec   : > { %v1153_v39 = vpop.f32.mrf.mxu1 }
 0x6ed   : > { %v1162_v44 = vmax.f32 %v1049_v37, %v1153_v39 }
 0x6ee   : > { %v1155_v45 = vpop.f32.mrf.mxu1 }
 0x6ef   : > { %v1166_v50 = vadd.f32 %v1162_v44, %v623_v40  ;;  %v1163_v10 = vmax.f32 %v1050_v43, %v1155_v45 }
 0x6f0   : > { %v1157_v52 = vpop.f32.mrf.mxu1 }
 0x6f1   : > { %vm1170_vm1 = vcmp.gt.f32.partialorder %v1166_v50, 0.0  ;;  %v1174_v19 = vmul.f32 0.2, %v1166_v50  ;;  %v1167_v53 = vadd.f32 %v1163_v10, %v625_v46  ;;  %v1164_v54 = vmax.f32 %v1051_v47, %v1157_v52 }
 0x6f2   : > { %v1159_v56 = vpop.f32.mrf.mxu1 }
 0x6f3   : > { %v1178_v48 = vsel %vm1170_vm1, %v1166_v50, %v1174_v19  ;;  %vm1171_vm3 = vcmp.gt.f32.partialorder %v1167_v53, 0.0  ;;  %v1175_v20 = vmul.f32 0.2, %v1167_v53  ;;  %v1168_v57 = vadd.f32 %v1164_v54, %v627_v12 }
 0x6f4   : > { %1182 = vst [vmem:[%s297_s16] sm:$0xff] %v1178_v48  ;;  %v1165_v21 = vmax.f32 %v1052_v55, %v1159_v56 }
 0x6f5   : > { %v1179_v58 = vsel %vm1171_vm3, %v1167_v53, %v1175_v20  ;;  %vm1172_vm4 = vcmp.gt.f32.partialorder %v1168_v57, 0.0  ;;  %v1176_v14 = vmul.f32 0.2, %v1168_v57 }
 0x6f6   : > { %1183 = vst [vmem:[%s297_s16 + $0x8] sm:$0xff] %v1179_v58  ;;  %v1169_v15 = vadd.f32 %v1165_v21, %v629_v13 }
 0x6f7   : > { %v1180_v16 = vsel %vm1172_vm4, %v1168_v57, %v1176_v14 }
 0x6f8   : > { %1184 = vst [vmem:[%s297_s16 + $0x10] sm:$0xff] %v1180_v16  ;;  %vm1173_vm5 = vcmp.gt.f32.partialorder %v1169_v15, 0.0  ;;  %v1177_v17 = vmul.f32 0.2, %v1169_v15 }
 0x6fa   : > { %v1181_v18 = vsel %vm1173_vm5, %v1169_v15, %v1177_v17 }
 0x6fb   : > { %1185 = vst [vmem:[%s297_s16 + $0x18] sm:$0xff] %v1181_v18 }
 0x6fc PF: > { %s16_s20 = sadd.s32 1, %s1549_s20   ;;  %s1985_s18 = smov %s1545_s19 }
 0x6fd   : > { %p13_p2 = scmp.ge.s32.totalorder %s16_s20, 4   ;;  %s1986_s19 = smov %s1988_s22 }
 0x6ff   :  { %15 = sbr.rel (!%p13_p2) target bundleno = 2 (0x2), region = 78 }
 0x704   :  { %1218 = vsyncpa [#allocation3], 1 }
 0x705   :  { %1220 = vsyncpa [#allocation3 + $0x1], 1 }

// kernel: dgcnn_encoder.9
= control target key start
LH: loop header
LB: loop body
LE: loop exit
PB: predicated region body
PF: predicated region fallthrough
CT: control target
= control target key end

     0   :  { %12 = vsyncpa [#allocation4], 0  ;;  %s3402_s0 = inlined_call_operand.vmem [shape: f32[2,16,64], index: 0, kind: input, shape index: {}]   ;;  %s3403_s1 = inlined_call_operand.vmem [shape: f32[2,16,64], index: 1, kind: input, shape index: {}]   ;;  %s3404_s2 = inlined_call_operand.vmem [shape: f32[2,16,128], index: 2, kind: input, shape index: {}]   ;;  %s3405_s3 = inlined_call_operand.vmem [shape: f32[2,16,256], index: 3, kind: input, shape index: {}]   ;;  %s3406_s4 = inlined_call_operand.vmem [shape: bf16[512,512], index: 4, kind: input, shape index: {}]   ;;  %s3407_s5 = inlined_call_operand.vmem [shape: f32[1,512], index: 5, kind: input, shape index: {}]   ;;  %s3408_s6 = inlined_call_operand.vmem [shape: f32[512,32], index: 6, kind: input, shape index: {}]   ;;  %s3409_s7 = inlined_call_operand.hbm [shape: f32[2,1,32], index: 7, kind: output, shape index: {}]  }
   0x1   :  { %14 = vsyncpa [#allocation4 + $0x1], 0  ;;  %s2657_s24 = smov 0   ;;  %s2659_s25 = smov 0  }
   0x2   :  { %s2661_s26 = smov 0   ;;  %s2663_s27 = smov 0  }
   0x3   :  { %s2665_s28 = smov 0   ;;  %s2667_s29 = smov 0  }
   0x4 LB: > { %s2063_s30 = sadd.s32 4294967295, %s2611_s29   ;;  %s2064_s8 = sadd.s32 4294967294, %s2611_s29   ;;  %s2611_s29 = sphi %s2667_s29, %s20_s29   ;;  %s2607_s28 = sphi %s2665_s28, %s3418_s28   ;;  %s2603_s27 = sphi %s2663_s27, %s3417_s27   ;;  %s2599_s26 = sphi %s2661_s26, %s3416_s26   ;;  %s2595_s25 = sphi %s2659_s25, %s3415_s25   ;;  %s2591_s24 = sphi %s2657_s24, %s3414_s24  }
   0x5   : > { %s32_s9 = sadd.s32 1, %s2607_s28  ;;  %s214_s10 = sadd.s32 1, %s2599_s26 }
   0x6   : > { %p34_p0 = scmp.ge.s32.totalorder %s32_s9, 2  ;;  %p224_p1 = scmp.ne.s32.totalorder %s2599_s26, %s2595_s25 }
   0x7   : > { %p225_p2 = scmp.eq.s32.totalorder %s2063_s30, 1  ;;  %p230_p3 = scmp.ne.s32.totalorder %s2595_s25, %s2591_s24 }
   0x8   : > { %s3420_s9 = smov (%p34_p0, %s32_s9), 0  ;;  %p231_p5 = scmp.eq.s32.totalorder %s2064_s8, 1 }
   0x9   : > { %p2697_p4 = por %p225_p2, %p224_p1  ;;  %s211_s12 = ssub.s32 %s2607_s28, %s3420_s9 }
   0xa   : > { %p2067_p6 = scmp.ge.s32.totalorder %s2611_s29, 1  ;;  %p212_p7 = scmp.eq.s32.totalorder %s211_s12, 0 }
   0xb   : > { %p2704_p8 = por %p231_p5, %p230_p3  ;;  %p311_p9 = scmp.lt.s32.totalorder %s2611_s29, 3 }
   0xc   : > { %s2710_s14 = scalar_select %p212_p7, %s2599_s26, %s214_s10  }
   0xd   : > { %p312_p10 = pnand %p2067_p6, %p311_p9 }
   0xe   : > { %p375_p11 = scmp.lt.s32.totalorder (!%p312_p10), %s2603_s27, 1  ;;  %s372_s18 = sand.u32 (!%p312_p10), 1, %s2595_s25  }
   0xf   : > { %315 = sbr.rel (%p312_p10) target bundleno = 603 (0x25b), region = 48  ;;  %s2208_s19 = sshll.u32 (!%p312_p10), %s2603_s27, 4 }
  0x10   : > { %s1925_s10 = scalar_lea.sflag (!%p312_p10), [#allocation4], %s372_s18 }
  0x14   : > { %v2343_v0 = vld [vmem:[%s3406_s4 + $0xe4] ss:$16 sps:$4 sm:$0xff]   ;;  %v2345_v1 = vld [vmem:[%s3406_s4 + $0xec] ss:$16 sps:$4 sm:$0xff]   ;;  %v2613_v2 = vmov 0   ;;  %s2728_s23 = scalar_select %p375_p11, %s2603_s27, 1 }
  0x15   : > { %579 = vmatprep.mubr.bf16.mxu0 %v2613_v2  ;;  %622 = vmatprep.mubr.bf16.mxu1 %v2613_v2  ;;  %v2347_v3 = vld [vmem:[%s3406_s4 + $0xe0] ss:$16 sps:$4 sm:$0xff]   ;;  %v2348_v4 = vld [vmem:[%s3406_s4 + $0xe8] ss:$16 sps:$4 sm:$0xff]   ;;  %v2349_v5 = vld [vmem:[%s3406_s4 + $0xc4] ss:$16 sps:$4 sm:$0xff]  }
  0x16   : > { %555 = vmatprep.subr.bf16.mxu0 %v2343_v0  ;;  %598 = vmatprep.subr.bf16.mxu1 %v2345_v1  ;;  %v2351_v6 = vld [vmem:[%s3406_s4 + $0xcc] ss:$16 sps:$4 sm:$0xff]   ;;  %v2353_v7 = vld [vmem:[%s3406_s4 + $0xc0] ss:$16 sps:$4 sm:$0xff]   ;;  %v2354_v8 = vld [vmem:[%s3406_s4 + $0xc8] ss:$16 sps:$4 sm:$0xff]  }
  0x17   : > { %556 = vmatpush1.bf16.msra.mxu0 %v2347_v3  ;;  %599 = vmatpush1.bf16.msra.mxu1 %v2348_v4  ;;  %v2355_v9 = vld [vmem:[%s3406_s4 + $0xa4] ss:$16 sps:$4 sm:$0xff]   ;;  %s2746_s21 = sshll.u32 %s2728_s23, 4  ;;  %v2357_v10 = vld [vmem:[%s3406_s4 + $0xac] ss:$16 sps:$4 sm:$0xff]   ;;  %vm543_vm0 = vcmask 523264  }
  0x18   : > { %557 = vmatprep.subr.bf16.mxu0 %v2349_v5  ;;  %600 = vmatprep.subr.bf16.mxu1 %v2351_v6  ;;  %v2359_v11 = vld [vmem:[%s3406_s4 + $0xa0] ss:$16 sps:$4 sm:$0xff]   ;;  %v2360_v12 = vld [vmem:[%s3406_s4 + $0xa8] ss:$16 sps:$4 sm:$0xff]   ;;  %v2361_v13 = vld [vmem:[%s3406_s4 + $0x84] ss:$16 sps:$4 sm:$0xff]   ;;  %s392_s30 = scalar_lea.vmem %s3403_s1, %s2746_s21  ;;  %s382_s8 = scalar_lea.vmem %s3402_s0, %s2746_s21 }
  0x19   : > { %v2363_v14 = vld [vmem:[%s3406_s4 + $0x8c] ss:$16 sps:$4 sm:$0xff]   ;;  %v2365_v15 = vld [vmem:[%s3406_s4 + $0x80] ss:$16 sps:$4 sm:$0xff]   ;;  %v2366_v16 = vld [vmem:[%s3406_s4 + $0x88] ss:$16 sps:$4 sm:$0xff]   ;;  %s402_s15 = scalar_lea.vmem %s3404_s2, %s2746_s21 }
  0x1a   : > { %v444_v17 = vld [vmem:[%s392_s30] sm:$0xff]  ;;  %v445_v18 = vld [vmem:[%s392_s30 + $0x8] sm:$0xff]  ;;  %vm1922_vm10 = vcmask 253952   ;;  %s1935_s30 = scalar_lea.hbm %s3409_s7, %s2208_s19 }
  0x1b   : > { %558 = vmatpush1.bf16.msra.mxu0 %v2353_v7  ;;  %601 = vmatpush1.bf16.msra.mxu1 %v2354_v8  ;;  %v2369_v19 = vld [vmem:[%s3406_s4 + $0x64] ss:$16 sps:$4 sm:$0xff]   ;;  %v2372_v20 = vld [vmem:[%s3406_s4 + $0x6c] ss:$16 sps:$4 sm:$0xff]   ;;  %v446_v21 = vpack.c.bf16 %v445_v18, %v444_v17  ;;  %v2367_v22 = vld [vmem:[%s3406_s4 + $0x60] ss:$16 sps:$4 sm:$0xff]  }
  0x1c   : > { %559 = vmatprep.subr.bf16.mxu0 %v2355_v9  ;;  %602 = vmatprep.subr.bf16.mxu1 %v2357_v10  ;;  %v2370_v23 = vld [vmem:[%s3406_s4 + $0x68] ss:$16 sps:$4 sm:$0xff]   ;;  %v2375_v24 = vld [vmem:[%s3406_s4 + $0x44] ss:$16 sps:$4 sm:$0xff]   ;;  %v2378_v25 = vld [vmem:[%s3406_s4 + $0x4c] ss:$16 sps:$4 sm:$0xff]  }
  0x1d   : > { %v2373_v26 = vld [vmem:[%s3406_s4 + $0x40] ss:$16 sps:$4 sm:$0xff]   ;;  %v2376_v27 = vld [vmem:[%s3406_s4 + $0x48] ss:$16 sps:$4 sm:$0xff]   ;;  %v2381_v28 = vld [vmem:[%s3406_s4 + $0x24] ss:$16 sps:$4 sm:$0xff]  }
  0x1e   : > { %v2384_v29 = vld [vmem:[%s3406_s4 + $0x2c] ss:$16 sps:$4 sm:$0xff]   ;;  %v2379_v30 = vld [vmem:[%s3406_s4 + $0x20] ss:$16 sps:$4 sm:$0xff]   ;;  %v2382_v31 = vld [vmem:[%s3406_s4 + $0x28] ss:$16 sps:$4 sm:$0xff]  }
  0x1f   : > { %560 = vmatpush1.bf16.msra.mxu0 %v2359_v11  ;;  %603 = vmatpush1.bf16.msra.mxu1 %v2360_v12  ;;  %v2387_v32 = vld [vmem:[%s3406_s4 + $0x4] ss:$16 sps:$4 sm:$0xff]   ;;  %v2390_v33 = vld [vmem:[%s3406_s4 + $0xc] ss:$16 sps:$4 sm:$0xff]   ;;  %v2385_v34 = vld [vmem:[%s3406_s4] ss:$16 sps:$4 sm:$0xff]  }
  0x20   : > { %561 = vmatprep.subr.bf16.mxu0 %v2361_v13  ;;  %604 = vmatprep.subr.bf16.mxu1 %v2363_v14  ;;  %v2388_v35 = vld [vmem:[%s3406_s4 + $0x8] ss:$16 sps:$4 sm:$0xff]   ;;  %v425_v36 = vld [vmem:[%s382_s8] sm:$0xff]  ;;  %v2396_v39 = vld [vmem:[%s3406_s4 + $0x1ec] ss:$16 sps:$4 sm:$0xff]  }
  0x21   : > { %v426_v37 = vld [vmem:[%s382_s8 + $0x8] sm:$0xff]  ;;  %v2393_v38 = vld [vmem:[%s3406_s4 + $0x1e4] ss:$16 sps:$4 sm:$0xff]   ;;  %v2391_v41 = vld [vmem:[%s3406_s4 + $0x1e0] ss:$16 sps:$4 sm:$0xff]   ;;  %s2616_s8 = smov [#allocation3]  }
  0x22   : > { %v427_v40 = vpack.c.bf16 %v426_v37, %v425_v36  ;;  %v2394_v42 = vld [vmem:[%s3406_s4 + $0x1e8] ss:$16 sps:$4 sm:$0xff]   ;;  %v2399_v43 = vld [vmem:[%s3406_s4 + $0x1c4] ss:$16 sps:$4 sm:$0xff]   ;;  %v2402_v44 = vld [vmem:[%s3406_s4 + $0x1cc] ss:$16 sps:$4 sm:$0xff]  }
  0x23   : > { %562 = vmatpush1.bf16.msra.mxu0 %v2365_v15  ;;  %605 = vmatpush1.bf16.msra.mxu1 %v2366_v16  ;;  %v2397_v45 = vld [vmem:[%s3406_s4 + $0x1c0] ss:$16 sps:$4 sm:$0xff]   ;;  %v2400_v46 = vld [vmem:[%s3406_s4 + $0x1c8] ss:$16 sps:$4 sm:$0xff]   ;;  %v2405_v47 = vld [vmem:[%s3406_s4 + $0x1a4] ss:$16 sps:$4 sm:$0xff]  }
  0x24   : > { %724 = vmatprep.subr.bf16.mxu0 %v2369_v19  ;;  %767 = vmatprep.subr.bf16.mxu1 %v2372_v20  ;;  %v2408_v48 = vld [vmem:[%s3406_s4 + $0x1ac] ss:$16 sps:$4 sm:$0xff]   ;;  %v2403_v49 = vld [vmem:[%s3406_s4 + $0x1a0] ss:$16 sps:$4 sm:$0xff]   ;;  %v2406_v50 = vld [vmem:[%s3406_s4 + $0x1a8] ss:$16 sps:$4 sm:$0xff]  }
  0x25   : > { %v2411_v51 = vld [vmem:[%s3406_s4 + $0x184] ss:$16 sps:$4 sm:$0xff]   ;;  %v2414_v52 = vld [vmem:[%s3406_s4 + $0x18c] ss:$16 sps:$4 sm:$0xff]   ;;  %v2409_v53 = vld [vmem:[%s3406_s4 + $0x180] ss:$16 sps:$4 sm:$0xff]  }
  0x26   : > { %2092 = vmatmul.mubr.msk.bf16.vlgmr.msra.gmra.mxu0 %vm543_vm0, %v446_v21  ;;  %2093 = vmatmul.mubr.msk.bf16.vlgmr.msra.gmra.mxu1 %vm543_vm0, %v446_v21  ;;  %v2412_v54 = vld [vmem:[%s3406_s4 + $0x188] ss:$16 sps:$4 sm:$0xff]   ;;  %v2417_v55 = vld [vmem:[%s3406_s4 + $0x164] ss:$16 sps:$4 sm:$0xff]   ;;  %v2420_v56 = vld [vmem:[%s3406_s4 + $0x16c] ss:$16 sps:$4 sm:$0xff]  }
  0x27   : > { %725 = vmatpush1.bf16.msra.mxu0 %v2367_v22  ;;  %768 = vmatpush1.bf16.msra.mxu1 %v2370_v23  ;;  %v2415_v57 = vld [vmem:[%s3406_s4 + $0x160] ss:$16 sps:$4 sm:$0xff]   ;;  %v2418_v58 = vld [vmem:[%s3406_s4 + $0x168] ss:$16 sps:$4 sm:$0xff]   ;;  %v2423_v59 = vld [vmem:[%s3406_s4 + $0x144] ss:$16 sps:$4 sm:$0xff]  }
  0x28   : > { %726 = vmatprep.subr.bf16.mxu0 %v2375_v24  ;;  %769 = vmatprep.subr.bf16.mxu1 %v2378_v25  ;;  %v2426_v60 = vld [vmem:[%s3406_s4 + $0x14c] ss:$16 sps:$4 sm:$0xff]   ;;  %v2421_v61 = vld [vmem:[%s3406_s4 + $0x140] ss:$16 sps:$4 sm:$0xff]   ;;  %v2424_v62 = vld [vmem:[%s3406_s4 + $0x148] ss:$16 sps:$4 sm:$0xff]  }
  0x29   : > { %748 = vmatprep.mubr.bf16.mxu0 %v2613_v2  ;;  %791 = vmatprep.mubr.bf16.mxu1 %v2613_v2  ;;  %v2429_v63 = vld [vmem:[%s3406_s4 + $0x124] ss:$16 sps:$4 sm:$0xff]   ;;  %v2432_v0 = vld [vmem:[%s3406_s4 + $0x12c] ss:$16 sps:$4 sm:$0xff]   ;;  %v2427_v1 = vld [vmem:[%s3406_s4 + $0x120] ss:$16 sps:$4 sm:$0xff]  }
  0x2a   : > { %v2435_v3 = vld [vmem:[%s3406_s4 + $0x104] ss:$16 sps:$4 sm:$0xff]   ;;  %v2438_v4 = vld [vmem:[%s3406_s4 + $0x10c] ss:$16 sps:$4 sm:$0xff]   ;;  %v2433_v5 = vld [vmem:[%s3406_s4 + $0x100] ss:$16 sps:$4 sm:$0xff]  }
  0x2b   : > { %727 = vmatpush1.bf16.msra.mxu0 %v2373_v26  ;;  %770 = vmatpush1.bf16.msra.mxu1 %v2376_v27  ;;  %v2436_v6 = vld [vmem:[%s3406_s4 + $0x108] ss:$16 sps:$4 sm:$0xff]   ;;  %v802_v7 = vld [vmem:[%s402_s15] sm:$0xff]  ;;  %v2444_v10 = vld [vmem:[%s3406_s4 + $0x2ec] ss:$16 sps:$4 sm:$0xff]   ;;  %s2539_s27 = sshll.u32 %s2616_s8, 4  ;;  %s2540_s27 = int_to_ptr.vmem [resolvable:$false] %s2539_s27 }
  0x2c   : > { %728 = vmatprep.subr.bf16.mxu0 %v2381_v28  ;;  %771 = vmatprep.subr.bf16.mxu1 %v2384_v29  ;;  %v803_v8 = vld [vmem:[%s402_s15 + $0x8] sm:$0xff]  ;;  %v2441_v9 = vld [vmem:[%s3406_s4 + $0x2e4] ss:$16 sps:$4 sm:$0xff]   ;;  %v2439_v12 = vld [vmem:[%s3406_s4 + $0x2e0] ss:$16 sps:$4 sm:$0xff]   ;;  %s2214_s15 = sshll.u32 %s2728_s23, 5 }
  0x2d   : > { %v804_v11 = vpack.c.bf16 %v803_v8, %v802_v7  ;;  %v2442_v13 = vld [vmem:[%s3406_s4 + $0x2e8] ss:$16 sps:$4 sm:$0xff]   ;;  %v2447_v14 = vld [vmem:[%s3406_s4 + $0x2c4] ss:$16 sps:$4 sm:$0xff]   ;;  %v2450_v15 = vld [vmem:[%s3406_s4 + $0x2cc] ss:$16 sps:$4 sm:$0xff]   ;;  %s3009_s21 = scalar_lea.vmem %s3405_s3, %s2214_s15 }
  0x2e   : > { %v2445_v16 = vld [vmem:[%s3406_s4 + $0x2c0] ss:$16 sps:$4 sm:$0xff]   ;;  %v2448_v17 = vld [vmem:[%s3406_s4 + $0x2c8] ss:$16 sps:$4 sm:$0xff]   ;;  %v2453_v18 = vld [vmem:[%s3406_s4 + $0x2a4] ss:$16 sps:$4 sm:$0xff]  }
  0x2f   : > { %729 = vmatpush1.bf16.msra.mxu0 %v2379_v30  ;;  %772 = vmatpush1.bf16.msra.mxu1 %v2382_v31  ;;  %v2456_v19 = vld [vmem:[%s3406_s4 + $0x2ac] ss:$16 sps:$4 sm:$0xff]   ;;  %v2451_v20 = vld [vmem:[%s3406_s4 + $0x2a0] ss:$16 sps:$4 sm:$0xff]   ;;  %v2454_v21 = vld [vmem:[%s3406_s4 + $0x2a8] ss:$16 sps:$4 sm:$0xff]  }
  0x30   : > { %730 = vmatprep.subr.bf16.mxu0 %v2387_v32  ;;  %773 = vmatprep.subr.bf16.mxu1 %v2390_v33  ;;  %v2459_v22 = vld [vmem:[%s3406_s4 + $0x284] ss:$16 sps:$4 sm:$0xff]   ;;  %v2462_v23 = vld [vmem:[%s3406_s4 + $0x28c] ss:$16 sps:$4 sm:$0xff]   ;;  %v2457_v24 = vld [vmem:[%s3406_s4 + $0x280] ss:$16 sps:$4 sm:$0xff]  }
  0x31   : > { %v2460_v25 = vld [vmem:[%s3406_s4 + $0x288] ss:$16 sps:$4 sm:$0xff]   ;;  %v2465_v26 = vld [vmem:[%s3406_s4 + $0x264] ss:$16 sps:$4 sm:$0xff]   ;;  %v2468_v27 = vld [vmem:[%s3406_s4 + $0x26c] ss:$16 sps:$4 sm:$0xff]  }
  0x32   : > { %v2463_v28 = vld [vmem:[%s3406_s4 + $0x260] ss:$16 sps:$4 sm:$0xff]   ;;  %v2466_v29 = vld [vmem:[%s3406_s4 + $0x268] ss:$16 sps:$4 sm:$0xff]   ;;  %v2471_v30 = vld [vmem:[%s3406_s4 + $0x244] ss:$16 sps:$4 sm:$0xff]  }
  0x33   : > { %731 = vmatpush1.bf16.msra.mxu0 %v2385_v34  ;;  %774 = vmatpush1.bf16.msra.mxu1 %v2388_v35  ;;  %v2474_v31 = vld [vmem:[%s3406_s4 + $0x24c] ss:$16 sps:$4 sm:$0xff]   ;;  %v2469_v32 = vld [vmem:[%s3406_s4 + $0x240] ss:$16 sps:$4 sm:$0xff]   ;;  %v2472_v33 = vld [vmem:[%s3406_s4 + $0x248] ss:$16 sps:$4 sm:$0xff]  }
  0x34   : > { %997 = vmatprep.subr.bf16.mxu0 %v2393_v38  ;;  %1040 = vmatprep.subr.bf16.mxu1 %v2396_v39  ;;  %v2477_v34 = vld [vmem:[%s3406_s4 + $0x224] ss:$16 sps:$4 sm:$0xff]   ;;  %v2480_v35 = vld [vmem:[%s3406_s4 + $0x22c] ss:$16 sps:$4 sm:$0xff]   ;;  %v2475_v38 = vld [vmem:[%s3406_s4 + $0x220] ss:$16 sps:$4 sm:$0xff]  }
  0x35   : > { %v1092_v36 = vld [vmem:[%s3009_s21 + $0x8] sm:$0xff]  ;;  %v1094_v37 = vld [vmem:[%s3009_s21 + $0x18] sm:$0xff]  ;;  %v2523_v7 = vld [vmem:[%s3406_s4 + $0x320] ss:$16 sps:$4 sm:$0xff]   ;;  %s2541_s16 = scalar_lea.vmem %s2540_s27, 32 }
  0x36   : > { %2110 = vmatmul.mubr.msk.bf16.vlgmr.msra.gmra.mxu0 %vm543_vm0, %v427_v40  ;;  %2111 = vmatmul.mubr.msk.bf16.vlgmr.msra.gmra.mxu1 %vm543_vm0, %v427_v40  ;;  %v2478_v39 = vld [vmem:[%s3406_s4 + $0x228] ss:$16 sps:$4 sm:$0xff]   ;;  %v1096_v40 = vpack.c.bf16 %v1094_v37, %v1092_v36 }
  0x37   : > { %998 = vmatpush1.bf16.msra.mxu0 %v2391_v41  ;;  %1041 = vmatpush1.bf16.msra.mxu1 %v2394_v42  ;;  %v2483_v41 = vld [vmem:[%s3406_s4 + $0x204] ss:$16 sps:$4 sm:$0xff]   ;;  %v2486_v42 = vld [vmem:[%s3406_s4 + $0x20c] ss:$16 sps:$4 sm:$0xff]   ;;  %v2526_v8 = vld [vmem:[%s3406_s4 + $0x328] ss:$16 sps:$4 sm:$0xff]  }
  0x38   : > { %999 = vmatprep.subr.bf16.mxu0 %v2399_v43  ;;  %1042 = vmatprep.subr.bf16.mxu1 %v2402_v44  ;;  %v2481_v43 = vld [vmem:[%s3406_s4 + $0x200] ss:$16 sps:$4 sm:$0xff]   ;;  %v2484_v44 = vld [vmem:[%s3406_s4 + $0x208] ss:$16 sps:$4 sm:$0xff]  }
  0x39   : > { %1029 = vmatprep.mubr.bf16.mxu0 %v2613_v2  ;;  %1072 = vmatprep.mubr.bf16.mxu1 %v2613_v2  ;;  %v2430_v2 = vld [vmem:[%s3406_s4 + $0x128] ss:$16 sps:$4 sm:$0xff]  }
  0x3a   : > { %v1756_v36 = vld [vmem:[%s3408_s6 + $0x1d8] sm:$0xff] }
  0x3b   : > { %1000 = vmatpush1.bf16.msra.mxu0 %v2397_v45  ;;  %1043 = vmatpush1.bf16.msra.mxu1 %v2400_v46  ;;  %v2489_v45 = vld [vmem:[%s3406_s4 + $0x3e4] ss:$16 sps:$4 sm:$0xff]   ;;  %v2492_v46 = vld [vmem:[%s3406_s4 + $0x3ec] ss:$16 sps:$4 sm:$0xff]  }
  0x3c   : > { %1001 = vmatprep.subr.bf16.mxu0 %v2405_v47  ;;  %1044 = vmatprep.subr.bf16.mxu1 %v2408_v48  ;;  %v2487_v47 = vld [vmem:[%s3406_s4 + $0x3e0] ss:$16 sps:$4 sm:$0xff]   ;;  %v2490_v48 = vld [vmem:[%s3406_s4 + $0x3e8] ss:$16 sps:$4 sm:$0xff]  }
  0x3d   : > { %v1708_v37 = vld [vmem:[%s3408_s6 + $0x58] sm:$0xff] }
  0x3f   : > { %1002 = vmatpush1.bf16.msra.mxu0 %v2403_v49  ;;  %1045 = vmatpush1.bf16.msra.mxu1 %v2406_v50  ;;  %v2495_v49 = vld [vmem:[%s3406_s4 + $0x3c4] ss:$16 sps:$4 sm:$0xff]   ;;  %v2498_v50 = vld [vmem:[%s3406_s4 + $0x3cc] ss:$16 sps:$4 sm:$0xff]  }
  0x40   : > { %1003 = vmatprep.subr.bf16.mxu0 %v2411_v51  ;;  %1046 = vmatprep.subr.bf16.mxu1 %v2414_v52  ;;  %v2493_v51 = vld [vmem:[%s3406_s4 + $0x3c0] ss:$16 sps:$4 sm:$0xff]   ;;  %v2496_v52 = vld [vmem:[%s3406_s4 + $0x3c8] ss:$16 sps:$4 sm:$0xff]  }
  0x43   : > { %1004 = vmatpush1.bf16.msra.mxu0 %v2409_v53  ;;  %1047 = vmatpush1.bf16.msra.mxu1 %v2412_v54  ;;  %v2501_v53 = vld [vmem:[%s3406_s4 + $0x3a4] ss:$16 sps:$4 sm:$0xff]   ;;  %v2504_v54 = vld [vmem:[%s3406_s4 + $0x3ac] ss:$16 sps:$4 sm:$0xff]  }
  0x44   : > { %1005 = vmatprep.subr.bf16.mxu0 %v2417_v55  ;;  %1048 = vmatprep.subr.bf16.mxu1 %v2420_v56  ;;  %v2499_v55 = vld [vmem:[%s3406_s4 + $0x3a0] ss:$16 sps:$4 sm:$0xff]   ;;  %v2502_v56 = vld [vmem:[%s3406_s4 + $0x3a8] ss:$16 sps:$4 sm:$0xff]  }
  0x47   : > { %1006 = vmatpush1.bf16.msra.mxu0 %v2415_v57  ;;  %1049 = vmatpush1.bf16.msra.mxu1 %v2418_v58  ;;  %v2507_v57 = vld [vmem:[%s3406_s4 + $0x384] ss:$16 sps:$4 sm:$0xff]   ;;  %v2510_v58 = vld [vmem:[%s3406_s4 + $0x38c] ss:$16 sps:$4 sm:$0xff]  }
  0x48   : > { %1007 = vmatprep.subr.bf16.mxu0 %v2423_v59  ;;  %1050 = vmatprep.subr.bf16.mxu1 %v2426_v60  ;;  %v2505_v59 = vld [vmem:[%s3406_s4 + $0x380] ss:$16 sps:$4 sm:$0xff]   ;;  %v2508_v60 = vld [vmem:[%s3406_s4 + $0x388] ss:$16 sps:$4 sm:$0xff]  }
  0x4b   : > { %1008 = vmatpush1.bf16.msra.mxu0 %v2421_v61  ;;  %1051 = vmatpush1.bf16.msra.mxu1 %v2424_v62  ;;  %v2513_v61 = vld [vmem:[%s3406_s4 + $0x364] ss:$16 sps:$4 sm:$0xff]   ;;  %v2516_v62 = vld [vmem:[%s3406_s4 + $0x36c] ss:$16 sps:$4 sm:$0xff]  }
  0x4c   : > { %1009 = vmatprep.subr.bf16.mxu0 %v2429_v63  ;;  %1052 = vmatprep.subr.bf16.mxu1 %v2432_v0  ;;  %v2511_v63 = vld [vmem:[%s3406_s4 + $0x360] ss:$16 sps:$4 sm:$0xff]   ;;  %v2514_v0 = vld [vmem:[%s3406_s4 + $0x368] ss:$16 sps:$4 sm:$0xff]  }
  0x4f   : > { %1010 = vmatpush1.bf16.msra.mxu0 %v2427_v1  ;;  %1053 = vmatpush1.bf16.msra.mxu1 %v2430_v2  ;;  %v2519_v1 = vld [vmem:[%s3406_s4 + $0x344] ss:$16 sps:$4 sm:$0xff]   ;;  %v2522_v2 = vld [vmem:[%s3406_s4 + $0x34c] ss:$16 sps:$4 sm:$0xff]  }
  0x50   : > { %1011 = vmatprep.subr.bf16.mxu0 %v2435_v3  ;;  %1054 = vmatprep.subr.bf16.mxu1 %v2438_v4  ;;  %v2517_v3 = vld [vmem:[%s3406_s4 + $0x340] ss:$16 sps:$4 sm:$0xff]   ;;  %v2520_v4 = vld [vmem:[%s3406_s4 + $0x348] ss:$16 sps:$4 sm:$0xff]  }
  0x53   : > { %1012 = vmatpush1.bf16.msra.mxu0 %v2433_v5  ;;  %1055 = vmatpush1.bf16.msra.mxu1 %v2436_v6  ;;  %v2525_v5 = vld [vmem:[%s3406_s4 + $0x324] ss:$16 sps:$4 sm:$0xff]   ;;  %v2528_v6 = vld [vmem:[%s3406_s4 + $0x32c] ss:$16 sps:$4 sm:$0xff]  }
  0x54   : > { %1481 = vmatprep.subr.bf16.mxu0 %v2441_v9  ;;  %1524 = vmatprep.subr.bf16.mxu1 %v2444_v10  ;;  %v2531_v9 = vld [vmem:[%s3406_s4 + $0x304] ss:$16 sps:$4 sm:$0xff]   ;;  %v2534_v10 = vld [vmem:[%s3406_s4 + $0x30c] ss:$16 sps:$4 sm:$0xff]  }
  0x56   : > { %1030 = vmatmul.mubr.bf16.vlgmr.msra.gmra.mxu0 %v804_v11  ;;  %1073 = vmatmul.mubr.bf16.vlgmr.msra.gmra.mxu1 %v804_v11  ;;  %v2529_v11 = vld [vmem:[%s3406_s4 + $0x300] ss:$16 sps:$4 sm:$0xff]  }
  0x57   : > { %1482 = vmatpush1.bf16.msra.mxu0 %v2439_v12  ;;  %1525 = vmatpush1.bf16.msra.mxu1 %v2442_v13  ;;  %v2532_v12 = vld [vmem:[%s3406_s4 + $0x308] ss:$16 sps:$4 sm:$0xff]   ;;  %v1091_v13 = vld [vmem:[%s3009_s21] sm:$0xff] }
  0x58   : > { %1483 = vmatprep.subr.bf16.mxu0 %v2447_v14  ;;  %1526 = vmatprep.subr.bf16.mxu1 %v2450_v15  ;;  %v1093_v14 = vld [vmem:[%s3009_s21 + $0x10] sm:$0xff]  ;;  %s373_s21 = scalar_lea.vmem [#allocation3], %s372_s18 }
  0x59   : > { %1513 = vmatprep.mubr.bf16.mxu0 %v1096_v40  ;;  %1556 = vmatprep.mubr.bf16.mxu1 %v1096_v40  ;;  %v1095_v15 = vpack.c.bf16 %v1093_v14, %v1091_v13  ;;  %v1755_v40 = vld [vmem:[%s3408_s6 + $0x1d0] sm:$0xff]  ;;  %v1698_v13 = vld [vmem:[%s3408_s6 + $0x8] sm:$0xff]  ;;  %s1937_s20 = sshll.u32 %s373_s21, 4  ;;  %s1938_s20 = int_to_ptr.vmem [resolvable:$true] %s1937_s20 }
  0x5a   : > { %v1730_v14 = vld [vmem:[%s3408_s6 + $0x108] sm:$0xff]  ;;  %s2535_s12 = scalar_lea.vmem %s1938_s20, 16  ;;  %p2542_p1 = scmp.lt.s32.totalorder %s1938_s20, %s2540_s27 }
  0x5b   : > { %1484 = vmatpush1.bf16.msra.mxu0 %v2445_v16  ;;  %1527 = vmatpush1.bf16.msra.mxu1 %v2448_v17  ;;  %v420_v16 = vlaneseq  ;;  %p2536_p12 = scmp.ne.s32.totalorder %s1938_s20, %s2535_s12  ;;  %p2543_p2 = scmp.lt.s32.totalorder %s2541_s16, %s2535_s12 }
  0x5c   : > { %1485 = vmatprep.subr.bf16.mxu0 %v2453_v18  ;;  %1528 = vmatprep.subr.bf16.mxu1 %v2456_v19  ;;  %v2614_v18 = vmov -inf   ;;  %v1728_v19 = vld [vmem:[%s3408_s6 + $0xf8] sm:$0xff] }
  0x5d   : > { %vm3136_vm1 = vcmp.lt.s32.totalorder %v420_v16, 512  ;;  %p2537_p13 = pnand %p2536_p12, %p2697_p4  ;;  %p2544_p3 = por %p2543_p2, %p2542_p1 }
  0x5e   : > { %424 = vst.msk [vmem:[#allocation2] sm:$0xf] %vm3136_vm1, %v2614_v18  ;;  %v1745_v18 = vld [vmem:[%s3408_s6 + $0x180] sm:$0xff] }
  0x5f   : > { %1486 = vmatpush1.bf16.msra.mxu0 %v2451_v20  ;;  %1529 = vmatpush1.bf16.msra.mxu1 %v2454_v21  ;;  %v1760_v20 = vld [vmem:[%s3408_s6 + $0x1f8] sm:$0xff]  ;;  %p2538_p0 = pneg %p2537_p13 }
  0x60   : > { %1487 = vmatprep.subr.bf16.mxu0 %v2459_v22  ;;  %1530 = vmatprep.subr.bf16.mxu1 %v2462_v23  ;;  %v1712_v21 = vld [vmem:[%s3408_s6 + $0x78] sm:$0xff]  ;;  %v1727_v23 = vld [vmem:[%s3408_s6 + $0xf0] sm:$0xff] }
  0x61   : > { %v1744_v22 = vld [vmem:[%s3408_s6 + $0x178] sm:$0xff]  ;;  %p2545_p5 = pnand %p2544_p3, %p2538_p0 }
  0x63   : > { %1488 = vmatpush1.bf16.msra.mxu0 %v2457_v24  ;;  %1531 = vmatpush1.bf16.msra.mxu1 %v2460_v25  ;;  %v1759_v24 = vld [vmem:[%s3408_s6 + $0x1f0] sm:$0xff] }
  0x64   : > { %1489 = vmatprep.subr.bf16.mxu0 %v2465_v26  ;;  %1532 = vmatprep.subr.bf16.mxu1 %v2468_v27  ;;  %v1711_v25 = vld [vmem:[%s3408_s6 + $0x70] sm:$0xff]  ;;  %v1726_v27 = vld [vmem:[%s3408_s6 + $0xe8] sm:$0xff] }
  0x65   : > { %v1743_v26 = vld [vmem:[%s3408_s6 + $0x170] sm:$0xff] }
  0x67   : > { %1490 = vmatpush1.bf16.msra.mxu0 %v2463_v28  ;;  %1533 = vmatpush1.bf16.msra.mxu1 %v2466_v29  ;;  %v1758_v28 = vld [vmem:[%s3408_s6 + $0x1e8] sm:$0xff] }
  0x68   : > { %1491 = vmatprep.subr.bf16.mxu0 %v2471_v30  ;;  %1534 = vmatprep.subr.bf16.mxu1 %v2474_v31  ;;  %v1710_v29 = vld [vmem:[%s3408_s6 + $0x68] sm:$0xff]  ;;  %v1725_v31 = vld [vmem:[%s3408_s6 + $0xe0] sm:$0xff] }
  0x69   : > { %v1742_v30 = vld [vmem:[%s3408_s6 + $0x168] sm:$0xff] }
  0x6b   : > { %1492 = vmatpush1.bf16.msra.mxu0 %v2469_v32  ;;  %1535 = vmatpush1.bf16.msra.mxu1 %v2472_v33  ;;  %v1757_v32 = vld [vmem:[%s3408_s6 + $0x1e0] sm:$0xff] }
  0x6c   : > { %1493 = vmatprep.subr.bf16.mxu0 %v2477_v34  ;;  %1536 = vmatprep.subr.bf16.mxu1 %v2480_v35  ;;  %v1709_v33 = vld [vmem:[%s3408_s6 + $0x60] sm:$0xff]  ;;  %v1724_v35 = vld [vmem:[%s3408_s6 + $0xd8] sm:$0xff] }
  0x6d   : > { %v1741_v34 = vld [vmem:[%s3408_s6 + $0x160] sm:$0xff] }
  0x6f   : > { %1494 = vmatpush1.bf16.msra.mxu0 %v2475_v38  ;;  %1537 = vmatpush1.bf16.msra.mxu1 %v2478_v39  ;;  %v1740_v38 = vld [vmem:[%s3408_s6 + $0x158] sm:$0xff]  ;;  %v1723_v39 = vld [vmem:[%s3408_s6 + $0xd0] sm:$0xff] }
  0x70   : > { %1495 = vmatprep.subr.bf16.mxu0 %v2483_v41  ;;  %1538 = vmatprep.subr.bf16.mxu1 %v2486_v42  ;;  %v1707_v41 = vld [vmem:[%s3408_s6 + $0x50] sm:$0xff] }
  0x71   : > { %v1739_v42 = vld [vmem:[%s3408_s6 + $0x150] sm:$0xff] }
  0x73   : > { %1496 = vmatpush1.bf16.msra.mxu0 %v2481_v43  ;;  %1539 = vmatpush1.bf16.msra.mxu1 %v2484_v44  ;;  %v1722_v43 = vld [vmem:[%s3408_s6 + $0xc8] sm:$0xff] }
  0x74   : > { %1497 = vmatprep.subr.bf16.mxu0 %v2489_v45  ;;  %1540 = vmatprep.subr.bf16.mxu1 %v2492_v46  ;;  %v1754_v44 = vld [vmem:[%s3408_s6 + $0x1c8] sm:$0xff] }
  0x75   : > { %v1706_v45 = vld [vmem:[%s3408_s6 + $0x48] sm:$0xff] }
  0x76   : > { %v1738_v46 = vld [vmem:[%s3408_s6 + $0x148] sm:$0xff] }
  0x77   : > { %1498 = vmatpush2.bf16.msra.mxu0 %v2487_v47  ;;  %1541 = vmatpush2.bf16.msra.mxu1 %v2490_v48  ;;  %v1721_v47 = vld [vmem:[%s3408_s6 + $0xc0] sm:$0xff] }
  0x78   : > { %1499 = vmatprep.subr.bf16.mxu0 %v2495_v49  ;;  %1542 = vmatprep.subr.bf16.mxu1 %v2498_v50  ;;  %v1753_v48 = vld [vmem:[%s3408_s6 + $0x1c0] sm:$0xff] }
  0x79   : > { %v1705_v49 = vld [vmem:[%s3408_s6 + $0x40] sm:$0xff] }
  0x7a   : > { %v1737_v50 = vld [vmem:[%s3408_s6 + $0x140] sm:$0xff] }
  0x7b   : > { %1500 = vmatpush2.bf16.msra.mxu0 %v2493_v51  ;;  %1543 = vmatpush2.bf16.msra.mxu1 %v2496_v52  ;;  %v1720_v51 = vld [vmem:[%s3408_s6 + $0xb8] sm:$0xff] }
  0x7c   : > { %1501 = vmatprep.subr.bf16.mxu0 %v2501_v53  ;;  %1544 = vmatprep.subr.bf16.mxu1 %v2504_v54  ;;  %v1752_v52 = vld [vmem:[%s3408_s6 + $0x1b8] sm:$0xff] }
  0x7d   : > { %v1704_v53 = vld [vmem:[%s3408_s6 + $0x38] sm:$0xff] }
  0x7e   : > { %v1736_v54 = vld [vmem:[%s3408_s6 + $0x138] sm:$0xff] }
  0x7f   : > { %1502 = vmatpush2.bf16.msra.mxu0 %v2499_v55  ;;  %1545 = vmatpush2.bf16.msra.mxu1 %v2502_v56  ;;  %v1719_v55 = vld [vmem:[%s3408_s6 + $0xb0] sm:$0xff] }
  0x80   : > { %1503 = vmatprep.subr.bf16.mxu0 %v2507_v57  ;;  %1546 = vmatprep.subr.bf16.mxu1 %v2510_v58  ;;  %v1751_v56 = vld [vmem:[%s3408_s6 + $0x1b0] sm:$0xff] }
  0x81   : > { %v1703_v57 = vld [vmem:[%s3408_s6 + $0x30] sm:$0xff] }
  0x82   : > { %v1735_v58 = vld [vmem:[%s3408_s6 + $0x130] sm:$0xff] }
  0x83   : > { %1504 = vmatpush2.bf16.msra.mxu0 %v2505_v59  ;;  %1547 = vmatpush2.bf16.msra.mxu1 %v2508_v60  ;;  %v1718_v59 = vld [vmem:[%s3408_s6 + $0xa8] sm:$0xff] }
  0x84   : > { %1505 = vmatprep.subr.bf16.mxu0 %v2513_v61  ;;  %1548 = vmatprep.subr.bf16.mxu1 %v2516_v62  ;;  %v1750_v60 = vld [vmem:[%s3408_s6 + $0x1a8] sm:$0xff] }
  0x85   : > { %v1702_v61 = vld [vmem:[%s3408_s6 + $0x28] sm:$0xff] }
  0x86   : > { %v1734_v62 = vld [vmem:[%s3408_s6 + $0x128] sm:$0xff] }
  0x87   : > { %1506 = vmatpush2.bf16.msra.mxu0 %v2511_v63  ;;  %1549 = vmatpush2.bf16.msra.mxu1 %v2514_v0  ;;  %v1717_v63 = vld [vmem:[%s3408_s6 + $0xa0] sm:$0xff] }
  0x88   : > { %1507 = vmatprep.subr.bf16.mxu0 %v2519_v1  ;;  %1550 = vmatprep.subr.bf16.mxu1 %v2522_v2  ;;  %v1749_v0 = vld [vmem:[%s3408_s6 + $0x1a0] sm:$0xff] }
  0x89   : > { %v1701_v1 = vld [vmem:[%s3408_s6 + $0x20] sm:$0xff] }
  0x8a   : > { %v1733_v2 = vld [vmem:[%s3408_s6 + $0x120] sm:$0xff] }
  0x8b   : > { %1508 = vmatpush2.bf16.msra.mxu0 %v2517_v3  ;;  %1551 = vmatpush2.bf16.msra.mxu1 %v2520_v4  ;;  %v1716_v3 = vld [vmem:[%s3408_s6 + $0x98] sm:$0xff] }
  0x8c   : > { %1509 = vmatprep.subr.bf16.mxu0 %v2525_v5  ;;  %1552 = vmatprep.subr.bf16.mxu1 %v2528_v6  ;;  %v1748_v4 = vld [vmem:[%s3408_s6 + $0x198] sm:$0xff] }
  0x8d   : > { %v1700_v5 = vld [vmem:[%s3408_s6 + $0x18] sm:$0xff] }
  0x8e   : > { %v1732_v6 = vld [vmem:[%s3408_s6 + $0x118] sm:$0xff] }
  0x8f   : > { %1510 = vmatpush2.bf16.msra.mxu0 %v2523_v7  ;;  %1553 = vmatpush2.bf16.msra.mxu1 %v2526_v8  ;;  %v1715_v7 = vld [vmem:[%s3408_s6 + $0x90] sm:$0xff] }
  0x90   : > { %1511 = vmatprep.subr.bf16.mxu0 %v2531_v9  ;;  %1554 = vmatprep.subr.bf16.mxu1 %v2534_v10  ;;  %v1747_v8 = vld [vmem:[%s3408_s6 + $0x190] sm:$0xff] }
  0x91   : > { %v1699_v9 = vld [vmem:[%s3408_s6 + $0x10] sm:$0xff] }
  0x92   : > { %v1731_v10 = vld [vmem:[%s3408_s6 + $0x110] sm:$0xff] }
  0x93   : > { %1512 = vmatpush2.bf16.msra.mxu0 %v2529_v11  ;;  %1555 = vmatpush2.bf16.msra.mxu1 %v2532_v12  ;;  %v1714_v11 = vld [vmem:[%s3408_s6 + $0x88] sm:$0xff] }
  0x94   : > { %2215 = vmatprep.subr.mxu0 %v1728_v19  ;;  %2250 = vmatprep.subr.mxu1 %v1760_v20  ;;  %v1746_v12 = vld [vmem:[%s3408_s6 + $0x188] sm:$0xff]  ;;  %v1697_v19 = vld [vmem:[%s3408_s6] sm:$0xff] }
  0x95   : > { %v1729_v20 = vld [vmem:[%s3408_s6 + $0x100] sm:$0xff] }
  0x96   : > { %1514 = vmatmul.mubr.bf16.vlgmr.msra.gmra.mxu0 %v1095_v15  ;;  %1557 = vmatmul.mubr.bf16.vlgmr.msra.gmra.mxu1 %v1095_v15  ;;  %v1713_v15 = vld [vmem:[%s3408_s6 + $0x80] sm:$0xff] }
  0x97   : > { %2216 = vmatpush3.msra.mxu0 %v1712_v21  ;;  %2251 = vmatpush3.msra.mxu1 %v1744_v22 }
  0x98   : > { %2217 = vmatprep.subr.mxu0 %v1727_v23  ;;  %2252 = vmatprep.subr.mxu1 %v1759_v24 }
  0x99   : > { %2218 = vmatpush3.msra.mxu0 %v1711_v25  ;;  %2253 = vmatpush3.msra.mxu1 %v1743_v26 }
  0x9a   : > { %2219 = vmatprep.subr.mxu0 %v1726_v27  ;;  %2254 = vmatprep.subr.mxu1 %v1758_v28 }
  0x9b   : > { %2220 = vmatpush3.msra.mxu0 %v1710_v29  ;;  %2255 = vmatpush3.msra.mxu1 %v1742_v30 }
  0x9c   : > { %2221 = vmatprep.subr.mxu0 %v1725_v31  ;;  %2256 = vmatprep.subr.mxu1 %v1757_v32 }
  0x9d   : > { %2222 = vmatpush3.msra.mxu0 %v1709_v33  ;;  %2257 = vmatpush3.msra.mxu1 %v1741_v34 }
  0x9e   : > { %2223 = vmatprep.subr.mxu0 %v1724_v35  ;;  %2258 = vmatprep.subr.mxu1 %v1756_v36 }
  0x9f   : > { %2224 = vmatpush3.msra.mxu0 %v1708_v37  ;;  %2259 = vmatpush3.msra.mxu1 %v1740_v38 }
  0xa0   : > { %2225 = vmatprep.subr.mxu0 %v1723_v39  ;;  %2260 = vmatprep.subr.mxu1 %v1755_v40 }
  0xa1   : > { %2226 = vmatpush3.msra.mxu0 %v1707_v41  ;;  %2261 = vmatpush3.msra.mxu1 %v1739_v42  ;;  %v3335_v41 = vshrl.u32 %v420_v16, 7 }
  0xa2   : > { %2227 = vmatprep.subr.mxu0 %v1722_v43  ;;  %2262 = vmatprep.subr.mxu1 %v1754_v44 }
  0xa3   : > { %2228 = vmatpush3.msra.mxu0 %v1706_v45  ;;  %2263 = vmatpush3.msra.mxu1 %v1738_v46  ;;  %v1579_v44 = vsub.s32 0, %v3335_v41  ;;  %v1587_v45 = vsub.s32 2, %v3335_v41  ;;  %v1575_v46 = vld [vmem:[%s3407_s5] sm:$0xf] }
  0xa4   : > { %2229 = vmatprep.subr.mxu0 %v1721_v47  ;;  %2264 = vmatprep.subr.mxu1 %v1753_v48  ;;  %v1583_v47 = vsub.s32 1, %v3335_v41  ;;  %v1591_v48 = vsub.s32 3, %v3335_v41 }
  0xa5   : > { %2230 = vmatpush3.msra.mxu0 %v1705_v49  ;;  %2265 = vmatpush3.msra.mxu1 %v1737_v50  ;;  %v1580_v16 = vrot.slane %v1575_v46, %v1579_v44 }
  0xa6   : > { %2231 = vmatprep.subr.mxu0 %v1720_v51  ;;  %2266 = vmatprep.subr.mxu1 %v1752_v52 }
  0xa7   : > { %2232 = vmatpush3.msra.mxu0 %v1704_v53  ;;  %2267 = vmatpush3.msra.mxu1 %v1736_v54  ;;  %v1588_v53 = vrot.slane %v1575_v46, %v1587_v45 }
  0xa8   : > { %2233 = vmatprep.subr.mxu0 %v1719_v55  ;;  %2268 = vmatprep.subr.mxu1 %v1751_v56 }
  0xa9   : > { %2234 = vmatpush3.msra.mxu0 %v1703_v57  ;;  %2269 = vmatpush3.msra.mxu1 %v1735_v58 }
  0xaa   : > { %2235 = vmatprep.subr.mxu0 %v1718_v59  ;;  %2270 = vmatprep.subr.mxu1 %v1750_v60  ;;  %v1584_v60 = vrot.slane %v1575_v46, %v1583_v47 }
  0xab   : > { %2236 = vmatpush3.msra.mxu0 %v1702_v61  ;;  %2271 = vmatpush3.msra.mxu1 %v1734_v62  ;;  %v1592_v61 = vrot.slane %v1575_v46, %v1591_v48 }
  0xac   : > { %2237 = vmatprep.subr.mxu0 %v1717_v63  ;;  %2272 = vmatprep.subr.mxu1 %v1749_v0 }
  0xad   : > { %2238 = vmatpush3.msra.mxu0 %v1701_v1  ;;  %2273 = vmatpush3.msra.mxu1 %v1733_v2 }
  0xae   : > { %2239 = vmatprep.subr.mxu0 %v1716_v3  ;;  %2274 = vmatprep.subr.mxu1 %v1748_v4 }
  0xaf   : > { %2240 = vmatpush3.msra.mxu0 %v1700_v5  ;;  %2275 = vmatpush3.msra.mxu1 %v1732_v6 }
  0xb0   : > { %2241 = vmatprep.subr.mxu0 %v1715_v7  ;;  %2276 = vmatprep.subr.mxu1 %v1747_v8 }
  0xb1   : > { %2242 = vmatpush3.msra.mxu0 %v1699_v9  ;;  %2277 = vmatpush3.msra.mxu1 %v1731_v10 }
  0xb2   : > { %2243 = vmatprep.subr.mxu0 %v1714_v11  ;;  %2278 = vmatprep.subr.mxu1 %v1746_v12 }
  0xb3   : > { %2244 = vmatpush3.msra.mxu0 %v1698_v13  ;;  %2279 = vmatpush3.msra.mxu1 %v1730_v14 }
  0xb4   : > { %2245 = vmatprep.subr.mxu0 %v1713_v15  ;;  %2280 = vmatprep.subr.mxu1 %v1745_v18 }
  0xb5   : > { %2246 = vmatpush3.msra.mxu0 %v1697_v19  ;;  %2281 = vmatpush3.msra.mxu1 %v1729_v20 }
  0xe6   : > { %v581_v21 = vpop.f32.mrf.mxu0  ;;  %v624_v22 = vpop.f32.mrf.mxu1 }
  0xe8   : > { %v583_v23 = vpop.f32.mrf.mxu0  ;;  %v626_v24 = vpop.f32.mrf.mxu1 }
  0xea   : > { %v585_v25 = vpop.f32.mrf.mxu0  ;;  %v628_v26 = vpop.f32.mrf.mxu1 }
  0xec   : > { %v587_v27 = vpop.f32.mrf.mxu0  ;;  %v630_v28 = vpop.f32.mrf.mxu1 }
  0xf6   : > { %v750_v29 = vpop.f32.mrf.mxu0  ;;  %v793_v30 = vpop.f32.mrf.mxu1 }
  0xf7   : > { %v751_v49 = vadd.f32 %v750_v29, %v581_v21  ;;  %v794_v50 = vadd.f32 %v793_v30, %v624_v22 }
  0xf8   : > { %v752_v31 = vpop.f32.mrf.mxu0  ;;  %v795_v32 = vpop.f32.mrf.mxu1 }
  0xf9   : > { %v753_v54 = vadd.f32 %v752_v31, %v583_v23  ;;  %v796_v55 = vadd.f32 %v795_v32, %v626_v24 }
  0xfa   : > { %v754_v33 = vpop.f32.mrf.mxu0  ;;  %v797_v34 = vpop.f32.mrf.mxu1 }
  0xfb   : > { %v755_v2 = vadd.f32 %v754_v33, %v585_v25  ;;  %v798_v3 = vadd.f32 %v797_v34, %v628_v26 }
  0xfc   : > { %v756_v35 = vpop.f32.mrf.mxu0  ;;  %v799_v36 = vpop.f32.mrf.mxu1 }
  0xfd   : > { %v757_v4 = vadd.f32 %v756_v35, %v587_v27  ;;  %v800_v5 = vadd.f32 %v799_v36, %v630_v28 }
 0x116   : > { %v1031_v37 = vpop.f32.mrf.mxu0  ;;  %v1074_v38 = vpop.f32.mrf.mxu1 }
 0x117   : > { %v1083_v56 = vadd.f32 %v1031_v37, %v751_v49  ;;  %v1085_v57 = vadd.f32 %v1074_v38, %v794_v50 }
 0x118   : > { %v1033_v39 = vpop.f32.mrf.mxu0  ;;  %v1076_v40 = vpop.f32.mrf.mxu1 }
 0x119   : > { %v1084_v62 = vadd.f32 %v1033_v39, %v753_v54  ;;  %v1086_v63 = vadd.f32 %v1076_v40, %v796_v55 }
 0x11a   : > { %v1035_v42 = vpop.f32.mrf.mxu0  ;;  %v1078_v43 = vpop.f32.mrf.mxu1 }
 0x11b   : > { %v1087_v12 = vadd.f32 %v1035_v42, %v755_v2  ;;  %v1089_v13 = vadd.f32 %v1078_v43, %v798_v3 }
 0x11c   : > { %v1037_v51 = vpop.f32.mrf.mxu0  ;;  %v1080_v52 = vpop.f32.mrf.mxu1 }
 0x11d   : > { %v1088_v18 = vadd.f32 %v1037_v51, %v757_v4  ;;  %v1090_v19 = vadd.f32 %v1080_v52, %v800_v5 }
 0x156   : > { %v1515_v58 = vpop.f32.mrf.mxu0  ;;  %v1558_v59 = vpop.f32.mrf.mxu1 }
 0x157   : > { %v1567_v0 = vadd.f32 %v1515_v58, %v1083_v56  ;;  %v1569_v1 = vadd.f32 %v1558_v59, %v1085_v57 }
 0x158   : > { %v1517_v6 = vpop.f32.mrf.mxu0  ;;  %v1560_v7 = vpop.f32.mrf.mxu1 }
 0x159   : > { %v1597_v8 = vadd.f32 %v1580_v16, %v1567_v0  ;;  %v1599_v9 = vadd.f32 %v1588_v53, %v1569_v1  ;;  %v1568_v10 = vadd.f32 %v1517_v6, %v1084_v62  ;;  %v1570_v11 = vadd.f32 %v1560_v7, %v1086_v63 }
 0x15a   : > { %v1519_v14 = vpop.f32.mrf.mxu0  ;;  %v1562_v15 = vpop.f32.mrf.mxu1  ;;  %v2615_v62 = vmov 1966171168  }
 0x15b   : > { %v1613_v20 = vmul.f32 0.2, %v1597_v8  ;;  %v1615_v21 = vmul.f32 0.2, %v1599_v9  ;;  %v1598_v22 = vadd.f32 %v1584_v60, %v1568_v10  ;;  %v1600_v23 = vadd.f32 %v1592_v61, %v1570_v11 }
 0x15c   : > { %v1571_v24 = vadd.f32 %v1519_v14, %v1087_v12  ;;  %v1573_v25 = vadd.f32 %v1562_v15, %v1089_v13  ;;  %v1521_v26 = vpop.f32.mrf.mxu0  ;;  %v1564_v27 = vpop.f32.mrf.mxu1  ;;  %vm1605_vm2 = vcmp.gt.f32.partialorder %v1597_v8, 0.0  ;;  %vm1607_vm3 = vcmp.gt.f32.partialorder %v1599_v9, 0.0 }
 0x15d   : > { %v1572_v28 = vadd.f32 %v1521_v26, %v1088_v18  ;;  %v1574_v29 = vadd.f32 %v1564_v27, %v1090_v19  ;;  %v1614_v30 = vmul.f32 0.2, %v1598_v22  ;;  %v1616_v31 = vmul.f32 0.2, %v1600_v23  ;;  %v1629_v27 = vld [vmem:[#allocation2] sm:$0xf] }
 0x15e   : > { %v1601_v32 = vadd.f32 %v1580_v16, %v1571_v24  ;;  %v1603_v33 = vadd.f32 %v1588_v53, %v1573_v25  ;;  %v1621_v36 = vsel %vm1605_vm2, %v1597_v8, %v1613_v20  ;;  %v1623_v37 = vsel %vm1607_vm3, %v1599_v9, %v1615_v21 }
 0x15f   : > { %v1602_v34 = vadd.f32 %v1584_v60, %v1572_v28  ;;  %v1604_v35 = vadd.f32 %v1592_v61, %v1574_v29  ;;  %vm1606_vm4 = vcmp.gt.f32.partialorder %v1598_v22, 0.0  ;;  %vm1608_vm5 = vcmp.gt.f32.partialorder %v1600_v23, 0.0 }
 0x160   : > { %vm1609_vm6 = vcmp.gt.f32.partialorder %v1601_v32, 0.0  ;;  %v1617_v38 = vmul.f32 0.2, %v1601_v32  ;;  %vm1611_vm7 = vcmp.gt.f32.partialorder %v1603_v33, 0.0  ;;  %v1619_v39 = vmul.f32 0.2, %v1603_v33 }
 0x161   : > { %vm1610_vm8 = vcmp.gt.f32.partialorder %v1602_v34, 0.0  ;;  %v1618_v40 = vmul.f32 0.2, %v1602_v34  ;;  %vm1612_vm9 = vcmp.gt.f32.partialorder %v1604_v35, 0.0  ;;  %v1620_v42 = vmul.f32 0.2, %v1604_v35 }
 0x162   : > { %v1622_v43 = vsel %vm1606_vm4, %v1598_v22, %v1614_v30  ;;  %v1624_v46 = vsel %vm1608_vm5, %v1600_v23, %v1616_v31  ;;  %v1625_v49 = vsel %vm1609_vm6, %v1601_v32, %v1617_v38  ;;  %v1627_v50 = vsel %vm1611_vm7, %v1603_v33, %v1619_v39 }
 0x163   : > { %v1630_v51 = vmax.f32 %v1621_v36, %v1625_v49  ;;  %v1644_v52 = vmax.f32 %v1623_v37, %v1627_v50  ;;  %v1626_v16 = vsel %vm1610_vm8, %v1602_v34, %v1618_v40  ;;  %v1628_v53 = vsel %vm1612_vm9, %v1604_v35, %v1620_v42 }
 0x164   : > { %v1637_v54 = vmax.f32 %v1622_v43, %v1626_v16  ;;  %v1651_v55 = vmax.f32 %v1624_v46, %v1628_v53  ;;  %v1665_v63 = vunpack.c.l.s4 %v2615_v62 }
 0x165   : > { %v1631_v56 = vrot.slane %v1630_v51, 4  ;;  %v1645_v57 = vrot.slane %v1644_v52, 4 }
 0x166   : > { %v1638_v58 = vrot.slane %v1637_v54, 4  ;;  %v1652_v59 = vrot.slane %v1651_v55, 4  ;;  %v1666_v8 = vunpack.c.0.s8 %v1665_v63 }
 0x167   : > { %v1632_v60 = vmax.f32 %v1630_v51, %v1631_v56  ;;  %v1646_v61 = vmax.f32 %v1644_v52, %v1645_v57 }
 0x168   : > { %v1639_v0 = vmax.f32 %v1637_v54, %v1638_v58  ;;  %v1653_v1 = vmax.f32 %v1651_v55, %v1652_v59  ;;  %v1669_v15 = vsub.s32 %v1666_v8, %v3335_v41 }
 0x169   : > { %v1633_v2 = vrot.slane %v1632_v60, 2  ;;  %v1647_v3 = vrot.slane %v1646_v61, 2 }
 0x16a   : > { %v1640_v4 = vrot.slane %v1639_v0, 2  ;;  %v1654_v5 = vrot.slane %v1653_v1, 2 }
 0x16b   : > { %v1634_v6 = vmax.f32 %v1632_v60, %v1633_v2  ;;  %v1648_v7 = vmax.f32 %v1646_v61, %v1647_v3 }
 0x16c   : > { %v1641_v9 = vmax.f32 %v1639_v0, %v1640_v4  ;;  %v1655_v10 = vmax.f32 %v1653_v1, %v1654_v5 }
 0x16d   : > { %v1635_v11 = vrot.slane %v1634_v6, 1  ;;  %v1649_v12 = vrot.slane %v1648_v7, 1 }
 0x16e   : > { %v1642_v13 = vrot.slane %v1641_v9, 1  ;;  %v1656_v14 = vrot.slane %v1655_v10, 1 }
 0x16f   : > { %v1636_v18 = vmax.f32 %v1634_v6, %v1635_v11  ;;  %v1650_v19 = vmax.f32 %v1648_v7, %v1649_v12 }
 0x170   : > { %v1643_v20 = vmax.f32 %v1641_v9, %v1642_v13  ;;  %v1657_v21 = vmax.f32 %v1655_v10, %v1656_v14 }
 0x172   : > { %v1662_v22 = vcombine.low %v1636_v18, %v1643_v20  ;;  %v1663_v23 = vcombine.low %v1650_v19, %v1657_v21 }
 0x174   : > { %v1670_v24 = vrot.slane %v1662_v22, %v1669_v15  ;;  %v1677_v25 = vrot.slane %v1663_v23, %v1669_v15 }
 0x176   : > { %v1678_v26 = vcombine.low %v1670_v24, %v1677_v25 }
 0x178   : > { %v1685_v28 = vrot.slane %v1678_v26, %v1669_v15 }
 0x17a   : > { %v1687_v29 = vmax.f32 %v1629_v27, %v1685_v28 }
 0x17c   : > { %1692 = vst.msk [vmem:[#allocation2] sm:$0xf] %vm3136_vm1, %v1687_v29 }
 0x183   : > { %v1696_v30 = vld [vmem:[#allocation2] sm:$0xf] }
 0x184   : > { %v1769_v31 = vrot.slane %v1696_v30, %v1583_v47  ;;  %v1777_v32 = vrot.slane %v1696_v30, %v1591_v48  ;;  %v1765_v33 = vrot.slane %v1696_v30, %v1579_v44  ;;  %v1773_v34 = vrot.slane %v1696_v30, %v1587_v45 }
 0x186   : > { %1846 = vmatprep.mubr.f32.mxu0 %v1769_v31  ;;  %1916 = vmatprep.mubr.f32.mxu1 %v1777_v32 }
 0x187   : > { %1847 = vmatmul.mubr.f32.vlgmr.msra.gmra.mxu0 %v1765_v33  ;;  %1917 = vmatmul.mubr.f32.vlgmr.msra.gmra.mxu1 %v1773_v34 }
 0x247   : > { %v2247_v17 = vpop.f32.mrf.mxu0  ;;  %v2282_v35 = vpop.f32.mrf.mxu1 }
 0x249   : > { %v2248_v36 = vpop.f32.mrf.mxu0  ;;  %v2283_v37 = vpop.f32.mrf.mxu1 }
 0x24a   : > { %v2249_v47 = vadd.f32 %v2248_v36, %v2247_v17  ;;  %v2284_v48 = vadd.f32 %v2283_v37, %v2282_v35 }
 0x24c   : > { %v1919_v44 = vadd.f32 %v2284_v48, %v2249_v47 }
 0x24e   : > { %1923 = vst.msk [vmem:[%s373_s21] sm:$0x1] %vm1922_vm10, %v1919_v44 }
 0x24f   : > { %2548 = shalt.err (!%p2545_p5)
}
 0x250   : > { %s2549_s15 = scalar_lea.hbm %s1935_s30, 16  ;;  %s2553_s19 = scalar_lea.hbm %s3409_s7, 32 }
 0x251   : > { %p2550_p6 = scmp.ne.s32.totalorder %s1935_s30, %s2549_s15  ;;  %p2554_p10 = scmp.lt.s32.totalorder %s1935_s30, %s3409_s7 }
 0x252   : > { %p2555_p11 = scmp.lt.s32.totalorder %s2553_s19, %s2549_s15 }
 0x253   : > { %p2551_p7 = pnand %p2550_p6, %p2697_p4 }
 0x254   : > { %p2556_p12 = por %p2555_p11, %p2554_p10 }
 0x255   : > { %p2552_p9 = pneg %p2551_p7 }
 0x257   : > { %p2557_p13 = pnand %p2556_p12, %p2552_p9 }
 0x259   : > { %2560 = shalt.err (!%p2557_p13)
}
 0x25a   : > { %2285 = dma.vmem_to_hbm [thread:$0]  (%p2697_p4), %s1938_s20, 16, %s1935_s30, %s1925_s10  }
 0x25b PF: > { %p2291_p0 = scmp.ge.s32.totalorder %s2611_s29, 2  ;;  %s1949_s23 = sand.u32 1, %s2591_s24  }
 0x25c   : > { %s1950_s12 = scalar_lea.sflag [#allocation4], %s1949_s23 }
 0x25d   : > { %p2288_p1 = pnand %p2291_p0, %p2704_p8 }
 0x25f   : > { %p2289_p2 = pneg %p2288_p1 }
 0x261   : > { %2586 = dma.done.wait (%p2289_p2), %s1950_s12, 16  }
 0x262   : > { %2588 = vsyncadd (%p2289_p2), %s1950_s12, 4294967280  ;;  %s20_s29 = sadd.s32 1, %s2611_s29   ;;  %s3414_s24 = smov %s2595_s25 }
 0x263   : > { %p17_p3 = scmp.ge.s32.totalorder %s20_s29, 4   ;;  %s3415_s25 = smov %s2599_s26 }
 0x264   : > { %s3416_s26 = smov %s2710_s14  ;;  %s3417_s27 = smov %s2607_s28 }
 0x265   : > { %s3418_s28 = smov %s3420_s9  ;;  %19 = sbr.rel (!%p17_p3) target bundleno = 4 (0x4), region = 100 }
 0x26a   :  { %1954 = vsyncpa [#allocation4], 1 }
 0x26b   :  { %1956 = vsyncpa [#allocation4 + $0x1], 1 }

</bundles_post_ra>
